<compile_context>
chip_gen: v7x
topology: tpu7x:2x2x1
jax: 0.10.0
libtpu: 0.0.40
codegen_flags: <defaults>
</compile_context>

<pallas_src>
import numpy as np
import jax
import jax.numpy as jnp
from jax.experimental import pallas as pl
from jax.experimental.pallas import tpu as pltpu

# ----------------------------- model hyper-params ---------------------------
LOOKBACK = 23
NUM_FEATURES = 4
INPUT_SIZE = NUM_FEATURES * LOOKBACK          # 92
OUTPUT_SIZE = 5
K = 4                                         # conv kernel width
C1_OUT = 80
C2_OUT = 40
L1 = LOOKBACK - K + 1                         # 20  (conv1, stride 1)
L2 = (L1 - K) // 2 + 1                        # 9   (conv2, stride 2)
C1_FLAT = L1 * C1_OUT                         # 1600 (conv1 activations, flat)
CONV_FLAT = C2_OUT * L2                       # 360  (conv2 activations, flat)
CAT_DIM = INPUT_SIZE + CONV_FLAT              # 452
H1, H2 = 64, 32
BATCH = 2

# Packed small-weight slab row offsets (all multiples of 8).
WS_L1X_OFF = 0                                # l1_w rows acting on X      (92, 64)
WS_L1C_OFF = 96                               # l1_w rows acting on conv   (360, 64)
WS_L2_OFF = 456                               # l2_w zero-padded           (64, 64)
WS_L3_OFF = 520                               # l3_w zero-padded           (64, 64)
WS_ROWS = 584

# Packed bias row lane offsets (all multiples of 128).
B1_OFF = 0                                    # conv1 bias tiled to 1600
B2_OFF = 1664                                 # conv2 bias tiled to 360
BL1_OFF = 2048                                # l1 bias (64)
BL2_OFF = 2176                                # l2 bias (32, zero-padded to 64)
BL3_OFF = 2304                                # l3 bias (5,  zero-padded to 64)
BIAS_W = 2432

MAX_BATCH_TILE = 256


# ------------------------------- Pallas kernel ------------------------------
def fused_forward_kernel(x_ref, w1t_ref, w2t_ref, ws_ref, bias_ref, o_ref):
    """Whole CNNModel forward for one batch tile: 6 batched matmuls, no loops.

    x_ref   : (TB, 92)       raw input rows
    w1t_ref : (92, 1600)     Toeplitz conv1 weight, out column = l*80 + o
    w2t_ref : (1600, 360)    Toeplitz stride-2 conv2 weight, out column = o2*9 + l2
                             (== torch flatten order, so l1_w[92:] applies directly)
    ws_ref  : (584, 64)      packed small weights (l1x / l1c / l2 / l3, zero-padded)
    bias_ref: (1, 2432)      packed biases (conv biases pre-tiled to flat layouts)
    o_ref   : (TB, 5)
    """
    x = x_ref[...]                                                   # (TB, 92)

    # conv1 + ReLU: one Toeplitz matmul, output layout col = l*80 + o.
    h1 = jnp.maximum(
        jnp.dot(x, w1t_ref[...], preferred_element_type=jnp.float32)
        + bias_ref[:, B1_OFF:B1_OFF + C1_FLAT], 0.0)                 # (TB, 1600)

    # conv2 (stride 2) + ReLU: one Toeplitz matmul, output layout col = o2*9 + l2
    # (exactly torch's reshape(B, -1) order -> no permutation needed below).
    y2 = jnp.maximum(
        jnp.dot(h1, w2t_ref[...], preferred_element_type=jnp.float32)
        + bias_ref[:, B2_OFF:B2_OFF + CONV_FLAT], 0.0)               # (TB, 360)

    # Linear(452, 64) on cat([X, y2], 1), realized as a split matmul (no concat),
    # then ReLU.  Dropout(0.1) is identity at inference.
    z1 = (jnp.dot(x, ws_ref[WS_L1X_OFF:WS_L1X_OFF + INPUT_SIZE, :],
                  preferred_element_type=jnp.float32)
          + jnp.dot(y2, ws_ref[WS_L1C_OFF:WS_L1C_OFF + CONV_FLAT, :],
                    preferred_element_type=jnp.float32)
          + bias_ref[:, BL1_OFF:BL1_OFF + H1])
    h = jnp.maximum(z1, 0.0)                                         # (TB, 64)

    # Linear(64, 32) + Tanh.  l2_w / l2_b are zero-padded to 64 lanes and
    # tanh(0) = 0, so the pad lanes of h2 stay exactly zero.
    h2 = jnp.tanh(
        jnp.dot(h, ws_ref[WS_L2_OFF:WS_L2_OFF + H1, :],
                preferred_element_type=jnp.float32)
        + bias_ref[:, BL2_OFF:BL2_OFF + H1])                         # (TB, 64)

    # Linear(32, 5).  Rows 32:64 / lanes 5:64 of the padded l3 block are zero.
    out = (jnp.dot(h2, ws_ref[WS_L3_OFF:WS_L3_OFF + H1, :],
                   preferred_element_type=jnp.float32)
           + bias_ref[:, BL3_OFF:BL3_OFF + H1])                      # (TB, 64)

    o_ref[...] = out[:, 0:OUTPUT_SIZE]                               # single store


# --------------------------------- wrappers ---------------------------------
def prepare_kernel_params(params):
    """One-time host-side conversion of torch-layout params into kernel layout."""
    w1 = np.asarray(params["conv1_w"], np.float32)      # (80, 4, 4)   (o, c, k)
    b1 = np.asarray(params["conv1_b"], np.float32)      # (80,)
    w2 = np.asarray(params["conv2_w"], np.float32)      # (40, 80, 4)  (o2, c2, k)
    b2 = np.asarray(params["conv2_b"], np.float32)      # (40,)
    l1w = np.asarray(params["l1_w"], np.float32)        # (452, 64)
    l2w = np.asarray(params["l2_w"], np.float32)        # (64, 32)
    l3w = np.asarray(params["l3_w"], np.float32)        # (32, 5)

    # Toeplitz-expanded conv1 weight (92, 1600): W1T[c*23+t, l*80+o] = w1[o,c,t-l].
    w1t = np.zeros((INPUT_SIZE, C1_FLAT), np.float32)
    for l in range(L1):
        for k in range(K):
            for c in range(NUM_FEATURES):
                w1t[c * LOOKBACK + l + k, l * C1_OUT:(l + 1) * C1_OUT] = w1[:, c, k]

    # Toeplitz-expanded stride-2 conv2 weight (1600, 360):
    # W2T[(2*l2+k)*80 + c2, o2*9 + l2] = w2[o2, c2, k]  (torch flatten column order).
    w2t = np.zeros((C1_FLAT, CONV_FLAT), np.float32)
    for l2 in range(L2):
        for k in range(K):
            pos = 2 * l2 + k
            w2t[pos * C1_OUT:(pos + 1) * C1_OUT, l2::L2] = w2[:, :, k].T

    # Packed small-weight slab (584, 64), 8-aligned row offsets, zero padded.
    ws = np.zeros((WS_ROWS, H1), np.float32)
    ws[WS_L1X_OFF:WS_L1X_OFF + INPUT_SIZE, :] = l1w[:INPUT_SIZE, :]
    ws[WS_L1C_OFF:WS_L1C_OFF + CONV_FLAT, :] = l1w[INPUT_SIZE:, :]
    ws[WS_L2_OFF:WS_L2_OFF + H1, :H2] = l2w
    ws[WS_L3_OFF:WS_L3_OFF + H2, :OUTPUT_SIZE] = l3w

    # Packed bias row (1, 2432), 128-lane-aligned segments; conv biases are
    # pre-tiled to match the Toeplitz output layouts.
    bias = np.zeros((1, BIAS_W), np.float32)
    bias[0, B1_OFF:B1_OFF + C1_FLAT] = np.tile(b1, L1)          # b1t[l*80+o] = b1[o]
    bias[0, B2_OFF:B2_OFF + CONV_FLAT] = np.repeat(b2, L2)      # b2t[o*9+l]  = b2[o]
    bias[0, BL1_OFF:BL1_OFF + H1] = np.asarray(params["l1_b"], np.float32).reshape(-1)
    bias[0, BL2_OFF:BL2_OFF + H2] = np.asarray(params["l2_b"], np.float32).reshape(-1)
    bias[0, BL3_OFF:BL3_OFF + OUTPUT_SIZE] = \
        np.asarray(params["l3_b"], np.float32).reshape(-1)

    return {"w1t": jnp.asarray(w1t), "w2t": jnp.asarray(w2t),
            "ws": jnp.asarray(ws), "bias": jnp.asarray(bias)}


@jax.jit
def cnn_model_forward(X, kp):
    B = X.shape[0]
    tb = B if B <= MAX_BATCH_TILE else MAX_BATCH_TILE      # batch tile per grid step
    nb = pl.cdiv(B, tb)
    bp = nb * tb
    xp = X if bp == B else jnp.pad(X, ((0, bp - B), (0, 0)))

    out = pl.pallas_call(
        fused_forward_kernel,
        out_shape=jax.ShapeDtypeStruct((bp, OUTPUT_SIZE), jnp.float32),
        grid=(nb,),
        in_specs=[
            pl.BlockSpec((tb, INPUT_SIZE), lambda i: (i, 0)),
            pl.BlockSpec((INPUT_SIZE, C1_FLAT), lambda i: (0, 0)),   # weights stay
            pl.BlockSpec((C1_FLAT, CONV_FLAT), lambda i: (0, 0)),    # VMEM-resident
            pl.BlockSpec((WS_ROWS, H1), lambda i: (0, 0)),           # across steps
            pl.BlockSpec((1, BIAS_W), lambda i: (0, 0)),
        ],
        out_specs=pl.BlockSpec((tb, OUTPUT_SIZE), lambda i: (i, 0)),
        compiler_params=pltpu.CompilerParams(
            dimension_semantics=("parallel",)),                      # v7x: 2 TCs
    )(xp, kp["w1t"], kp["w2t"], kp["ws"], kp["bias"])
    return out if bp == B else out[:B]


# --------------------------- pure-JAX reference ------------------------------
def reference_forward(X, params):
    B = X.shape[0]
    x2 = X.reshape(B, NUM_FEATURES, LOOKBACK)
    w1, b1 = params["conv1_w"], params["conv1_b"]
    w2, b2 = params["conv2_w"], params["conv2_b"]
    y1 = jnp.zeros((B, C1_OUT, L1), jnp.float32)
    for k in range(K):
        y1 = y1 + jnp.einsum("bcl,oc->bol", x2[:, :, k:k + L1], w1[:, :, k])
    y1 = jnp.maximum(y1 + b1[None, :, None], 0.0)
    y2 = jnp.zeros((B, C2_OUT, L2), jnp.float32)
    for k in range(K):
        y2 = y2 + jnp.einsum("bcl,oc->bol", y1[:, :, k:k + 2 * L2:2], w2[:, :, k])
    y2 = jnp.maximum(y2 + b2[None, :, None], 0.0)
    x_cat = jnp.concatenate([X, y2.reshape(B, -1)], axis=1)
    h = jnp.maximum(x_cat @ params["l1_w"] + params["l1_b"], 0.0)
    h = jnp.tanh(h @ params["l2_w"] + params["l2_b"])
    return h @ params["l3_w"] + params["l3_b"]


# ----------------------------------- main ------------------------------------
def init_params(key):
    ks = jax.random.split(key, 10)
    s = 0.05
    return {
        "conv1_w": s * jax.random.normal(ks[0], (C1_OUT, NUM_FEATURES, K), jnp.float32),
        "conv1_b": s * jax.random.normal(ks[1], (C1_OUT,), jnp.float32),
        "conv2_w": s * jax.random.normal(ks[2], (C2_OUT, C1_OUT, K), jnp.float32),
        "conv2_b": s * jax.random.normal(ks[3], (C2_OUT,), jnp.float32),
        "l1_w": s * jax.random.normal(ks[4], (CAT_DIM, H1), jnp.float32),
        "l1_b": s * jax.random.normal(ks[5], (1, H1), jnp.float32),
        "l2_w": s * jax.random.normal(ks[6], (H1, H2), jnp.float32),
        "l2_b": s * jax.random.normal(ks[7], (1, H2), jnp.float32),
        "l3_w": s * jax.random.normal(ks[8], (H2, OUTPUT_SIZE), jnp.float32),
        "l3_b": s * jax.random.normal(ks[9], (1, OUTPUT_SIZE), jnp.float32),
    }


if __name__ == "__main__":
    key = jax.random.PRNGKey(0)
    pkey, xkey = jax.random.split(key)
    params = init_params(pkey)
    kparams = prepare_kernel_params(params)   # one-time, kernel-layout weights
    X = jax.random.normal(xkey, (BATCH, INPUT_SIZE), jnp.float32)

    out = jax.block_until_ready(cnn_model_forward(X, kparams))
    ref = jax.block_until_ready(reference_forward(X, params))

    assert out.shape == (BATCH, OUTPUT_SIZE)
    # Toeplitz folding only re-associates / adds exact zeros -> tight f32 tolerance.
    assert bool(jnp.allclose(out, ref, atol=5e-5, rtol=5e-4)), "mismatch vs reference"

    print("KERNEL_OK")
</pallas_src>

<mosaic_0001>
module attributes {stable_mosaic.version = 11 : i64} {
  func.func @fused_forward_kernel(%arg0: i32, %arg1: memref<2x92xf32, #tpu.memory_space<vmem>>, %arg2: memref<92x1600xf32, #tpu.memory_space<vmem>>, %arg3: memref<1600x360xf32, #tpu.memory_space<vmem>>, %arg4: memref<584x64xf32, #tpu.memory_space<vmem>>, %arg5: memref<1x2432xf32, #tpu.memory_space<vmem>>, %arg6: memref<2x5xf32, #tpu.memory_space<vmem>>) attributes {dimension_semantics = [#tpu.dimension_semantics<parallel>], iteration_bounds = array<i64: 1>, scalar_prefetch = 0 : i64, scratch_operands = 0 : i64, tpu.core_type = #tpu.core_type<tc>, window_params = [{transform_indices = @transform_0, window_bounds = array<i64: 2, 92>}, {pipeline_mode = #tpu.pipeline_mode<synchronous>, transform_indices = @transform_1, window_bounds = array<i64: 92, 1600>}, {pipeline_mode = #tpu.pipeline_mode<synchronous>, transform_indices = @transform_2, window_bounds = array<i64: 1600, 360>}, {pipeline_mode = #tpu.pipeline_mode<synchronous>, transform_indices = @transform_3, window_bounds = array<i64: 584, 64>}, {pipeline_mode = #tpu.pipeline_mode<synchronous>, transform_indices = @transform_4, window_bounds = array<i64: 1, 2432>}, {transform_indices = @transform_5, window_bounds = array<i64: 2, 5>}]} {
    %c0 = arith.constant 0 : index
    %c0_0 = arith.constant 0 : index
    %0 = vector.load %arg1[%c0, %c0_0] : memref<2x92xf32, #tpu.memory_space<vmem>>, vector<2x92xf32>
    %c0_1 = arith.constant 0 : index
    %c0_2 = arith.constant 0 : index
    %1 = vector.load %arg2[%c0_1, %c0_2] : memref<92x1600xf32, #tpu.memory_space<vmem>>, vector<92x1600xf32>
    %cst = arith.constant dense<0.000000e+00> : vector<2x1600xf32>
    %2 = tpu.matmul %0, %1, %cst {dimension_numbers = #tpu.dot_dimension_numbers<[1], [0], [0], [1], [0, 0, 1, 1], [], []>} : vector<2x92xf32>, vector<92x1600xf32>, vector<2x1600xf32> -> vector<2x1600xf32>
    %c0_3 = arith.constant 0 : index
    %c0_4 = arith.constant 0 : index
    %3 = vector.load %arg5[%c0_3, %c0_4] : memref<1x2432xf32, #tpu.memory_space<vmem>>, vector<1x1600xf32>
    %4 = vector.broadcast %3 : vector<1x1600xf32> to vector<2x1600xf32>
    %5 = arith.addf %2, %4 : vector<2x1600xf32>
    %cst_5 = arith.constant 0.000000e+00 : f32
    %6 = vector.broadcast %cst_5 : f32 to vector<2x1600xf32>
    %7 = arith.maximumf %5, %6 : vector<2x1600xf32>
    %c0_6 = arith.constant 0 : index
    %c0_7 = arith.constant 0 : index
    %8 = vector.load %arg3[%c0_6, %c0_7] : memref<1600x360xf32, #tpu.memory_space<vmem>>, vector<1600x360xf32>
    %cst_8 = arith.constant dense<0.000000e+00> : vector<2x360xf32>
    %9 = tpu.matmul %7, %8, %cst_8 {dimension_numbers = #tpu.dot_dimension_numbers<[1], [0], [0], [1], [0, 0, 1, 1], [], []>} : vector<2x1600xf32>, vector<1600x360xf32>, vector<2x360xf32> -> vector<2x360xf32>
    %c0_9 = arith.constant 0 : index
    %c1664 = arith.constant 1664 : index
    %10 = vector.load %arg5[%c0_9, %c1664] : memref<1x2432xf32, #tpu.memory_space<vmem>>, vector<1x360xf32>
    %11 = vector.broadcast %10 : vector<1x360xf32> to vector<2x360xf32>
    %12 = arith.addf %9, %11 : vector<2x360xf32>
    %cst_10 = arith.constant 0.000000e+00 : f32
    %13 = vector.broadcast %cst_10 : f32 to vector<2x360xf32>
    %14 = arith.maximumf %12, %13 : vector<2x360xf32>
    %c0_11 = arith.constant 0 : index
    %c0_12 = arith.constant 0 : index
    %15 = vector.load %arg4[%c0_11, %c0_12] : memref<584x64xf32, #tpu.memory_space<vmem>>, vector<92x64xf32>
    %cst_13 = arith.constant dense<0.000000e+00> : vector<2x64xf32>
    %16 = tpu.matmul %0, %15, %cst_13 {dimension_numbers = #tpu.dot_dimension_numbers<[1], [0], [0], [1], [0, 0, 1, 1], [], []>} : vector<2x92xf32>, vector<92x64xf32>, vector<2x64xf32> -> vector<2x64xf32>
    %c96 = arith.constant 96 : index
    %c0_14 = arith.constant 0 : index
    %17 = vector.load %arg4[%c96, %c0_14] : memref<584x64xf32, #tpu.memory_space<vmem>>, vector<360x64xf32>
    %cst_15 = arith.constant dense<0.000000e+00> : vector<2x64xf32>
    %18 = tpu.matmul %14, %17, %cst_15 {dimension_numbers = #tpu.dot_dimension_numbers<[1], [0], [0], [1], [0, 0, 1, 1], [], []>} : vector<2x360xf32>, vector<360x64xf32>, vector<2x64xf32> -> vector<2x64xf32>
    %19 = arith.addf %16, %18 : vector<2x64xf32>
    %c0_16 = arith.constant 0 : index
    %c2048 = arith.constant 2048 : index
    %20 = vector.load %arg5[%c0_16, %c2048] : memref<1x2432xf32, #tpu.memory_space<vmem>>, vector<1x64xf32>
    %21 = vector.broadcast %20 : vector<1x64xf32> to vector<2x64xf32>
    %22 = arith.addf %19, %21 : vector<2x64xf32>
    %cst_17 = arith.constant 0.000000e+00 : f32
    %23 = vector.broadcast %cst_17 : f32 to vector<2x64xf32>
    %24 = arith.maximumf %22, %23 : vector<2x64xf32>
    %c456 = arith.constant 456 : index
    %c0_18 = arith.constant 0 : index
    %25 = vector.load %arg4[%c456, %c0_18] : memref<584x64xf32, #tpu.memory_space<vmem>>, vector<64x64xf32>
    %cst_19 = arith.constant dense<0.000000e+00> : vector<2x64xf32>
    %26 = tpu.matmul %24, %25, %cst_19 {dimension_numbers = #tpu.dot_dimension_numbers<[1], [0], [0], [1], [0, 0, 1, 1], [], []>} : vector<2x64xf32>, vector<64x64xf32>, vector<2x64xf32> -> vector<2x64xf32>
    %c0_20 = arith.constant 0 : index
    %c2176 = arith.constant 2176 : index
    %27 = vector.load %arg5[%c0_20, %c2176] : memref<1x2432xf32, #tpu.memory_space<vmem>>, vector<1x64xf32>
    %28 = vector.broadcast %27 : vector<1x64xf32> to vector<2x64xf32>
    %29 = arith.addf %26, %28 : vector<2x64xf32>
    %30 = math.tanh %29 : vector<2x64xf32>
    %c520 = arith.constant 520 : index
    %c0_21 = arith.constant 0 : index
    %31 = vector.load %arg4[%c520, %c0_21] : memref<584x64xf32, #tpu.memory_space<vmem>>, vector<64x64xf32>
    %cst_22 = arith.constant dense<0.000000e+00> : vector<2x64xf32>
    %32 = tpu.matmul %30, %31, %cst_22 {dimension_numbers = #tpu.dot_dimension_numbers<[1], [0], [0], [1], [0, 0, 1, 1], [], []>} : vector<2x64xf32>, vector<64x64xf32>, vector<2x64xf32> -> vector<2x64xf32>
    %c0_23 = arith.constant 0 : index
    %c2304 = arith.constant 2304 : index
    %33 = vector.load %arg5[%c0_23, %c2304] : memref<1x2432xf32, #tpu.memory_space<vmem>>, vector<1x64xf32>
    %34 = vector.broadcast %33 : vector<1x64xf32> to vector<2x64xf32>
    %35 = arith.addf %32, %34 : vector<2x64xf32>
    %36 = vector.extract_strided_slice %35 {offsets = [0, 0], sizes = [2, 5], strides = [1, 1]} : vector<2x64xf32> to vector<2x5xf32>
    %c0_24 = arith.constant 0 : index
    %c0_25 = arith.constant 0 : index
    %37 = vector.load %arg6[%c0_24, %c0_25] : memref<2x5xf32, #tpu.memory_space<vmem>>, vector<2x5xf32>
    tpu.vector_store %arg6[%c0_24, %c0_25], %36 {strides = array<i32>} : memref<2x5xf32, #tpu.memory_space<vmem>>, vector<2x5xf32>,
    return
  }
  func.func @transform_0(%arg0: i32) -> (i32, i32) {
    %c0_i32 = arith.constant 0 : i32
    %c0_i32_0 = arith.constant 0 : i32
    return %arg0, %c0_i32 : i32, i32
  }
  func.func @transform_1(%arg0: i32) -> (i32, i32) {
    %c0_i32 = arith.constant 0 : i32
    %c0_i32_0 = arith.constant 0 : i32
    %c0_i32_1 = arith.constant 0 : i32
    return %c0_i32, %c0_i32_0 : i32, i32
  }
  func.func @transform_2(%arg0: i32) -> (i32, i32) {
    %c0_i32 = arith.constant 0 : i32
    %c0_i32_0 = arith.constant 0 : i32
    %c0_i32_1 = arith.constant 0 : i32
    return %c0_i32, %c0_i32_0 : i32, i32
  }
  func.func @transform_3(%arg0: i32) -> (i32, i32) {
    %c0_i32 = arith.constant 0 : i32
    %c0_i32_0 = arith.constant 0 : i32
    %c0_i32_1 = arith.constant 0 : i32
    return %c0_i32, %c0_i32_0 : i32, i32
  }
  func.func @transform_4(%arg0: i32) -> (i32, i32) {
    %c0_i32 = arith.constant 0 : i32
    %c0_i32_0 = arith.constant 0 : i32
    %c0_i32_1 = arith.constant 0 : i32
    return %c0_i32, %c0_i32_0 : i32, i32
  }
  func.func @transform_5(%arg0: i32) -> (i32, i32) {
    %c0_i32 = arith.constant 0 : i32
    %c0_i32_0 = arith.constant 0 : i32
    return %arg0, %c0_i32 : i32, i32
  }
}

</mosaic_0001>

<bundles_post_ra>
// kernel: cnn_model_forward.1
= control target key start
LH: loop header
LB: loop body
LE: loop exit
PB: predicated region body
PF: predicated region fallthrough
CT: control target
= control target key end

     0   :  { %v4287_v7 = vmov 0.0   ;;  %vm251_vm0 = vcmask 1043456   ;;  %vm4288_vm1 = vmmov 1   ;;  %vm247_vm3 = vcmask 752640   ;;  %s7103_s0 = inlined_call_operand.vmem [shape: f32[2,92], index: 0, kind: input, shape index: {}]   ;;  %s7104_s1 = inlined_call_operand.vmem [shape: f32[92,1600], index: 1, kind: input, shape index: {}]   ;;  %s7105_s2 = inlined_call_operand.vmem [shape: f32[1600,360], index: 2, kind: input, shape index: {}]   ;;  %s7106_s3 = inlined_call_operand.vmem [shape: f32[584,64], index: 3, kind: input, shape index: {}]   ;;  %s7107_s4 = inlined_call_operand.vmem [shape: f32[1,2432], index: 4, kind: input, shape index: {}]   ;;  %s7108_s5 = inlined_call_operand.hbm [shape: f32[2,5], index: 5, kind: output, shape index: {}]  }
   0x1   :  { %v23_v0 = vld [vmem:[%s7104_s1 + $0x8] sm:$0xff]  ;;  %v36_v1 = vld [vmem:[%s7104_s1 + $0x70] sm:$0xff]  ;;  %v22_v2 = vld [vmem:[%s7104_s1] sm:$0xff]  ;;  %355 = vmatprep.mubr.f32.mxu0 %v4287_v7  ;;  %568 = vmatprep.mubr.f32.mxu1 %v4287_v7 }
   0x2   :  { %v3369_v3 = vpack.c.bf16 %v36_v1, %v23_v0  ;;  %v35_v4 = vld [vmem:[%s7104_s1 + $0x68] sm:$0xff]  ;;  %v49_v5 = vld [vmem:[%s7104_s1 + $0xd8] sm:$0xff]  ;;  %v62_v6 = vld [vmem:[%s7104_s1 + $0x140] sm:$0xff] }
   0x3   :  { %v3371_v8 = vpack.c.bf16 %v35_v4, %v22_v2  ;;  %v3373_v9 = vpack.c.bf16 %v62_v6, %v49_v5  ;;  %v48_v10 = vld [vmem:[%s7104_s1 + $0xd0] sm:$0xff]  ;;  %v61_v11 = vld [vmem:[%s7104_s1 + $0x138] sm:$0xff]  ;;  %v75_v12 = vld [vmem:[%s7104_s1 + $0x1a8] sm:$0xff] }
   0x4   :  { %3370 = vmatprep.subr.bf16.mxu0 %v3369_v3  ;;  %v88_v13 = vld [vmem:[%s7104_s1 + $0x210] sm:$0xff]  ;;  %v3375_v14 = vpack.c.bf16 %v61_v11, %v48_v10  ;;  %v74_v16 = vld [vmem:[%s7104_s1 + $0x1a0] sm:$0xff]  ;;  %v87_v17 = vld [vmem:[%s7104_s1 + $0x208] sm:$0xff] }
   0x5   :  { %3372 = vmatpush1.bf16.msra.mxu0 %v3371_v8  ;;  %v3377_v15 = vpack.c.bf16 %v88_v13, %v75_v12  ;;  %v101_v18 = vld [vmem:[%s7104_s1 + $0x278] sm:$0xff]  ;;  %v114_v19 = vld [vmem:[%s7104_s1 + $0x2e0] sm:$0xff]  ;;  %v3379_v20 = vpack.c.bf16 %v87_v17, %v74_v16  ;;  %v100_v22 = vld [vmem:[%s7104_s1 + $0x270] sm:$0xff] }
   0x6   :  { %3374 = vmatprep.subr.bf16.mxu0 %v3373_v9  ;;  %v3381_v21 = vpack.c.bf16 %v114_v19, %v101_v18  ;;  %v113_v23 = vld [vmem:[%s7104_s1 + $0x2d8] sm:$0xff]  ;;  %v127_v24 = vld [vmem:[%s7104_s1 + $0x348] sm:$0xff]  ;;  %v140_v25 = vld [vmem:[%s7104_s1 + $0x3b0] sm:$0xff] }
   0x7   :  { %v3383_v26 = vpack.c.bf16 %v113_v23, %v100_v22  ;;  %v3385_v27 = vpack.c.bf16 %v140_v25, %v127_v24  ;;  %v126_v28 = vld [vmem:[%s7104_s1 + $0x340] sm:$0xff]  ;;  %v139_v29 = vld [vmem:[%s7104_s1 + $0x3a8] sm:$0xff]  ;;  %v153_v30 = vld [vmem:[%s7104_s1 + $0x418] sm:$0xff] }
   0x8   :  { %v166_v31 = vld [vmem:[%s7104_s1 + $0x480] sm:$0xf]  ;;  %v3387_v32 = vpack.c.bf16 %v139_v29, %v126_v28  ;;  %v152_v34 = vld [vmem:[%s7104_s1 + $0x410] sm:$0xff]  ;;  %v165_v35 = vld [vmem:[%s7104_s1 + $0x478] sm:$0xf] }
   0x9   :  { %3376 = vmatpush1.bf16.msra.mxu0 %v3375_v14  ;;  %v3389_v33 = vpack.c.bf16 %v166_v31, %v153_v30  ;;  %vm4396_vm2 = vmpackc.low %vm251_vm0, %vm4288_vm1  ;;  %v25_v37 = vld [vmem:[%s7104_s1 + $0x18] sm:$0xff]  ;;  %v38_v38 = vld [vmem:[%s7104_s1 + $0x80] sm:$0xff]  ;;  %v3392_v39 = vpack.c.bf16 %v165_v35, %v152_v34 }
   0xa   :  { %3378 = vmatprep.subr.bf16.mxu0 %v3377_v15  ;;  %v3395_v40 = vpack.c.bf16 %v38_v38, %v25_v37  ;;  %v24_v41 = vld [vmem:[%s7104_s1 + $0x10] sm:$0xff]  ;;  %v37_v42 = vld [vmem:[%s7104_s1 + $0x78] sm:$0xff]  ;;  %v51_v43 = vld [vmem:[%s7104_s1 + $0xe8] sm:$0xff] }
   0xb   :  { %v64_v44 = vld [vmem:[%s7104_s1 + $0x150] sm:$0xff]  ;;  %v4423_v45 = vld [vmem:[%s7103_s0] sm:$0x3]  ;;  %v3397_v47 = vpack.c.bf16 %v37_v42, %v24_v41  ;;  %v63_v48 = vld [vmem:[%s7104_s1 + $0x148] sm:$0xff] }
   0xc   :  { %v50_v46 = vld [vmem:[%s7104_s1 + $0xe0] sm:$0xff]  ;;  %v77_v49 = vld [vmem:[%s7104_s1 + $0x1b8] sm:$0xff]  ;;  %v3399_v51 = vpack.c.bf16 %v64_v44, %v51_v43  ;;  %v28_v53 = vld [vmem:[%s7104_s1 + $0x30] sm:$0xff] }
   0xd   :  { %3380 = vmatpush1.bf16.msra.mxu0 %v3379_v20  ;;  %v29_v50 = vld [vmem:[%s7104_s1 + $0x38] sm:$0xff]  ;;  %v42_v52 = vld [vmem:[%s7104_s1 + $0xa0] sm:$0xff]  ;;  %v55_v58 = vld [vmem:[%s7104_s1 + $0x108] sm:$0xff]  ;;  %v3401_v63 = vpack.c.bf16 %v63_v48, %v50_v46 }
   0xe   :  { %3382 = vmatprep.subr.bf16.mxu0 %v3381_v21  ;;  %v41_v54 = vld [vmem:[%s7104_s1 + $0x98] sm:$0xff]  ;;  %v90_v55 = vld [vmem:[%s7104_s1 + $0x220] sm:$0xff]  ;;  %v3447_v56 = vpack.c.bf16 %v42_v52, %v29_v50  ;;  %v68_v59 = vld [vmem:[%s7104_s1 + $0x170] sm:$0xff] }
   0xf   :  { %v3449_v57 = vpack.c.bf16 %v41_v54, %v28_v53  ;;  %v3451_v60 = vpack.c.bf16 %v68_v59, %v55_v58  ;;  %v54_v61 = vld [vmem:[%s7104_s1 + $0x100] sm:$0xff]  ;;  %v67_v62 = vld [vmem:[%s7104_s1 + $0x168] sm:$0xff]  ;;  %v81_v0 = vld [vmem:[%s7104_s1 + $0x1d8] sm:$0xff]  ;;  %v3403_v2 = vpack.c.bf16 %v90_v55, %v77_v49 }
  0x10   :  { %v94_v1 = vld [vmem:[%s7104_s1 + $0x240] sm:$0xff]  ;;  %v76_v3 = vld [vmem:[%s7104_s1 + $0x1b0] sm:$0xff]  ;;  %v89_v4 = vld [vmem:[%s7104_s1 + $0x218] sm:$0xff]  ;;  %3448 = vmatprep.subr.bf16.mxu1 %v3447_v56  ;;  %v3453_v8 = vpack.c.bf16 %v67_v62, %v54_v61 }
  0x11   :  { %3384 = vmatpush1.bf16.msra.mxu0 %v3383_v26  ;;  %v103_v5 = vld [vmem:[%s7104_s1 + $0x288] sm:$0xff]  ;;  %v116_v6 = vld [vmem:[%s7104_s1 + $0x2f0] sm:$0xff]  ;;  %3450 = vmatpush1.bf16.msra.mxu1 %v3449_v57  ;;  %v3455_v9 = vpack.c.bf16 %v94_v1, %v81_v0  ;;  %v93_v11 = vld [vmem:[%s7104_s1 + $0x238] sm:$0xff]  ;;  %v3405_v12 = vpack.c.bf16 %v89_v4, %v76_v3 }
  0x12   :  { %3386 = vmatprep.subr.bf16.mxu0 %v3385_v27  ;;  %3452 = vmatprep.subr.bf16.mxu1 %v3451_v60  ;;  %v80_v10 = vld [vmem:[%s7104_s1 + $0x1d0] sm:$0xff]  ;;  %v107_v13 = vld [vmem:[%s7104_s1 + $0x2a8] sm:$0xff]  ;;  %v3407_v15 = vpack.c.bf16 %v116_v6, %v103_v5  ;;  %v102_v16 = vld [vmem:[%s7104_s1 + $0x280] sm:$0xff] }
  0x13   :  { %v120_v14 = vld [vmem:[%s7104_s1 + $0x310] sm:$0xff]  ;;  %v115_v17 = vld [vmem:[%s7104_s1 + $0x2e8] sm:$0xff]  ;;  %v129_v18 = vld [vmem:[%s7104_s1 + $0x358] sm:$0xff]  ;;  %v3457_v20 = vpack.c.bf16 %v93_v11, %v80_v10 }
  0x14   :  { %v142_v19 = vld [vmem:[%s7104_s1 + $0x3c0] sm:$0xff]  ;;  %v3459_v21 = vpack.c.bf16 %v120_v14, %v107_v13  ;;  %v119_v23 = vld [vmem:[%s7104_s1 + $0x308] sm:$0xff]  ;;  %v3409_v24 = vpack.c.bf16 %v115_v17, %v102_v16  ;;  %v133_v25 = vld [vmem:[%s7104_s1 + $0x378] sm:$0xff] }
  0x15   :  { %3388 = vmatpush1.bf16.msra.mxu0 %v3387_v32  ;;  %3454 = vmatpush1.bf16.msra.mxu1 %v3453_v8  ;;  %v106_v22 = vld [vmem:[%s7104_s1 + $0x2a0] sm:$0xff]  ;;  %v3411_v27 = vpack.c.bf16 %v142_v19, %v129_v18  ;;  %v128_v28 = vld [vmem:[%s7104_s1 + $0x350] sm:$0xff]  ;;  %v141_v29 = vld [vmem:[%s7104_s1 + $0x3b8] sm:$0xff] }
  0x16   :  { %3391 = vmatprep.subr.msk.bf16.mxu0 %vm4396_vm2, %v3389_v33  ;;  %3456 = vmatprep.subr.bf16.mxu1 %v3455_v9  ;;  %v146_v26 = vld [vmem:[%s7104_s1 + $0x3e0] sm:$0xff]  ;;  %v155_v30 = vld [vmem:[%s7104_s1 + $0x428] sm:$0xff]  ;;  %v168_v31 = vld [vmem:[%s7104_s1 + $0x490] sm:$0xf]  ;;  %v3461_v32 = vpack.c.bf16 %v119_v23, %v106_v22  ;;  %v3413_v37 = vpack.c.bf16 %v141_v29, %v128_v28 }
  0x17   :  { %v3463_v33 = vpack.c.bf16 %v146_v26, %v133_v25  ;;  %v132_v34 = vld [vmem:[%s7104_s1 + $0x370] sm:$0xff]  ;;  %v145_v35 = vld [vmem:[%s7104_s1 + $0x3d8] sm:$0xff]  ;;  %v159_v38 = vld [vmem:[%s7104_s1 + $0x448] sm:$0xff] }
  0x18   :  { %v154_v41 = vld [vmem:[%s7104_s1 + $0x420] sm:$0xff]  ;;  %v167_v42 = vld [vmem:[%s7104_s1 + $0x488] sm:$0xf]  ;;  %v40_v44 = vld [vmem:[%s7104_s1 + $0x90] sm:$0xff]  ;;  %v3465_v46 = vpack.c.bf16 %v145_v35, %v132_v34 }
  0x19   :  { %3394 = vmatpush1.bf16.msk.msra.mxu0 %vm4396_vm2, %v3392_v39  ;;  %3458 = vmatpush1.bf16.msra.mxu1 %v3457_v20  ;;  %v172_v39 = vld [vmem:[%s7104_s1 + $0x4b0] sm:$0xf]  ;;  %v27_v43 = vld [vmem:[%s7104_s1 + $0x28] sm:$0xff]  ;;  %v158_v48 = vld [vmem:[%s7104_s1 + $0x440] sm:$0xff]  ;;  %v3418_v50 = vpack.c.bf16 %v167_v42, %v154_v41 }
  0x1a   :  { %3396 = vmatprep.subr.bf16.mxu0 %v3395_v40  ;;  %3460 = vmatprep.subr.bf16.mxu1 %v3459_v21  ;;  %v3415_v40 = vpack.c.bf16 %v168_v31, %v155_v30  ;;  %v171_v49 = vld [vmem:[%s7104_s1 + $0x4a8] sm:$0xf]  ;;  %v46_v52 = vld [vmem:[%s7104_s1 + $0xc0] sm:$0xff]  ;;  %v3421_v53 = vpack.c.bf16 %v40_v44, %v27_v43  ;;  %v53_v56 = vld [vmem:[%s7104_s1 + $0xf8] sm:$0xff] }
  0x1b   :  { %v26_v54 = vld [vmem:[%s7104_s1 + $0x20] sm:$0xff]  ;;  %v39_v55 = vld [vmem:[%s7104_s1 + $0x88] sm:$0xff]  ;;  %v3470_v58 = vpack.c.bf16 %v171_v49, %v158_v48  ;;  %v32_v60 = vld [vmem:[%s7104_s1 + $0x50] sm:$0xff] }
  0x1c   :  { %2889 = vmatmul.mubr.msk.f32.vlgmr.msra.gmra.mrb[0].mxu0 %vm247_vm3, %v4423_v45  ;;  %v66_v57 = vld [vmem:[%s7104_s1 + $0x160] sm:$0xff]  ;;  %v45_v61 = vld [vmem:[%s7104_s1 + $0xb8] sm:$0xff]  ;;  %v3423_v62 = vpack.c.bf16 %v39_v55, %v26_v54  ;;  %v72_v0 = vld [vmem:[%s7104_s1 + $0x190] sm:$0xff] }
  0x1d   :  { %3398 = vmatpush1.bf16.msra.mxu0 %v3397_v47  ;;  %426 = vmatprep.mubr.f32.mxu0 %v4287_v7  ;;  %v3467_v47 = vpack.c.bf16 %v172_v39, %v159_v38  ;;  %v3425_v1 = vpack.c.bf16 %v66_v57, %v53_v56  ;;  %v65_v3 = vld [vmem:[%s7104_s1 + $0x158] sm:$0xff]  ;;  %v79_v4 = vld [vmem:[%s7104_s1 + $0x1c8] sm:$0xff]  ;;  %v92_v5 = vld [vmem:[%s7104_s1 + $0x230] sm:$0xff]  ;;  %v3501_v6 = vpack.c.bf16 %v45_v61, %v32_v60 }
  0x1e   :  { %3400 = vmatprep.subr.bf16.mxu0 %v3399_v51  ;;  %3462 = vmatpush1.bf16.msra.mxu1 %v3461_v32  ;;  %v33_v51 = vld [vmem:[%s7104_s1 + $0x58] sm:$0xff]  ;;  %v58_v9 = vld [vmem:[%s7104_s1 + $0x120] sm:$0xff]  ;;  %v71_v10 = vld [vmem:[%s7104_s1 + $0x188] sm:$0xff]  ;;  %v3429_v14 = vpack.c.bf16 %v92_v5, %v79_v4 }
  0x1f   :  { %3464 = vmatprep.subr.bf16.mxu1 %v3463_v33  ;;  %v3499_v59 = vpack.c.bf16 %v46_v52, %v33_v51  ;;  %v98_v13 = vld [vmem:[%s7104_s1 + $0x260] sm:$0xff]  ;;  %v91_v16 = vld [vmem:[%s7104_s1 + $0x228] sm:$0xff]  ;;  %v105_v17 = vld [vmem:[%s7104_s1 + $0x298] sm:$0xff]  ;;  %v3505_v19 = vpack.c.bf16 %v71_v10, %v58_v9 }
  0x20   :  { %v118_v18 = vld [vmem:[%s7104_s1 + $0x300] sm:$0xff]  ;;  %v84_v21 = vld [vmem:[%s7104_s1 + $0x1f0] sm:$0xff]  ;;  %v97_v22 = vld [vmem:[%s7104_s1 + $0x258] sm:$0xff] }
  0x21   :  { %3402 = vmatpush1.bf16.msra.mxu0 %v3401_v63  ;;  %v59_v63 = vld [vmem:[%s7104_s1 + $0x128] sm:$0xff]  ;;  %v124_v25 = vld [vmem:[%s7104_s1 + $0x330] sm:$0xff]  ;;  %v3433_v26 = vpack.c.bf16 %v118_v18, %v105_v17  ;;  %v117_v28 = vld [vmem:[%s7104_s1 + $0x2f8] sm:$0xff]  ;;  %v3509_v31 = vpack.c.bf16 %v97_v22, %v84_v21 }
  0x22   :  { %3404 = vmatprep.subr.bf16.mxu0 %v3403_v2  ;;  %3466 = vmatpush1.bf16.msra.mxu1 %v3465_v46  ;;  %v52_v2 = vld [vmem:[%s7104_s1 + $0xf0] sm:$0xff]  ;;  %v3503_v8 = vpack.c.bf16 %v72_v0, %v59_v63  ;;  %v131_v29 = vld [vmem:[%s7104_s1 + $0x368] sm:$0xff]  ;;  %v110_v33 = vld [vmem:[%s7104_s1 + $0x2c0] sm:$0xff] }
  0x23   :  { %3469 = vmatprep.subr.msk.bf16.mxu1 %vm4396_vm2, %v3467_v47  ;;  %v3427_v11 = vpack.c.bf16 %v65_v3, %v52_v2  ;;  %v144_v30 = vld [vmem:[%s7104_s1 + $0x3d0] sm:$0xff]  ;;  %v123_v34 = vld [vmem:[%s7104_s1 + $0x328] sm:$0xff]  ;;  %v150_v38 = vld [vmem:[%s7104_s1 + $0x400] sm:$0xff] }
  0x24   :  { %v3437_v39 = vpack.c.bf16 %v144_v30, %v131_v29  ;;  %v143_v41 = vld [vmem:[%s7104_s1 + $0x3c8] sm:$0xff]  ;;  %v157_v42 = vld [vmem:[%s7104_s1 + $0x438] sm:$0xff]  ;;  %v170_v43 = vld [vmem:[%s7104_s1 + $0x4a0] sm:$0xf]  ;;  %v3513_v44 = vpack.c.bf16 %v123_v34, %v110_v33 }
  0x25   :  { %3406 = vmatpush1.bf16.msra.mxu0 %v3405_v12  ;;  %v85_v12 = vld [vmem:[%s7104_s1 + $0x1f8] sm:$0xff]  ;;  %v136_v47 = vld [vmem:[%s7104_s1 + $0x390] sm:$0xff]  ;;  %v3441_v52 = vpack.c.bf16 %v170_v43, %v157_v42  ;;  %v31_v55 = vld [vmem:[%s7104_s1 + $0x48] sm:$0xff] }
  0x26   :  { %3408 = vmatprep.subr.bf16.mxu0 %v3407_v15  ;;  %3472 = vmatpush1.bf16.msk.msra.mxu1 %vm4396_vm2, %v3470_v58  ;;  %v78_v15 = vld [vmem:[%s7104_s1 + $0x1c0] sm:$0xff]  ;;  %v3507_v20 = vpack.c.bf16 %v98_v13, %v85_v12  ;;  %v149_v48 = vld [vmem:[%s7104_s1 + $0x3f8] sm:$0xff]  ;;  %v176_v51 = vld [vmem:[%s7104_s1 + $0x4d0] sm:$0xf] }
  0x27   :  { %3500 = vmatprep.subr.bf16.mxu1 %v3499_v59  ;;  %v3431_v23 = vpack.c.bf16 %v91_v16, %v78_v15  ;;  %v169_v54 = vld [vmem:[%s7104_s1 + $0x498] sm:$0xf]  ;;  %v44_v56 = vld [vmem:[%s7104_s1 + $0xb0] sm:$0xff]  ;;  %v3517_v57 = vpack.c.bf16 %v149_v48, %v136_v47  ;;  %v162_v59 = vld [vmem:[%s7104_s1 + $0x460] sm:$0xff] }
  0x28   :  { %v175_v60 = vld [vmem:[%s7104_s1 + $0x4c8] sm:$0xf]  ;;  %v804_v63 = vld [vmem:[%s7105_s2 + $0x20] sm:$0xff]  ;;  %v3473_v0 = vpack.c.bf16 %v44_v56, %v31_v55  ;;  %v57_v3 = vld [vmem:[%s7104_s1 + $0x118] sm:$0xff] }
  0x29   :  { %3410 = vmatpush1.bf16.msra.mxu0 %v3409_v24  ;;  %2898 = vmatmul.mubr.msk.f32.vlgmr.msra.gmra.mrb[0].mxu1 %vm247_vm3, %v4423_v45  ;;  %v111_v24 = vld [vmem:[%s7104_s1 + $0x2c8] sm:$0xff]  ;;  %v70_v4 = vld [vmem:[%s7104_s1 + $0x180] sm:$0xff]  ;;  %v3522_v5 = vpack.c.bf16 %v175_v60, %v162_v59  ;;  %v803_v9 = vld [vmem:[%s7105_s2 + $0x18] sm:$0xff] }
  0x2a   :  { %3412 = vmatprep.subr.bf16.mxu0 %v3411_v27  ;;  %3502 = vmatpush1.bf16.msra.mxu1 %v3501_v6  ;;  %v104_v27 = vld [vmem:[%s7104_s1 + $0x290] sm:$0xff]  ;;  %v3511_v32 = vpack.c.bf16 %v124_v25, %v111_v24  ;;  %v43_v2 = vld [vmem:[%s7104_s1 + $0xa8] sm:$0xff]  ;;  %v3477_v13 = vpack.c.bf16 %v70_v4, %v57_v3  ;;  %v69_v15 = vld [vmem:[%s7104_s1 + $0x178] sm:$0xff] }
  0x2b   :  { %710 = vmatprep.mubr.f32.mxu1 %v4287_v7  ;;  %3504 = vmatprep.subr.bf16.mxu1 %v3503_v8  ;;  %v3435_v35 = vpack.c.bf16 %v117_v28, %v104_v27  ;;  %v800_v8 = vld [vmem:[%s7105_s2] sm:$0xff]  ;;  %v810_v12 = vld [vmem:[%s7105_s2 + $0x50] sm:$0xff]  ;;  %v83_v16 = vld [vmem:[%s7104_s1 + $0x1e8] sm:$0xff] }
  0x2c   :  { %v96_v17 = vld [vmem:[%s7104_s1 + $0x250] sm:$0xff]  ;;  %v3546_v18 = vpack.c.bf16 %v803_v9, %v800_v8  ;;  %v809_v21 = vld [vmem:[%s7105_s2 + $0x48] sm:$0xff]  ;;  %v816_v24 = vld [vmem:[%s7105_s2 + $0x80] sm:$0xff] }
  0x2d   :  { %3414 = vmatpush1.bf16.msra.mxu0 %v3413_v37  ;;  %v137_v37 = vld [vmem:[%s7104_s1 + $0x398] sm:$0xff]  ;;  %v3481_v25 = vpack.c.bf16 %v96_v17, %v83_v16  ;;  %v95_v27 = vld [vmem:[%s7104_s1 + $0x248] sm:$0xff]  ;;  %v122_v29 = vld [vmem:[%s7104_s1 + $0x320] sm:$0xff] }
  0x2e   :  { %3417 = vmatprep.subr.msk.bf16.mxu0 %vm4396_vm2, %v3415_v40  ;;  %3506 = vmatpush1.bf16.msra.mxu1 %v3505_v19  ;;  %v130_v40 = vld [vmem:[%s7104_s1 + $0x360] sm:$0xff]  ;;  %v3515_v46 = vpack.c.bf16 %v150_v38, %v137_v37  ;;  %v109_v28 = vld [vmem:[%s7104_s1 + $0x2b8] sm:$0xff]  ;;  %v822_v37 = vld [vmem:[%s7105_s2 + $0xb0] sm:$0xff] }
  0x2f   :  { %3508 = vmatprep.subr.bf16.mxu1 %v3507_v20  ;;  %v3439_v49 = vpack.c.bf16 %v143_v41, %v130_v40  ;;  %v806_v20 = vld [vmem:[%s7105_s2 + $0x30] sm:$0xff]  ;;  %v815_v33 = vld [vmem:[%s7105_s2 + $0x78] sm:$0xff]  ;;  %v3485_v38 = vpack.c.bf16 %v122_v29, %v109_v28  ;;  %v135_v41 = vld [vmem:[%s7104_s1 + $0x388] sm:$0xff] }
  0x30   :  { %v3550_v30 = vpack.c.bf16 %v809_v21, %v806_v20  ;;  %v121_v40 = vld [vmem:[%s7104_s1 + $0x318] sm:$0xff]  ;;  %v148_v42 = vld [vmem:[%s7104_s1 + $0x3f0] sm:$0xff] }
  0x31   :  { %3420 = vmatpush1.bf16.msk.msra.mxu0 %vm4396_vm2, %v3418_v50  ;;  %v163_v50 = vld [vmem:[%s7104_s1 + $0x468] sm:$0xff] }
  0x32   :  { %3422 = vmatprep.subr.bf16.mxu0 %v3421_v53  ;;  %3510 = vmatpush1.bf16.msra.mxu1 %v3509_v31  ;;  %v156_v53 = vld [vmem:[%s7104_s1 + $0x430] sm:$0xff]  ;;  %v3519_v58 = vpack.c.bf16 %v176_v51, %v163_v50 }
  0x33   :  { %3512 = vmatprep.subr.bf16.mxu1 %v3511_v32  ;;  %v3444_v61 = vpack.c.bf16 %v169_v54, %v156_v53  ;;  %v812_v32 = vld [vmem:[%s7105_s2 + $0x60] sm:$0xff] }
  0x34   :  { %2892 = vmatmul.mubr.msk.f32.vlgmr.msra.gmra.mrb[2].mxu0 %vm247_vm3, %v4423_v45  ;;  %v3554_v43 = vpack.c.bf16 %v815_v33, %v812_v32 }
  0x35   :  { %3424 = vmatpush1.bf16.msra.mxu0 %v3423_v62  ;;  %497 = vmatprep.mubr.f32.mxu0 %v4287_v7  ;;  %v801_v62 = vld [vmem:[%s7105_s2 + $0x8] sm:$0xff] }
  0x36   :  { %3426 = vmatprep.subr.bf16.mxu0 %v3425_v1  ;;  %3514 = vmatpush1.bf16.msra.mxu1 %v3513_v44  ;;  %v30_v1 = vld [vmem:[%s7104_s1 + $0x40] sm:$0xff]  ;;  %v3544_v6 = vpack.c.bf16 %v804_v63, %v801_v62 }
  0x37   :  { %3516 = vmatprep.subr.bf16.mxu1 %v3515_v46  ;;  %v3475_v10 = vpack.c.bf16 %v43_v2, %v30_v1 }
  0x39   :  { %3428 = vmatpush1.bf16.msra.mxu0 %v3427_v11  ;;  %v807_v11 = vld [vmem:[%s7105_s2 + $0x38] sm:$0xff] }
  0x3a   :  { %3430 = vmatprep.subr.bf16.mxu0 %v3429_v14  ;;  %3518 = vmatpush1.bf16.msra.mxu1 %v3517_v57  ;;  %v56_v14 = vld [vmem:[%s7104_s1 + $0x110] sm:$0xff]  ;;  %v3548_v19 = vpack.c.bf16 %v810_v12, %v807_v11 }
  0x3b   :  { %3521 = vmatprep.subr.msk.bf16.mxu1 %vm4396_vm2, %v3519_v58  ;;  %v3479_v22 = vpack.c.bf16 %v69_v15, %v56_v14 }
  0x3d   :  { %3432 = vmatpush1.bf16.msra.mxu0 %v3431_v23  ;;  %v813_v23 = vld [vmem:[%s7105_s2 + $0x68] sm:$0xff] }
  0x3e   :  { %3434 = vmatprep.subr.bf16.mxu0 %v3433_v26  ;;  %3524 = vmatpush1.bf16.msk.msra.mxu1 %vm4396_vm2, %v3522_v5  ;;  %v82_v26 = vld [vmem:[%s7104_s1 + $0x1e0] sm:$0xff]  ;;  %v3552_v31 = vpack.c.bf16 %v816_v24, %v813_v23 }
  0x3f   :  { %3545 = vmatprep.subr.bf16.mxu1 %v3544_v6  ;;  %v3483_v34 = vpack.c.bf16 %v95_v27, %v82_v26 }
  0x41   :  { %3436 = vmatpush1.bf16.msra.mxu0 %v3435_v35  ;;  %2904 = vmatmul.mubr.msk.f32.vlgmr.msra.gmra.mrb[2].mxu1 %vm247_vm3, %v4423_v45  ;;  %v819_v35 = vld [vmem:[%s7105_s2 + $0x98] sm:$0xff] }
  0x42   :  { %3438 = vmatprep.subr.bf16.mxu0 %v3437_v39  ;;  %3547 = vmatpush1.bf16.msra.mxu1 %v3546_v18  ;;  %v108_v39 = vld [vmem:[%s7104_s1 + $0x2b0] sm:$0xff] }
  0x43   :  { %3549 = vmatprep.subr.bf16.mxu1 %v3548_v19 }
  0x45   :  { %3440 = vmatpush1.bf16.msra.mxu0 %v3439_v49 }
  0x46   :  { %3443 = vmatprep.subr.msk.bf16.mxu0 %vm4396_vm2, %v3441_v52  ;;  %3551 = vmatpush1.bf16.msra.mxu1 %v3550_v30 }
  0x49   :  { %3446 = vmatpush1.bf16.msk.msra.mxu0 %vm4396_vm2, %v3444_v61 }
  0x4a   :  { %3474 = vmatprep.subr.bf16.mxu0 %v3473_v0 }
  0x4c   :  { %2895 = vmatmul.mubr.msk.f32.vlgmr.msra.gmra.mrb[4].mxu0 %vm247_vm3, %v4423_v45 }
  0x4d   :  { %3476 = vmatpush1.bf16.msra.mxu0 %v3475_v10  ;;  %639 = vmatprep.mubr.f32.mxu0 %v4287_v7 }
  0x4e   :  { %3478 = vmatprep.subr.bf16.mxu0 %v3477_v13 }
  0x51   :  { %3480 = vmatpush1.bf16.msra.mxu0 %v3479_v22 }
  0x52   :  { %3482 = vmatprep.subr.bf16.mxu0 %v3481_v25 }
  0x53   :  { %10 = vsyncpa [#allocation3], 0  ;;  %3553 = vmatprep.subr.bf16.mxu1 %v3552_v31  ;;  %v3556_v44 = vpack.c.bf16 %v822_v37, %v819_v35  ;;  %v818_v46 = vld [vmem:[%s7105_s2 + $0x90] sm:$0xff]  ;;  %v821_v47 = vld [vmem:[%s7105_s2 + $0xa8] sm:$0xff]  ;;  %v3487_v48 = vpack.c.bf16 %v121_v40, %v108_v39  ;;  %v3489_v51 = vpack.c.bf16 %v148_v42, %v135_v41  ;;  %v4289_v19 = vmov 0.0|0.0  }
  0x54   :  { %v825_v49 = vld [vmem:[%s7105_s2 + $0xc8] sm:$0xff]  ;;  %v828_v50 = vld [vmem:[%s7105_s2 + $0xe0] sm:$0xff]  ;;  %v161_v54 = vld [vmem:[%s7104_s1 + $0x458] sm:$0xff]  ;;  %3555 = vmatpush1.bf16.msra.mxu1 %v3554_v43  ;;  %v3558_v56 = vpack.c.bf16 %v821_v47, %v818_v46  ;;  %vm4290_vm4 = vmmov 0   ;;  %vm1417_vm5 = vcmask 523264   ;;  %vm2468_vm6 = vcmask 850944  }
  0x55   :  { %3484 = vmatpush1.bf16.msra.mxu0 %v3483_v34  ;;  %v134_v52 = vld [vmem:[%s7104_s1 + $0x380] sm:$0xff]  ;;  %v147_v53 = vld [vmem:[%s7104_s1 + $0x3e8] sm:$0xff]  ;;  %3557 = vmatprep.subr.bf16.mxu1 %v3556_v44  ;;  %v3560_v57 = vpack.c.bf16 %v828_v50, %v825_v49  ;;  %v827_v59 = vld [vmem:[%s7105_s2 + $0xd8] sm:$0xff]  ;;  %vm2871_vm7 = vcmask 33792  }
  0x56   :  { %3486 = vmatprep.subr.bf16.mxu0 %v3485_v38  ;;  %v174_v55 = vld [vmem:[%s7104_s1 + $0x4c0] sm:$0xf]  ;;  %v3491_v60 = vpack.c.bf16 %v147_v53, %v134_v52  ;;  %v831_v61 = vld [vmem:[%s7105_s2 + $0xf8] sm:$0xff]  ;;  %v834_v62 = vld [vmem:[%s7105_s2 + $0x110] sm:$0xff] }
  0x57   :  { %v824_v58 = vld [vmem:[%s7105_s2 + $0xc0] sm:$0xff]  ;;  %v3493_v63 = vpack.c.bf16 %v174_v55, %v161_v54  ;;  %v160_v0 = vld [vmem:[%s7104_s1 + $0x450] sm:$0xff]  ;;  %v173_v1 = vld [vmem:[%s7104_s1 + $0x4b8] sm:$0xf]  ;;  %v3564_v3 = vpack.c.bf16 %v834_v62, %v831_v61 }
  0x58   :  { %3559 = vmatpush1.bf16.msra.mxu1 %v3558_v56  ;;  %v3562_v2 = vpack.c.bf16 %v827_v59, %v824_v58  ;;  %v830_v4 = vld [vmem:[%s7105_s2 + $0xf0] sm:$0xff]  ;;  %v833_v5 = vld [vmem:[%s7105_s2 + $0x108] sm:$0xff]  ;;  %v3496_v6 = vpack.c.bf16 %v173_v1, %v160_v0  ;;  %v840_v9 = vld [vmem:[%s7105_s2 + $0x140] sm:$0xff] }
  0x59   :  { %3488 = vmatpush1.bf16.msra.mxu0 %v3487_v48  ;;  %3561 = vmatprep.subr.bf16.mxu1 %v3560_v57  ;;  %v837_v8 = vld [vmem:[%s7105_s2 + $0x128] sm:$0xff]  ;;  %v34_v10 = vld [vmem:[%s7104_s1 + $0x60] sm:$0xff]  ;;  %v3566_v12 = vpack.c.bf16 %v833_v5, %v830_v4  ;;  %v839_v15 = vld [vmem:[%s7105_s2 + $0x138] sm:$0xff] }
  0x5a   :  { %3490 = vmatprep.subr.bf16.mxu0 %v3489_v51  ;;  %v47_v11 = vld [vmem:[%s7104_s1 + $0xc8] sm:$0xff]  ;;  %v3568_v13 = vpack.c.bf16 %v840_v9, %v837_v8  ;;  %v836_v14 = vld [vmem:[%s7105_s2 + $0x120] sm:$0xff]  ;;  %v843_v17 = vld [vmem:[%s7105_s2 + $0x158] sm:$0xff] }
  0x5b   :  { %v3526_v16 = vpack.c.bf16 %v47_v11, %v34_v10  ;;  %v846_v18 = vld [vmem:[%s7105_s2 + $0x170] sm:$0xff]  ;;  %v73_v21 = vld [vmem:[%s7104_s1 + $0x198] sm:$0xff]  ;;  %v3570_v22 = vpack.c.bf16 %v839_v15, %v836_v14  ;;  %v845_v25 = vld [vmem:[%s7105_s2 + $0x168] sm:$0xff] }
  0x5c   :  { %3563 = vmatpush1.bf16.msra.mxu1 %v3562_v2  ;;  %v60_v20 = vld [vmem:[%s7104_s1 + $0x130] sm:$0xff]  ;;  %v3572_v23 = vpack.c.bf16 %v846_v18, %v843_v17  ;;  %v849_v27 = vld [vmem:[%s7105_s2 + $0x188] sm:$0xff]  ;;  %v852_v28 = vld [vmem:[%s7105_s2 + $0x1a0] sm:$0xff] }
  0x5d   :  { %3492 = vmatpush1.bf16.msra.mxu0 %v3491_v60  ;;  %3565 = vmatprep.subr.bf16.mxu1 %v3564_v3  ;;  %v842_v24 = vld [vmem:[%s7105_s2 + $0x150] sm:$0xff]  ;;  %v3529_v26 = vpack.c.bf16 %v73_v21, %v60_v20  ;;  %v86_v29 = vld [vmem:[%s7104_s1 + $0x200] sm:$0xff]  ;;  %v99_v30 = vld [vmem:[%s7104_s1 + $0x268] sm:$0xff]  ;;  %v3576_v32 = vpack.c.bf16 %v852_v28, %v849_v27 }
  0x5e   :  { %3495 = vmatprep.subr.msk.bf16.mxu0 %vm4396_vm2, %v3493_v63  ;;  %v3574_v31 = vpack.c.bf16 %v845_v25, %v842_v24  ;;  %v848_v33 = vld [vmem:[%s7105_s2 + $0x180] sm:$0xff]  ;;  %v851_v34 = vld [vmem:[%s7105_s2 + $0x198] sm:$0xff]  ;;  %v3532_v35 = vpack.c.bf16 %v99_v30, %v86_v29  ;;  %v858_v38 = vld [vmem:[%s7105_s2 + $0x1d0] sm:$0xff] }
  0x5f   :  { %v855_v37 = vld [vmem:[%s7105_s2 + $0x1b8] sm:$0xff]  ;;  %v112_v39 = vld [vmem:[%s7104_s1 + $0x2d0] sm:$0xff]  ;;  %v3578_v41 = vpack.c.bf16 %v851_v34, %v848_v33  ;;  %v857_v44 = vld [vmem:[%s7105_s2 + $0x1c8] sm:$0xff] }
  0x60   :  { %3567 = vmatpush1.bf16.msra.mxu1 %v3566_v12  ;;  %v125_v40 = vld [vmem:[%s7104_s1 + $0x338] sm:$0xff]  ;;  %v3580_v42 = vpack.c.bf16 %v858_v38, %v855_v37  ;;  %v854_v43 = vld [vmem:[%s7105_s2 + $0x1b0] sm:$0xff]  ;;  %v861_v47 = vld [vmem:[%s7105_s2 + $0x1e8] sm:$0xff] }
  0x61   :  { %3498 = vmatpush1.bf16.msk.msra.mxu0 %vm4396_vm2, %v3496_v6  ;;  %3569 = vmatprep.subr.bf16.mxu1 %v3568_v13  ;;  %v3535_v46 = vpack.c.bf16 %v125_v40, %v112_v39  ;;  %v864_v48 = vld [vmem:[%s7105_s2 + $0x200] sm:$0xff]  ;;  %v151_v50 = vld [vmem:[%s7104_s1 + $0x408] sm:$0xff]  ;;  %v3582_v51 = vpack.c.bf16 %v857_v44, %v854_v43  ;;  %v863_v54 = vld [vmem:[%s7105_s2 + $0x1f8] sm:$0xff] }
  0x62   :  { %3525 = vmatprep.subr.bf16.mxu0 %v4289_v19  ;;  %v138_v49 = vld [vmem:[%s7104_s1 + $0x3a0] sm:$0xff]  ;;  %v3584_v52 = vpack.c.bf16 %v864_v48, %v861_v47  ;;  %v867_v56 = vld [vmem:[%s7105_s2 + $0x218] sm:$0xff]  ;;  %v870_v57 = vld [vmem:[%s7105_s2 + $0x230] sm:$0xff] }
  0x63   :  { %v860_v53 = vld [vmem:[%s7105_s2 + $0x1e0] sm:$0xff]  ;;  %v3538_v55 = vpack.c.bf16 %v151_v50, %v138_v49  ;;  %v164_v58 = vld [vmem:[%s7104_s1 + $0x470] sm:$0xff]  ;;  %v177_v59 = vld [vmem:[%s7104_s1 + $0x4d8] sm:$0xf]  ;;  %v3588_v63 = vpack.c.bf16 %v870_v57, %v867_v56 }
  0x64   :  { %2901 = vmatmul.mubr.msk.f32.vlgmr.msra.gmra.mrb[6].mxu0 %vm247_vm3, %v4423_v45  ;;  %3571 = vmatpush1.bf16.msra.mxu1 %v3570_v22  ;;  %v850_v60 = vld [vmem:[%s7105_s2 + $0x190] sm:$0xff]  ;;  %v853_v61 = vld [vmem:[%s7105_s2 + $0x1a8] sm:$0xff]  ;;  %v3586_v62 = vpack.c.bf16 %v863_v54, %v860_v53  ;;  %v3541_v2 = vpack.c.bf16 %v177_v59, %v164_v58  ;;  %v876_v4 = vld [vmem:[%s7105_s2 + $0x260] sm:$0xff] }
  0x65   :  { %3527 = vmatpush3.bf16.msra.mxu0 %v3526_v16  ;;  %3253 = vmatprep.mubr.msk.f32.mxu0 %vm4290_vm4, %v4287_v7  ;;  %v866_v0 = vld [vmem:[%s7105_s2 + $0x210] sm:$0xff]  ;;  %v869_v1 = vld [vmem:[%s7105_s2 + $0x228] sm:$0xff]  ;;  %v3944_v5 = vpack.c.bf16 %v853_v61, %v850_v60  ;;  %v856_v9 = vld [vmem:[%s7105_s2 + $0x1c0] sm:$0xff] }
  0x66   :  { %3528 = vmatprep.subr.bf16.mxu0 %v4289_v19  ;;  %3573 = vmatprep.subr.bf16.mxu1 %v3572_v23  ;;  %v873_v3 = vld [vmem:[%s7105_s2 + $0x248] sm:$0xff]  ;;  %v802_v6 = vld [vmem:[%s7105_s2 + $0x10] sm:$0xff]  ;;  %v859_v10 = vld [vmem:[%s7105_s2 + $0x1d8] sm:$0xff]  ;;  %v3590_v11 = vpack.c.bf16 %v869_v1, %v866_v0 }
  0x67   :  { %v805_v8 = vld [vmem:[%s7105_s2 + $0x28] sm:$0xff]  ;;  %v3592_v12 = vpack.c.bf16 %v876_v4, %v873_v3  ;;  %v872_v13 = vld [vmem:[%s7105_s2 + $0x240] sm:$0xff]  ;;  %v875_v14 = vld [vmem:[%s7105_s2 + $0x258] sm:$0xff]  ;;  %v3948_v18 = vpack.c.bf16 %v859_v10, %v856_v9 }
  0x68   :  { %3575 = vmatpush1.bf16.msra.mxu1 %v3574_v31  ;;  %v3946_v15 = vpack.c.bf16 %v805_v8, %v802_v6  ;;  %v879_v16 = vld [vmem:[%s7105_s2 + $0x278] sm:$0xff]  ;;  %v882_v17 = vld [vmem:[%s7105_s2 + $0x290] sm:$0xff]  ;;  %v808_v20 = vld [vmem:[%s7105_s2 + $0x40] sm:$0xff]  ;;  %v3594_v24 = vpack.c.bf16 %v875_v14, %v872_v13 }
  0x69   :  { %3530 = vmatpush3.bf16.msra.mxu0 %v3529_v26  ;;  %3577 = vmatprep.subr.bf16.mxu1 %v3576_v32  ;;  %v811_v21 = vld [vmem:[%s7105_s2 + $0x58] sm:$0xff]  ;;  %v862_v22 = vld [vmem:[%s7105_s2 + $0x1f0] sm:$0xff]  ;;  %v865_v23 = vld [vmem:[%s7105_s2 + $0x208] sm:$0xff]  ;;  %v3596_v25 = vpack.c.bf16 %v882_v17, %v879_v16 }
  0x6a   :  { %3531 = vmatprep.subr.bf16.mxu0 %v4289_v19  ;;  %v878_v26 = vld [vmem:[%s7105_s2 + $0x270] sm:$0xff]  ;;  %v881_v27 = vld [vmem:[%s7105_s2 + $0x288] sm:$0xff]  ;;  %v3950_v28 = vpack.c.bf16 %v811_v21, %v808_v20  ;;  %v3952_v30 = vpack.c.bf16 %v865_v23, %v862_v22  ;;  %v868_v33 = vld [vmem:[%s7105_s2 + $0x220] sm:$0xff]  ;;  %v182_v21 = vlaneseq }
  0x6b   :  { %v885_v29 = vld [vmem:[%s7105_s2 + $0x2a8] sm:$0xff]  ;;  %v814_v31 = vld [vmem:[%s7105_s2 + $0x70] sm:$0xff]  ;;  %v871_v34 = vld [vmem:[%s7105_s2 + $0x238] sm:$0xff] }
  0x6c   :  { %3579 = vmatpush1.bf16.msra.mxu1 %v3578_v41  ;;  %v817_v32 = vld [vmem:[%s7105_s2 + $0x88] sm:$0xff]  ;;  %v884_v38 = vld [vmem:[%s7105_s2 + $0x2a0] sm:$0xff]  ;;  %v887_v39 = vld [vmem:[%s7105_s2 + $0x2b8] sm:$0xff]  ;;  %v3956_v43 = vpack.c.bf16 %v871_v34, %v868_v33  ;;  %v5153_v22 = vshrl.u32 %v182_v21, 7 }
  0x6d   :  { %3533 = vmatpush3.bf16.msra.mxu0 %v3532_v35  ;;  %3581 = vmatprep.subr.bf16.mxu1 %v3580_v42  ;;  %v3598_v35 = vpack.c.bf16 %v881_v27, %v878_v26  ;;  %v3954_v40 = vpack.c.bf16 %v817_v32, %v814_v31  ;;  %v891_v41 = vld [vmem:[%s7105_s2 + $0x2d8] sm:$0xff]  ;;  %v894_v42 = vld [vmem:[%s7105_s2 + $0x2f0] sm:$0xff]  ;;  %v820_v44 = vld [vmem:[%s7105_s2 + $0xa0] sm:$0xff]  ;;  %v3602_v49 = vpack.c.bf16 %v887_v39, %v884_v38 }
  0x6e   :  { %3534 = vmatprep.subr.bf16.mxu0 %v4289_v19  ;;  %v874_v47 = vld [vmem:[%s7105_s2 + $0x250] sm:$0xff]  ;;  %v877_v48 = vld [vmem:[%s7105_s2 + $0x268] sm:$0xff]  ;;  %v3604_v50 = vpack.c.bf16 %v894_v42, %v891_v41  ;;  %v880_v59 = vld [vmem:[%s7105_s2 + $0x280] sm:$0xff]  ;;  %v5156_v23 = vsub.s32 0, %v5153_v22 }
  0x6f   :  { %v897_v54 = vld [vmem:[%s7105_s2 + $0x308] sm:$0xff]  ;;  %v3960_v56 = vpack.c.bf16 %v877_v48, %v874_v47  ;;  %v826_v57 = vld [vmem:[%s7105_s2 + $0xd0] sm:$0xff]  ;;  %v883_v60 = vld [vmem:[%s7105_s2 + $0x298] sm:$0xff] }
  0x70   :  { %3583 = vmatpush1.bf16.msra.mxu1 %v3582_v51  ;;  %v890_v51 = vld [vmem:[%s7105_s2 + $0x2d0] sm:$0xff]  ;;  %v829_v58 = vld [vmem:[%s7105_s2 + $0xe8] sm:$0xff]  ;;  %v3964_v0 = vpack.c.bf16 %v883_v60, %v880_v59  ;;  %v832_v1 = vld [vmem:[%s7105_s2 + $0x100] sm:$0xff] }
  0x71   :  { %3536 = vmatpush3.bf16.msra.mxu0 %v3535_v46  ;;  %3585 = vmatprep.subr.bf16.mxu1 %v3584_v52  ;;  %v823_v46 = vld [vmem:[%s7105_s2 + $0xb8] sm:$0xff]  ;;  %v893_v52 = vld [vmem:[%s7105_s2 + $0x2e8] sm:$0xff]  ;;  %v886_v3 = vld [vmem:[%s7105_s2 + $0x2b0] sm:$0xff] }
  0x72   :  { %3537 = vmatprep.subr.bf16.mxu0 %v4289_v19  ;;  %v3958_v53 = vpack.c.bf16 %v823_v46, %v820_v44  ;;  %v3606_v61 = vpack.c.bf16 %v893_v52, %v890_v51  ;;  %v889_v4 = vld [vmem:[%s7105_s2 + $0x2c8] sm:$0xff]  ;;  %v838_v8 = vld [vmem:[%s7105_s2 + $0x130] sm:$0xff]  ;;  %v892_v10 = vld [vmem:[%s7105_s2 + $0x2e0] sm:$0xff] }
  0x73   :  { %v3968_v6 = vpack.c.bf16 %v889_v4, %v886_v3  ;;  %v841_v9 = vld [vmem:[%s7105_s2 + $0x148] sm:$0xff]  ;;  %v844_v14 = vld [vmem:[%s7105_s2 + $0x160] sm:$0xff]  ;;  %v946_v16 = vld [vmem:[%s7105_s2 + $0x490] sm:$0xff] }
  0x74   :  { %3587 = vmatpush1.bf16.msra.mxu1 %v3586_v62  ;;  %v949_v17 = vld [vmem:[%s7105_s2 + $0x4a8] sm:$0xff]  ;;  %v898_v32 = vld [vmem:[%s7105_s2 + $0x310] sm:$0xff]  ;;  %v903_v34 = vld [vmem:[%s7105_s2 + $0x338] sm:$0xff] }
  0x75   :  { %3539 = vmatpush3.bf16.msra.mxu0 %v3538_v55  ;;  %3589 = vmatprep.subr.bf16.mxu1 %v3588_v63  ;;  %v900_v55 = vld [vmem:[%s7105_s2 + $0x320] sm:$0xff]  ;;  %v3962_v63 = vpack.c.bf16 %v829_v58, %v826_v57  ;;  %v3976_v20 = vpack.c.bf16 %v949_v17, %v946_v16  ;;  %v901_v33 = vld [vmem:[%s7105_s2 + $0x328] sm:$0xff]  ;;  %v955_v39 = vld [vmem:[%s7105_s2 + $0x4d8] sm:$0xff] }
  0x76   :  { %3540 = vmatprep.subr.bf16.mxu0 %v4289_v19  ;;  %v3608_v62 = vpack.c.bf16 %v900_v55, %v897_v54  ;;  %v952_v38 = vld [vmem:[%s7105_s2 + $0x4c0] sm:$0xff]  ;;  %v3978_v42 = vpack.c.bf16 %v901_v33, %v898_v32  ;;  %v905_v44 = vld [vmem:[%s7105_s2 + $0x348] sm:$0xff]  ;;  %v911_v58 = vld [vmem:[%s7105_s2 + $0x378] sm:$0xff]  ;;  %v196_v32 = vsub.s32 3, %v5153_v22 }
  0x77   :  { %v3980_v48 = vpack.c.bf16 %v955_v39, %v952_v38  ;;  %v909_v51 = vld [vmem:[%s7105_s2 + $0x368] sm:$0xff]  ;;  %v912_v52 = vld [vmem:[%s7105_s2 + $0x380] sm:$0xff]  ;;  %v2695_v36 = vld [vmem:[%s7106_s3 + $0x1d0] sm:$0xff] }
  0x78   :  { %3591 = vmatpush1.bf16.msra.mxu1 %v3590_v11  ;;  %v895_v11 = vld [vmem:[%s7105_s2 + $0x2f8] sm:$0xff]  ;;  %v961_v54 = vld [vmem:[%s7105_s2 + $0x508] sm:$0xff]  ;;  %v908_v57 = vld [vmem:[%s7105_s2 + $0x360] sm:$0xff]  ;;  %v3616_v59 = vpack.c.bf16 %v912_v52, %v909_v51 }
  0x79   :  { %3543 = vmatpush3.bf16.msk.msra.mxu0 %vm4396_vm2, %v3541_v2  ;;  %3593 = vmatprep.subr.bf16.mxu1 %v3592_v12  ;;  %v835_v2 = vld [vmem:[%s7105_s2 + $0x118] sm:$0xff]  ;;  %v3970_v12 = vpack.c.bf16 %v841_v9, %v838_v8  ;;  %v3972_v13 = vpack.c.bf16 %v895_v11, %v892_v10  ;;  %v3618_v3 = vpack.c.bf16 %v911_v58, %v908_v57  ;;  %v916_v10 = vld [vmem:[%s7105_s2 + $0x3a0] sm:$0xff]  ;;  %v937_v57 = vld [vmem:[%s7105_s2 + $0x448] sm:$0xff] }
  0x7a   :  { %3945 = vmatprep.subr.bf16.mxu0 %v3944_v5  ;;  %v3966_v5 = vpack.c.bf16 %v835_v2, %v832_v1  ;;  %v964_v1 = vld [vmem:[%s7105_s2 + $0x520] sm:$0xff]  ;;  %v967_v2 = vld [vmem:[%s7105_s2 + $0x538] sm:$0xff] }
  0x7b   :  { %v3988_v9 = vpack.c.bf16 %v967_v2, %v964_v1  ;;  %v919_v11 = vld [vmem:[%s7105_s2 + $0x3b8] sm:$0xff]  ;;  %v932_v52 = vld [vmem:[%s7105_s2 + $0x420] sm:$0xff] }
  0x7c   :  { %3254 = vmatmul.mubr.msk.f32.vlgmr.msra.gmra.mrb[8].mxu0 %vm247_vm3, %v4423_v45  ;;  %v888_v45 = vld [vmem:[%s7105_s2 + $0x2c0] sm:$0xff]  ;;  %3595 = vmatpush1.bf16.msra.mxu1 %v3594_v24  ;;  %v3990_v17 = vpack.c.bf16 %v919_v11, %v916_v10 }
  0x7d   :  { %3947 = vmatpush3.bf16.msra.mxu0 %v3946_v15  ;;  %3597 = vmatprep.subr.bf16.mxu1 %v3596_v25  ;;  %v3600_v37 = vpack.c.bf16 %v888_v45, %v885_v29  ;;  %v847_v15 = vld [vmem:[%s7105_s2 + $0x178] sm:$0xff]  ;;  %v5161_v24 = vld [vmem:[%s7107_s4] sm:$0xff]  ;;  %v5164_v25 = vsub.s32 1, %v5153_v22 }
  0x7e   :  { %3949 = vmatprep.subr.bf16.mxu0 %v3948_v18  ;;  %v3974_v18 = vpack.c.bf16 %v847_v15, %v844_v14  ;;  %v185_v26 = vrot.slane %v5161_v24, %v5156_v23  ;;  %v896_v29 = vld [vmem:[%s7105_s2 + $0x300] sm:$0xff]  ;;  %v899_v45 = vld [vmem:[%s7105_s2 + $0x318] sm:$0xff]  ;;  %v970_v14 = vld [vmem:[%s7105_s2 + $0x550] sm:$0xff] }
  0x7f   :  { %v189_v27 = vrot.slane %v5161_v24, %v5164_v25  ;;  %v3610_v41 = vpack.c.bf16 %v899_v45, %v896_v29  ;;  %v973_v15 = vld [vmem:[%s7105_s2 + $0x568] sm:$0xff]  ;;  %v927_v29 = vld [vmem:[%s7105_s2 + $0x3f8] sm:$0xff]  ;;  %v930_v45 = vld [vmem:[%s7105_s2 + $0x410] sm:$0xff] }
  0x80   :  { %3599 = vmatpush1.bf16.msra.mxu1 %v3598_v35  ;;  %v3628_v38 = vpack.c.bf16 %v930_v45, %v927_v29  ;;  %v940_v11 = vld [vmem:[%s7105_s2 + $0x460] sm:$0xff]  ;;  %v994_v29 = vld [vmem:[%s7105_s2 + $0x610] sm:$0xff]  ;;  %v997_v45 = vld [vmem:[%s7105_s2 + $0x628] sm:$0xff] }
  0x81   :  { %3951 = vmatpush3.bf16.msra.mxu0 %v3950_v28  ;;  %3601 = vmatprep.subr.bf16.mxu1 %v3600_v37  ;;  %v906_v37 = vld [vmem:[%s7105_s2 + $0x350] sm:$0xff] }
  0x82   :  { %3953 = vmatprep.subr.bf16.mxu0 %v3952_v30  ;;  %v3612_v47 = vpack.c.bf16 %v906_v37, %v903_v34  ;;  %v929_v37 = vld [vmem:[%s7105_s2 + $0x408] sm:$0xff] }
  0x84   :  { %3603 = vmatpush1.bf16.msra.mxu1 %v3602_v49  ;;  %v904_v49 = vld [vmem:[%s7105_s2 + $0x340] sm:$0xff] }
  0x85   :  { %3955 = vmatpush3.bf16.msra.mxu0 %v3954_v40  ;;  %3605 = vmatprep.subr.bf16.mxu1 %v3604_v50  ;;  %v907_v50 = vld [vmem:[%s7105_s2 + $0x358] sm:$0xff] }
  0x86   :  { %3957 = vmatprep.subr.bf16.mxu0 %v3956_v43  ;;  %v902_v43 = vld [vmem:[%s7105_s2 + $0x330] sm:$0xff] }
  0x87   :  { %v3614_v55 = vpack.c.bf16 %v905_v44, %v902_v43  ;;  %v936_v43 = vld [vmem:[%s7105_s2 + $0x440] sm:$0xff]  ;;  %v982_v44 = vld [vmem:[%s7105_s2 + $0x5b0] sm:$0xff] }
  0x88   :  { %3607 = vmatpush1.bf16.msra.mxu1 %v3606_v61  ;;  %v910_v61 = vld [vmem:[%s7105_s2 + $0x370] sm:$0xff] }
  0x89   :  { %3959 = vmatpush3.bf16.msra.mxu0 %v3958_v53  ;;  %3609 = vmatprep.subr.bf16.mxu1 %v3608_v62  ;;  %v958_v53 = vld [vmem:[%s7105_s2 + $0x4f0] sm:$0xff]  ;;  %v913_v62 = vld [vmem:[%s7105_s2 + $0x388] sm:$0xff] }
  0x8a   :  { %3961 = vmatprep.subr.bf16.mxu0 %v3960_v56  ;;  %v3982_v56 = vpack.c.bf16 %v907_v50, %v904_v49  ;;  %v3984_v60 = vpack.c.bf16 %v961_v54, %v958_v53  ;;  %v3986_v4 = vpack.c.bf16 %v913_v62, %v910_v61  ;;  %v935_v53 = vld [vmem:[%s7105_s2 + $0x438] sm:$0xff]  ;;  %v942_v61 = vld [vmem:[%s7105_s2 + $0x470] sm:$0xff]  ;;  %v988_v62 = vld [vmem:[%s7105_s2 + $0x5e0] sm:$0xff] }
  0x8d   :  { %3963 = vmatpush3.bf16.msra.mxu0 %v3962_v63  ;;  %v915_v63 = vld [vmem:[%s7105_s2 + $0x398] sm:$0xff] }
  0x8e   :  { %3965 = vmatprep.subr.bf16.mxu0 %v3964_v0  ;;  %v918_v0 = vld [vmem:[%s7105_s2 + $0x3b0] sm:$0xff] }
  0x8f   :  { %v3620_v8 = vpack.c.bf16 %v918_v0, %v915_v63  ;;  %v991_v63 = vld [vmem:[%s7105_s2 + $0x5f8] sm:$0xff] }
  0x90   :  { %v4004_v10 = vpack.c.bf16 %v991_v63, %v988_v62  ;;  %v1063_v62 = vld [vmem:[%s7105_s2 + $0x838] sm:$0xff]  ;;  %v204_v63 = vsub.s32 5, %v5153_v22 }
  0x91   :  { %3967 = vmatpush3.bf16.msra.mxu0 %v3966_v5  ;;  %v914_v5 = vld [vmem:[%s7105_s2 + $0x390] sm:$0xff] }
  0x92   :  { %3969 = vmatprep.subr.bf16.mxu0 %v3968_v6  ;;  %v917_v6 = vld [vmem:[%s7105_s2 + $0x3a8] sm:$0xff] }
  0x93   :  { %v3622_v16 = vpack.c.bf16 %v917_v6, %v914_v5  ;;  %v938_v6 = vld [vmem:[%s7105_s2 + $0x450] sm:$0xff] }
  0x95   :  { %3971 = vmatpush3.bf16.msra.mxu0 %v3970_v12  ;;  %v921_v12 = vld [vmem:[%s7105_s2 + $0x3c8] sm:$0xff] }
  0x96   :  { %3973 = vmatprep.subr.bf16.mxu0 %v3972_v13  ;;  %v924_v13 = vld [vmem:[%s7105_s2 + $0x3e0] sm:$0xff] }
  0x97   :  { %v3624_v21 = vpack.c.bf16 %v924_v13, %v921_v12  ;;  %v943_v12 = vld [vmem:[%s7105_s2 + $0x478] sm:$0xff]  ;;  %v945_v13 = vld [vmem:[%s7105_s2 + $0x488] sm:$0xff] }
  0x99   :  { %3975 = vmatpush3.bf16.msra.mxu0 %v3974_v18  ;;  %v920_v18 = vld [vmem:[%s7105_s2 + $0x3c0] sm:$0xff] }
  0x9a   :  { %3977 = vmatprep.subr.bf16.mxu0 %v3976_v20  ;;  %v923_v20 = vld [vmem:[%s7105_s2 + $0x3d8] sm:$0xff] }
  0x9b   :  { %v3626_v33 = vpack.c.bf16 %v923_v20, %v920_v18  ;;  %v4006_v20 = vpack.c.bf16 %v943_v12, %v940_v11  ;;  %v969_v11 = vld [vmem:[%s7105_s2 + $0x548] sm:$0xff]  ;;  %v972_v12 = vld [vmem:[%s7105_s2 + $0x560] sm:$0xff] }
  0xef   :  { %v357_v28 = vpop.f32.mrb[0].mxu0 }
  0xf0   :  { %v358_v30 = vadd.f32 %v357_v28, %v185_v26  ;;  %v359_v31 = vpop.f32.mrb[1].mxu0  ;;  %v3992_v26 = vpack.c.bf16 %v973_v15, %v970_v14  ;;  %v925_v28 = vld [vmem:[%s7105_s2 + $0x3e8] sm:$0xff]  ;;  %v948_v14 = vld [vmem:[%s7105_s2 + $0x4a0] sm:$0xff]  ;;  %v1042_v15 = vld [vmem:[%s7105_s2 + $0x790] sm:$0xff] }
  0xf1   :  { %v360_v35 = vadd.f32 %v359_v31, %v189_v27  ;;  %v922_v27 = vld [vmem:[%s7105_s2 + $0x3d0] sm:$0xff]  ;;  %v979_v31 = vld [vmem:[%s7105_s2 + $0x598] sm:$0xff] }
  0xf2   :  { %v787_v46 = vmax.f32 %v358_v30, 0.0  ;;  %v976_v30 = vld [vmem:[%s7105_s2 + $0x580] sm:$0xff]  ;;  %v3994_v34 = vpack.c.bf16 %v925_v28, %v922_v27  ;;  %v3640_v27 = vpack.c.bf16 %v948_v14, %v945_v13  ;;  %v1066_v13 = vld [vmem:[%s7105_s2 + $0x850] sm:$0xff]  ;;  %v1069_v14 = vld [vmem:[%s7105_s2 + $0x868] sm:$0xff] }
  0xf3   :  { %v788_v40 = vmax.f32 %v360_v35, 0.0  ;;  %v926_v35 = vld [vmem:[%s7105_s2 + $0x3f0] sm:$0xff]  ;;  %v3996_v39 = vpack.c.bf16 %v979_v31, %v976_v30  ;;  %v951_v30 = vld [vmem:[%s7105_s2 + $0x4b8] sm:$0xff] }
  0xf4   :  { %v3630_v49 = vpack.c.bf16 %v929_v37, %v926_v35  ;;  %v954_v31 = vld [vmem:[%s7105_s2 + $0x4d0] sm:$0xff] }
  0xf5   :  { %1485 = vmatprep.mubr.f32.mxu1 %v788_v40  ;;  %1982 = vmatprep.mubr.f32.mxu0 %v788_v40  ;;  %v928_v40 = vld [vmem:[%s7105_s2 + $0x400] sm:$0xff] }
  0xf6   :  { %1486 = vmatmul.mubr.f32.vlgmr.msra.gmra.mrb[4].mxu1 %v787_v46  ;;  %1983 = vmatmul.mubr.f32.vlgmr.msra.gmra.mrb[10].mxu0 %v787_v46  ;;  %v985_v46 = vld [vmem:[%s7105_s2 + $0x5c8] sm:$0xff] }
  0xf7   :  { %3611 = vmatpush1.bf16.msra.mxu1 %v3610_v41  ;;  %3979 = vmatpush3.bf16.msra.mxu0 %v3978_v42  ;;  %v931_v41 = vld [vmem:[%s7105_s2 + $0x418] sm:$0xff]  ;;  %v933_v42 = vld [vmem:[%s7105_s2 + $0x428] sm:$0xff] }
  0xf8   :  { %3613 = vmatprep.subr.bf16.mxu1 %v3612_v47  ;;  %3981 = vmatprep.subr.bf16.mxu0 %v3980_v48  ;;  %v197_v47 = vrot.slane %v5161_v24, %v196_v32  ;;  %v5319_v48 = vsub.s32 2, %v5153_v22  ;;  %v3998_v50 = vpack.c.bf16 %v931_v41, %v928_v40  ;;  %v3632_v54 = vpack.c.bf16 %v936_v43, %v933_v42  ;;  %v953_v40 = vld [vmem:[%s7105_s2 + $0x4c8] sm:$0xff]  ;;  %v1000_v43 = vld [vmem:[%s7105_s2 + $0x640] sm:$0xff] }
  0xf9   :  { %v3644_v41 = vpack.c.bf16 %v954_v31, %v951_v30  ;;  %v975_v30 = vld [vmem:[%s7105_s2 + $0x578] sm:$0xff] }
  0xfa   :  { %v193_v1 = vrot.slane %v5161_v24, %v5319_v48 }
  0xfb   :  { %3615 = vmatpush1.bf16.msra.mxu1 %v3614_v55  ;;  %3983 = vmatpush3.bf16.msra.mxu0 %v3982_v56  ;;  %v4000_v55 = vpack.c.bf16 %v985_v46, %v982_v44  ;;  %v934_v56 = vld [vmem:[%s7105_s2 + $0x430] sm:$0xff]  ;;  %v1003_v44 = vld [vmem:[%s7105_s2 + $0x658] sm:$0xff]  ;;  %v957_v46 = vld [vmem:[%s7105_s2 + $0x4e8] sm:$0xff] }
  0xfc   :  { %3617 = vmatprep.subr.bf16.mxu1 %v3616_v59  ;;  %3985 = vmatprep.subr.bf16.mxu0 %v3984_v60  ;;  %v939_v59 = vld [vmem:[%s7105_s2 + $0x458] sm:$0xff]  ;;  %v5345_v0 = vpop.f32.mrb[0].mxu1 }
  0xfd   :  { %v5349_v2 = vpop.f32.mrb[1].mxu1 }
  0xff   :  { %3619 = vmatpush1.bf16.msra.mxu1 %v3618_v3  ;;  %3987 = vmatpush3.bf16.msra.mxu0 %v3986_v4  ;;  %v3634_v3 = vpack.c.bf16 %v935_v53, %v932_v52  ;;  %v4002_v4 = vpack.c.bf16 %v937_v57, %v934_v56  ;;  %v4014_v52 = vpack.c.bf16 %v1003_v44, %v1000_v43  ;;  %v956_v53 = vld [vmem:[%s7105_s2 + $0x4e0] sm:$0xff]  ;;  %v1006_v57 = vld [vmem:[%s7105_s2 + $0x670] sm:$0xff]  ;;  %v977_v44 = vld [vmem:[%s7105_s2 + $0x588] sm:$0xff] }
 0x100   :  { %3621 = vmatprep.subr.bf16.mxu1 %v3620_v8  ;;  %3989 = vmatprep.subr.bf16.mxu0 %v3988_v9  ;;  %v941_v8 = vld [vmem:[%s7105_s2 + $0x468] sm:$0xff]  ;;  %v3636_v9 = vpack.c.bf16 %v942_v61, %v939_v59  ;;  %v963_v59 = vld [vmem:[%s7105_s2 + $0x518] sm:$0xff]  ;;  %v1060_v61 = vld [vmem:[%s7105_s2 + $0x820] sm:$0xff] }
 0x101   :  { %v3638_v18 = vpack.c.bf16 %v941_v8, %v938_v6  ;;  %v4020_v8 = vpack.c.bf16 %v1063_v62, %v1060_v61  ;;  %v974_v43 = vld [vmem:[%s7105_s2 + $0x570] sm:$0xff] }
 0x103   :  { %3623 = vmatpush1.bf16.msra.mxu1 %v3622_v16  ;;  %3991 = vmatpush3.bf16.msra.mxu0 %v3990_v17  ;;  %v1045_v16 = vld [vmem:[%s7105_s2 + $0x7a8] sm:$0xff] }
 0x104   :  { %3625 = vmatprep.subr.bf16.mxu1 %v3624_v21  ;;  %3993 = vmatprep.subr.bf16.mxu0 %v3992_v26  ;;  %v944_v21 = vld [vmem:[%s7105_s2 + $0x480] sm:$0xff]  ;;  %v947_v26 = vld [vmem:[%s7105_s2 + $0x498] sm:$0xff]  ;;  %v4008_v28 = vpack.c.bf16 %v1045_v16, %v1042_v15  ;;  %v205_v15 = vrot.slane %v5161_v24, %v204_v63  ;;  %v1030_v63 = vld [vmem:[%s7105_s2 + $0x730] sm:$0xff] }
 0x105   :  { %v3642_v37 = vpack.c.bf16 %v947_v26, %v944_v21  ;;  %v971_v21 = vld [vmem:[%s7105_s2 + $0x558] sm:$0xff] }
 0x107   :  { %3627 = vmatpush1.bf16.msra.mxu1 %v3626_v33  ;;  %3995 = vmatpush3.bf16.msra.mxu0 %v3994_v34  ;;  %v428_v51 = vpop.f32.mrb[2].mxu0  ;;  %v1048_v33 = vld [vmem:[%s7105_s2 + $0x7c0] sm:$0xff]  ;;  %v1051_v34 = vld [vmem:[%s7105_s2 + $0x7d8] sm:$0xff] }
 0x108   :  { %3629 = vmatprep.subr.bf16.mxu1 %v3628_v38  ;;  %3997 = vmatprep.subr.bf16.mxu0 %v3996_v39  ;;  %v430_v58 = vpop.f32.mrb[3].mxu0  ;;  %v5375_v17 = vadd.f32 %v428_v51, %v193_v1  ;;  %v4010_v38 = vpack.c.bf16 %v997_v45, %v994_v29  ;;  %v950_v39 = vld [vmem:[%s7105_s2 + $0x4b0] sm:$0xff]  ;;  %v4012_v42 = vpack.c.bf16 %v1051_v34, %v1048_v33  ;;  %v1021_v45 = vld [vmem:[%s7105_s2 + $0x6e8] sm:$0xff]  ;;  %v1072_v34 = vld [vmem:[%s7105_s2 + $0x880] sm:$0xff] }
 0x109   :  { %v431_v60 = vadd.f32 %v430_v58, %v197_v47  ;;  %v960_v47 = vld [vmem:[%s7105_s2 + $0x500] sm:$0xff]  ;;  %v3646_v51 = vpack.c.bf16 %v953_v40, %v950_v39  ;;  %v1009_v58 = vld [vmem:[%s7105_s2 + $0x688] sm:$0xff]  ;;  %v1018_v29 = vld [vmem:[%s7105_s2 + $0x6d0] sm:$0xff] }
 0x10a   :  { %v789_v35 = vmax.f32 %v5375_v17, 0.0  ;;  %v978_v33 = vld [vmem:[%s7105_s2 + $0x590] sm:$0xff] }
 0x10b   :  { %3631 = vmatpush1.bf16.msra.mxu1 %v3630_v49  ;;  %3999 = vmatpush3.bf16.msra.mxu0 %v3998_v50  ;;  %v790_v5 = vmax.f32 %v431_v60, 0.0  ;;  %v1054_v49 = vld [vmem:[%s7105_s2 + $0x7f0] sm:$0xff]  ;;  %v1057_v50 = vld [vmem:[%s7105_s2 + $0x808] sm:$0xff] }
 0x10c   :  { %3633 = vmatprep.subr.bf16.mxu1 %v3632_v54  ;;  %4001 = vmatprep.subr.bf16.mxu0 %v4000_v55  ;;  %v959_v54 = vld [vmem:[%s7105_s2 + $0x4f8] sm:$0xff]  ;;  %v3648_v55 = vpack.c.bf16 %v960_v47, %v957_v46  ;;  %v4016_v56 = vpack.c.bf16 %v1057_v50, %v1054_v49  ;;  %v966_v60 = vld [vmem:[%s7105_s2 + $0x530] sm:$0xff]  ;;  %v3660_v47 = vpack.c.bf16 %v978_v33, %v975_v30  ;;  %v1024_v50 = vld [vmem:[%s7105_s2 + $0x700] sm:$0xff] }
 0x10d   :  { %2052 = vmatprep.mubr.f32.mxu0 %v790_v5  ;;  %1556 = vmatprep.mubr.f32.mxu1 %v790_v5  ;;  %v3650_v1 = vpack.c.bf16 %v959_v54, %v956_v53  ;;  %v965_v5 = vld [vmem:[%s7105_s2 + $0x528] sm:$0xff]  ;;  %v3652_v6 = vpack.c.bf16 %v966_v60, %v963_v59  ;;  %v984_v53 = vld [vmem:[%s7105_s2 + $0x5c0] sm:$0xff]  ;;  %v1078_v54 = vld [vmem:[%s7105_s2 + $0x8b0] sm:$0xff] }
 0x10e   :  { %v980_v59 = vld [vmem:[%s7105_s2 + $0x5a0] sm:$0xff]  ;;  %v983_v60 = vld [vmem:[%s7105_s2 + $0x5b8] sm:$0xff] }
 0x10f   :  { %3635 = vmatpush1.bf16.msra.mxu1 %v3634_v3  ;;  %4003 = vmatpush3.bf16.msra.mxu0 %v4002_v4  ;;  %v4018_v3 = vpack.c.bf16 %v1009_v58, %v1006_v57  ;;  %v962_v4 = vld [vmem:[%s7105_s2 + $0x510] sm:$0xff]  ;;  %v3662_v57 = vpack.c.bf16 %v977_v44, %v974_v43  ;;  %v992_v33 = vld [vmem:[%s7105_s2 + $0x600] sm:$0xff]  ;;  %v999_v43 = vld [vmem:[%s7105_s2 + $0x638] sm:$0xff] }
 0x110   :  { %3637 = vmatprep.subr.bf16.mxu1 %v3636_v9  ;;  %4005 = vmatprep.subr.bf16.mxu0 %v4004_v10  ;;  %v1012_v9 = vld [vmem:[%s7105_s2 + $0x6a0] sm:$0xff]  ;;  %v1015_v10 = vld [vmem:[%s7105_s2 + $0x6b8] sm:$0xff]  ;;  %v3654_v16 = vpack.c.bf16 %v965_v5, %v962_v4  ;;  %v990_v4 = vld [vmem:[%s7105_s2 + $0x5f0] sm:$0xff] }
 0x111   :  { %v1084_v5 = vld [vmem:[%s7105_s2 + $0x8e0] sm:$0xff]  ;;  %v1002_v44 = vld [vmem:[%s7105_s2 + $0x650] sm:$0xff] }
 0x113   :  { %3639 = vmatpush1.bf16.msra.mxu1 %v3638_v18  ;;  %4007 = vmatpush3.bf16.msra.mxu0 %v4006_v20  ;;  %v4022_v18 = vpack.c.bf16 %v1015_v10, %v1012_v9  ;;  %v968_v20 = vld [vmem:[%s7105_s2 + $0x540] sm:$0xff]  ;;  %v3666_v10 = vpack.c.bf16 %v983_v60, %v980_v59  ;;  %v1099_v59 = vld [vmem:[%s7105_s2 + $0x958] sm:$0xff]  ;;  %v1005_v60 = vld [vmem:[%s7105_s2 + $0x668] sm:$0xff] }
 0x114   :  { %3641 = vmatprep.subr.bf16.mxu1 %v3640_v27  ;;  %4009 = vmatprep.subr.bf16.mxu0 %v4008_v28  ;;  %v3656_v27 = vpack.c.bf16 %v972_v12, %v969_v11  ;;  %v4024_v28 = vpack.c.bf16 %v1069_v14, %v1066_v13  ;;  %v5506_v39 = vpop.f32.mrb[2].mxu1  ;;  %v986_v12 = vld [vmem:[%s7105_s2 + $0x5d0] sm:$0xff]  ;;  %v989_v13 = vld [vmem:[%s7105_s2 + $0x5e8] sm:$0xff] }
 0x115   :  { %v5508_v40 = vpop.f32.mrb[3].mxu1  ;;  %v3670_v30 = vpack.c.bf16 %v989_v13, %v986_v12  ;;  %v1014_v13 = vld [vmem:[%s7105_s2 + $0x6b0] sm:$0xff] }
 0x116   :  { %2053 = vmatmul.mubr.f32.vlgmr.msra.gmra.mrb[12].mxu0 %v789_v35 }
 0x117   :  { %3643 = vmatpush1.bf16.msra.mxu1 %v3642_v37  ;;  %4011 = vmatpush3.bf16.msra.mxu0 %v4010_v38  ;;  %v1075_v37 = vld [vmem:[%s7105_s2 + $0x898] sm:$0xff] }
 0x118   :  { %3645 = vmatprep.subr.bf16.mxu1 %v3644_v41  ;;  %4013 = vmatprep.subr.bf16.mxu0 %v4012_v42  ;;  %v3658_v41 = vpack.c.bf16 %v971_v21, %v968_v20  ;;  %v4026_v42 = vpack.c.bf16 %v1021_v45, %v1018_v29  ;;  %v4028_v49 = vpack.c.bf16 %v1075_v37, %v1072_v34  ;;  %v993_v20 = vld [vmem:[%s7105_s2 + $0x608] sm:$0xff]  ;;  %v996_v21 = vld [vmem:[%s7105_s2 + $0x620] sm:$0xff]  ;;  %v995_v34 = vld [vmem:[%s7105_s2 + $0x618] sm:$0xff] }
 0x119   :  { %v3672_v37 = vpack.c.bf16 %v996_v21, %v993_v20  ;;  %v1010_v20 = vld [vmem:[%s7105_s2 + $0x690] sm:$0xff]  ;;  %v1013_v21 = vld [vmem:[%s7105_s2 + $0x6a8] sm:$0xff] }
 0x11b   :  { %3647 = vmatpush1.bf16.msra.mxu1 %v3646_v51  ;;  %4015 = vmatpush3.bf16.msra.mxu0 %v4014_v52  ;;  %v1027_v51 = vld [vmem:[%s7105_s2 + $0x718] sm:$0xff]  ;;  %v981_v52 = vld [vmem:[%s7105_s2 + $0x5a8] sm:$0xff] }
 0x11c   :  { %3649 = vmatprep.subr.bf16.mxu1 %v3648_v55  ;;  %4017 = vmatprep.subr.bf16.mxu0 %v4016_v56  ;;  %v1081_v55 = vld [vmem:[%s7105_s2 + $0x8c8] sm:$0xff]  ;;  %v200_v56 = vsub.s32 4, %v5153_v22  ;;  %v4030_v58 = vpack.c.bf16 %v1027_v51, %v1024_v50  ;;  %v3664_v61 = vpack.c.bf16 %v984_v53, %v981_v52  ;;  %v3674_v52 = vpack.c.bf16 %v995_v34, %v992_v33 }
 0x11d   :  { %v4032_v62 = vpack.c.bf16 %v1081_v55, %v1078_v54  ;;  %v998_v54 = vld [vmem:[%s7105_s2 + $0x630] sm:$0xff]  ;;  %v1001_v55 = vld [vmem:[%s7105_s2 + $0x648] sm:$0xff]  ;;  %v3686_v34 = vpack.c.bf16 %v1013_v21, %v1010_v20  ;;  %v1180_v20 = vld [vmem:[%s7105_s2 + $0xbe0] sm:$0xff] }
 0x11e   :  { %v201_v9 = vrot.slane %v5161_v24, %v200_v56  ;;  %v1165_v33 = vld [vmem:[%s7105_s2 + $0xb68] sm:$0xff]  ;;  %v1183_v21 = vld [vmem:[%s7105_s2 + $0xbf8] sm:$0xff] }
 0x11f   :  { %3651 = vmatpush1.bf16.msra.mxu1 %v3650_v1  ;;  %4019 = vmatpush3.bf16.msra.mxu0 %v4018_v3  ;;  %v5484_v26 = vpop.f32.mrb[4].mxu0  ;;  %v1033_v1 = vld [vmem:[%s7105_s2 + $0x748] sm:$0xff]  ;;  %v987_v3 = vld [vmem:[%s7105_s2 + $0x5d8] sm:$0xff] }
 0x120   :  { %3653 = vmatprep.subr.bf16.mxu1 %v3652_v6  ;;  %4021 = vmatprep.subr.bf16.mxu0 %v4020_v8  ;;  %v501_v31 = vpop.f32.mrb[5].mxu0  ;;  %v1087_v6 = vld [vmem:[%s7105_s2 + $0x8f8] sm:$0xff]  ;;  %v212_v8 = vsub.s32 7, %v5153_v22  ;;  %v4034_v11 = vpack.c.bf16 %v1033_v1, %v1030_v63  ;;  %v3668_v14 = vpack.c.bf16 %v990_v4, %v987_v3  ;;  %v5592_v45 = vadd.f32 %v5484_v26, %v201_v9  ;;  %v1090_v26 = vld [vmem:[%s7105_s2 + $0x910] sm:$0xff]  ;;  %v1153_v63 = vld [vmem:[%s7105_s2 + $0xb08] sm:$0xff] }
 0x121   :  { %v5504_v38 = vadd.f32 %v501_v31, %v205_v15  ;;  %v4036_v15 = vpack.c.bf16 %v1087_v6, %v1084_v5  ;;  %v3678_v3 = vpack.c.bf16 %v1001_v55, %v998_v54  ;;  %v1004_v5 = vld [vmem:[%s7105_s2 + $0x660] sm:$0xff]  ;;  %v1007_v6 = vld [vmem:[%s7105_s2 + $0x678] sm:$0xff]  ;;  %v1102_v9 = vld [vmem:[%s7105_s2 + $0x970] sm:$0xff] }
 0x122   :  { %v213_v29 = vrot.slane %v5161_v24, %v212_v8  ;;  %v791_v51 = vmax.f32 %v5592_v45, 0.0  ;;  %v1171_v54 = vld [vmem:[%s7105_s2 + $0xb98] sm:$0xff] }
 0x123   :  { %3655 = vmatpush1.bf16.msra.mxu1 %v3654_v16  ;;  %4023 = vmatpush3.bf16.msra.mxu0 %v4022_v18  ;;  %v792_v46 = vmax.f32 %v5504_v38, 0.0  ;;  %v1036_v16 = vld [vmem:[%s7105_s2 + $0x760] sm:$0xff]  ;;  %v1039_v18 = vld [vmem:[%s7105_s2 + $0x778] sm:$0xff] }
 0x124   :  { %3657 = vmatprep.subr.bf16.mxu1 %v3656_v27  ;;  %4025 = vmatprep.subr.bf16.mxu0 %v4024_v28  ;;  %v1138_v27 = vld [vmem:[%s7105_s2 + $0xa90] sm:$0xff]  ;;  %v1141_v28 = vld [vmem:[%s7105_s2 + $0xaa8] sm:$0xff]  ;;  %v4038_v31 = vpack.c.bf16 %v1039_v18, %v1036_v16  ;;  %v5619_v50 = vadd.f32 %v5349_v2, %v213_v29  ;;  %v1096_v2 = vld [vmem:[%s7105_s2 + $0x940] sm:$0xff]  ;;  %v3682_v16 = vpack.c.bf16 %v1007_v6, %v1004_v5  ;;  %v208_v6 = vsub.s32 6, %v5153_v22 }
 0x125   :  { %2122 = vmatprep.mubr.f32.mxu0 %v792_v46  ;;  %v4046_v4 = vpack.c.bf16 %v1099_v59, %v1096_v2  ;;  %v1108_v38 = vld [vmem:[%s7105_s2 + $0x9a0] sm:$0xff]  ;;  %v1017_v29 = vld [vmem:[%s7105_s2 + $0x6c8] sm:$0xff]  ;;  %v1091_v22 = vld [vmem:[%s7105_s2 + $0x918] sm:$0xff] }
 0x126   :  { %v794_v1 = vmax.f32 %v5619_v50, 0.0  ;;  %v1025_v2 = vld [vmem:[%s7105_s2 + $0x708] sm:$0xff] }
 0x127   :  { %3659 = vmatpush1.bf16.msra.mxu1 %v3658_v41  ;;  %4027 = vmatpush3.bf16.msra.mxu0 %v4026_v42  ;;  %v4040_v41 = vpack.c.bf16 %v1141_v28, %v1138_v27  ;;  %v1093_v42 = vld [vmem:[%s7105_s2 + $0x928] sm:$0xff] }
 0x128   :  { %3661 = vmatprep.subr.bf16.mxu1 %v3660_v47  ;;  %4029 = vmatprep.subr.bf16.mxu0 %v4028_v49  ;;  %v1144_v47 = vld [vmem:[%s7105_s2 + $0xac0] sm:$0xff]  ;;  %v1147_v49 = vld [vmem:[%s7105_s2 + $0xad8] sm:$0xff]  ;;  %v4042_v53 = vpack.c.bf16 %v1093_v42, %v1090_v26  ;;  %v1177_v5 = vld [vmem:[%s7105_s2 + $0xbc8] sm:$0xff] }
 0x129   :  { %v1019_v26 = vld [vmem:[%s7105_s2 + $0x6d8] sm:$0xff] }
 0x12b   :  { %3663 = vmatpush1.bf16.msra.mxu1 %v3662_v57  ;;  %4031 = vmatpush3.bf16.msra.mxu0 %v4030_v58  ;;  %v3676_v57 = vpack.c.bf16 %v1002_v44, %v999_v43  ;;  %v4044_v58 = vpack.c.bf16 %v1147_v49, %v1144_v47  ;;  %v1114_v44 = vld [vmem:[%s7105_s2 + $0x9d0] sm:$0xff]  ;;  %v1117_v47 = vld [vmem:[%s7105_s2 + $0x9e8] sm:$0xff]  ;;  %v1023_v49 = vld [vmem:[%s7105_s2 + $0x6f8] sm:$0xff] }
 0x12c   :  { %3665 = vmatprep.subr.bf16.mxu1 %v3664_v61  ;;  %4033 = vmatprep.subr.bf16.mxu0 %v4032_v62  ;;  %v1008_v61 = vld [vmem:[%s7105_s2 + $0x680] sm:$0xff]  ;;  %v1150_v62 = vld [vmem:[%s7105_s2 + $0xaf0] sm:$0xff] }
 0x12d   :  { %v3680_v17 = vpack.c.bf16 %v1008_v61, %v1005_v60  ;;  %v1120_v61 = vld [vmem:[%s7105_s2 + $0xa00] sm:$0xff] }
 0x12f   :  { %3667 = vmatpush1.bf16.msra.mxu1 %v3666_v10  ;;  %4035 = vmatpush3.bf16.msra.mxu0 %v4034_v11  ;;  %v1105_v10 = vld [vmem:[%s7105_s2 + $0x988] sm:$0xff]  ;;  %v1011_v11 = vld [vmem:[%s7105_s2 + $0x698] sm:$0xff] }
 0x130   :  { %3669 = vmatprep.subr.bf16.mxu1 %v3668_v14  ;;  %4037 = vmatprep.subr.bf16.mxu0 %v4036_v15  ;;  %v1156_v14 = vld [vmem:[%s7105_s2 + $0xb20] sm:$0xff]  ;;  %v1159_v15 = vld [vmem:[%s7105_s2 + $0xb38] sm:$0xff]  ;;  %v4050_v18 = vpack.c.bf16 %v1105_v10, %v1102_v9  ;;  %v3684_v27 = vpack.c.bf16 %v1014_v13, %v1011_v11 }
 0x131   :  { %v4052_v28 = vpack.c.bf16 %v1159_v15, %v1156_v14  ;;  %v1028_v9 = vld [vmem:[%s7105_s2 + $0x720] sm:$0xff]  ;;  %v1031_v10 = vld [vmem:[%s7105_s2 + $0x738] sm:$0xff]  ;;  %v1126_v14 = vld [vmem:[%s7105_s2 + $0xa30] sm:$0xff] }
 0x132   :  { %v1129_v15 = vld [vmem:[%s7105_s2 + $0xa48] sm:$0xff] }
 0x133   :  { %3671 = vmatpush1.bf16.msra.mxu1 %v3670_v30  ;;  %4039 = vmatpush3.bf16.msra.mxu0 %v4038_v31  ;;  %v1020_v30 = vld [vmem:[%s7105_s2 + $0x6e0] sm:$0xff]  ;;  %v1162_v31 = vld [vmem:[%s7105_s2 + $0xb50] sm:$0xff] }
 0x134   :  { %3673 = vmatprep.subr.bf16.mxu1 %v3672_v37  ;;  %4041 = vmatprep.subr.bf16.mxu0 %v4040_v41  ;;  %v1016_v41 = vld [vmem:[%s7105_s2 + $0x6c0] sm:$0xff]  ;;  %v3688_v42 = vpack.c.bf16 %v1020_v30, %v1017_v29  ;;  %v4056_v43 = vpack.c.bf16 %v1165_v33, %v1162_v31  ;;  %v1034_v29 = vld [vmem:[%s7105_s2 + $0x750] sm:$0xff]  ;;  %v1037_v30 = vld [vmem:[%s7105_s2 + $0x768] sm:$0xff]  ;;  %v4068_v31 = vpack.c.bf16 %v1183_v21, %v1180_v20 }
 0x135   :  { %v3690_v55 = vpack.c.bf16 %v1019_v26, %v1016_v41  ;;  %v1132_v33 = vld [vmem:[%s7105_s2 + $0xa60] sm:$0xff] }
 0x136   :  { %1557 = vmatmul.mubr.f32.vlgmr.msra.gmra.mrb[4].mxu1 %v789_v35  ;;  %2123 = vmatmul.mubr.f32.vlgmr.msra.gmra.mrb[14].mxu0 %v791_v51  ;;  %v4048_v35 = vpack.c.bf16 %v1153_v63, %v1150_v62  ;;  %v1123_v62 = vld [vmem:[%s7105_s2 + $0xa18] sm:$0xff]  ;;  %v1029_v63 = vld [vmem:[%s7105_s2 + $0x728] sm:$0xff]  ;;  %v1044_v26 = vld [vmem:[%s7105_s2 + $0x7a0] sm:$0xff] }
 0x137   :  { %3675 = vmatpush1.bf16.msra.mxu1 %v3674_v52  ;;  %4043 = vmatpush3.bf16.msra.mxu0 %v4042_v53  ;;  %v5657_v8 = vpop.f32.mrb[6].mxu0  ;;  %v1026_v52 = vld [vmem:[%s7105_s2 + $0x710] sm:$0xff]  ;;  %v1168_v53 = vld [vmem:[%s7105_s2 + $0xb80] sm:$0xff] }
 0x138   :  { %3677 = vmatprep.subr.bf16.mxu1 %v3676_v57  ;;  %4045 = vmatprep.subr.bf16.mxu0 %v4044_v58  ;;  %v5668_v12 = vpop.f32.mrb[7].mxu0  ;;  %v4058_v57 = vpack.c.bf16 %v1117_v47, %v1114_v44  ;;  %v1022_v58 = vld [vmem:[%s7105_s2 + $0x6f0] sm:$0xff]  ;;  %v3692_v59 = vpack.c.bf16 %v1026_v52, %v1023_v49  ;;  %v4060_v60 = vpack.c.bf16 %v1171_v54, %v1168_v53  ;;  %v1040_v52 = vld [vmem:[%s7105_s2 + $0x780] sm:$0xff]  ;;  %v1043_v53 = vld [vmem:[%s7105_s2 + $0x798] sm:$0xff] }
 0x139   :  { %2192 = vmatprep.mubr.f32.mxu0 %v794_v1  ;;  %1627 = vmatprep.mubr.f32.mxu1 %v792_v46  ;;  %v1111_v46 = vld [vmem:[%s7105_s2 + $0x9b8] sm:$0xff] }
 0x13a   :  { %v4054_v37 = vpack.c.bf16 %v1111_v46, %v1108_v38  ;;  %v3698_v38 = vpack.c.bf16 %v1031_v10, %v1028_v9  ;;  %v4066_v46 = vpack.c.bf16 %v1129_v15, %v1126_v14  ;;  %v1056_v14 = vld [vmem:[%s7105_s2 + $0x800] sm:$0xff]  ;;  %v1246_v15 = vld [vmem:[%s7105_s2 + $0xdf0] sm:$0xff] }
 0x13b   :  { %3679 = vmatpush1.bf16.msra.mxu1 %v3678_v3  ;;  %4047 = vmatpush3.bf16.msra.mxu0 %v4046_v4  ;;  %v1032_v3 = vld [vmem:[%s7105_s2 + $0x740] sm:$0xff]  ;;  %v1174_v4 = vld [vmem:[%s7105_s2 + $0xbb0] sm:$0xff] }
 0x13c   :  { %3681 = vmatprep.subr.bf16.mxu1 %v3680_v17  ;;  %4049 = vmatprep.subr.bf16.mxu0 %v4048_v35  ;;  %v3694_v17 = vpack.c.bf16 %v1025_v2, %v1022_v58  ;;  %v4062_v35 = vpack.c.bf16 %v1123_v62, %v1120_v61  ;;  %v3696_v11 = vpack.c.bf16 %v1032_v3, %v1029_v63  ;;  %v1189_v58 = vld [vmem:[%s7105_s2 + $0xc28] sm:$0xff]  ;;  %v1047_v2 = vld [vmem:[%s7105_s2 + $0x7b8] sm:$0xff]  ;;  %v1050_v61 = vld [vmem:[%s7105_s2 + $0x7d0] sm:$0xff] }
 0x13d   :  { %v4064_v13 = vpack.c.bf16 %v1177_v5, %v1174_v4  ;;  %v1240_v62 = vld [vmem:[%s7105_s2 + $0xdc0] sm:$0xff]  ;;  %v1243_v63 = vld [vmem:[%s7105_s2 + $0xdd8] sm:$0xff]  ;;  %v3706_v5 = vpack.c.bf16 %v1043_v53, %v1040_v52  ;;  %v3708_v9 = vpack.c.bf16 %v1050_v61, %v1047_v2  ;;  %v1065_v53 = vld [vmem:[%s7105_s2 + $0x848] sm:$0xff] }
 0x13e   :  { %v4076_v10 = vpack.c.bf16 %v1243_v63, %v1240_v62  ;;  %v1207_v52 = vld [vmem:[%s7105_s2 + $0xcb8] sm:$0xff]  ;;  %v1064_v2 = vld [vmem:[%s7105_s2 + $0x840] sm:$0xff]  ;;  %v1210_v63 = vld [vmem:[%s7105_s2 + $0xcd0] sm:$0xff] }
 0x13f   :  { %3683 = vmatpush1.bf16.msra.mxu1 %v3682_v16  ;;  %4051 = vmatpush3.bf16.msra.mxu0 %v4050_v18  ;;  %v1035_v16 = vld [vmem:[%s7105_s2 + $0x758] sm:$0xff]  ;;  %v1038_v18 = vld [vmem:[%s7105_s2 + $0x770] sm:$0xff] }
 0x140   :  { %3685 = vmatprep.subr.bf16.mxu1 %v3684_v27  ;;  %4053 = vmatprep.subr.bf16.mxu0 %v4052_v28  ;;  %v209_v27 = vrot.slane %v5161_v24, %v208_v6  ;;  %v5784_v28 = vld [vmem:[%s7107_s4 + $0x8] sm:$0x1f]  ;;  %v3700_v24 = vpack.c.bf16 %v1038_v18, %v1035_v16 }
 0x141   :  { %v233_v41 = vrot.slane %v5784_v28, %v200_v56  ;;  %v221_v44 = vrot.slane %v5784_v28, %v5164_v25  ;;  %v3702_v56 = vpack.c.bf16 %v1037_v30, %v1034_v29  ;;  %v1249_v16 = vld [vmem:[%s7105_s2 + $0xe08] sm:$0xff]  ;;  %v1198_v30 = vld [vmem:[%s7105_s2 + $0xc70] sm:$0xff] }
 0x142   :  { %v5816_v47 = vadd.f32 %v5345_v0, %v209_v27  ;;  %v1186_v0 = vld [vmem:[%s7105_s2 + $0xc10] sm:$0xff]  ;;  %v1052_v27 = vld [vmem:[%s7105_s2 + $0x7e0] sm:$0xff]  ;;  %v4080_v29 = vpack.c.bf16 %v1249_v16, %v1246_v15 }
 0x143   :  { %3687 = vmatpush1.bf16.msra.mxu1 %v3686_v34  ;;  %4055 = vmatpush3.bf16.msra.mxu0 %v4054_v37  ;;  %v1135_v34 = vld [vmem:[%s7105_s2 + $0xa78] sm:$0xff]  ;;  %v1041_v37 = vld [vmem:[%s7105_s2 + $0x788] sm:$0xff]  ;;  %v5845_v3 = vadd.f32 %v5668_v12, %v221_v44  ;;  %v4074_v6 = vpack.c.bf16 %v1189_v58, %v1186_v0  ;;  %v1192_v12 = vld [vmem:[%s7105_s2 + $0xc40] sm:$0xff] }
 0x144   :  { %3689 = vmatprep.subr.bf16.mxu1 %v3688_v42  ;;  %4057 = vmatprep.subr.bf16.mxu0 %v4056_v43  ;;  %v1234_v42 = vld [vmem:[%s7105_s2 + $0xd90] sm:$0xff]  ;;  %v1237_v43 = vld [vmem:[%s7105_s2 + $0xda8] sm:$0xff]  ;;  %v4070_v49 = vpack.c.bf16 %v1135_v34, %v1132_v33  ;;  %v793_v4 = vmax.f32 %v5816_v47, 0.0  ;;  %v1252_v34 = vld [vmem:[%s7105_s2 + $0xe20] sm:$0xff] }
 0x145   :  { %v796_v18 = vmax.f32 %v5845_v3, 0.0  ;;  %v1062_v33 = vld [vmem:[%s7105_s2 + $0x830] sm:$0xff]  ;;  %v1216_v16 = vld [vmem:[%s7105_s2 + $0xd00] sm:$0xff]  ;;  %v1203_v47 = vld [vmem:[%s7105_s2 + $0xc98] sm:$0xff] }
 0x147   :  { %3691 = vmatpush1.bf16.msra.mxu1 %v3690_v55  ;;  %4059 = vmatpush3.bf16.msra.mxu0 %v4058_v57  ;;  %v3704_v55 = vpack.c.bf16 %v1044_v26, %v1041_v37  ;;  %v4072_v57 = vpack.c.bf16 %v1237_v43, %v1234_v42  ;;  %v1255_v37 = vld [vmem:[%s7105_s2 + $0xe38] sm:$0xff]  ;;  %v1058_v42 = vld [vmem:[%s7105_s2 + $0x810] sm:$0xff]  ;;  %v1061_v43 = vld [vmem:[%s7105_s2 + $0x828] sm:$0xff] }
 0x148   :  { %3693 = vmatprep.subr.bf16.mxu1 %v3692_v59  ;;  %4061 = vmatprep.subr.bf16.mxu0 %v4060_v60  ;;  %v3718_v0 = vpack.c.bf16 %v1061_v43, %v1058_v42  ;;  %v1086_v42 = vld [vmem:[%s7105_s2 + $0x8f0] sm:$0xff]  ;;  %v1276_v43 = vld [vmem:[%s7105_s2 + $0xee0] sm:$0xff] }
 0x14b   :  { %3695 = vmatpush1.bf16.msra.mxu1 %v3694_v17  ;;  %4063 = vmatpush3.bf16.msra.mxu0 %v4062_v35  ;;  %v1046_v17 = vld [vmem:[%s7105_s2 + $0x7b0] sm:$0xff]  ;;  %v1049_v35 = vld [vmem:[%s7105_s2 + $0x7c8] sm:$0xff] }
 0x14c   :  { %3697 = vmatprep.subr.bf16.mxu1 %v3696_v11  ;;  %4065 = vmatprep.subr.bf16.mxu0 %v4064_v13  ;;  %v1195_v11 = vld [vmem:[%s7105_s2 + $0xc58] sm:$0xff]  ;;  %v1053_v13 = vld [vmem:[%s7105_s2 + $0x7e8] sm:$0xff]  ;;  %v3710_v20 = vpack.c.bf16 %v1049_v35, %v1046_v17  ;;  %v1074_v17 = vld [vmem:[%s7105_s2 + $0x890] sm:$0xff] }
 0x14d   :  { %v4078_v21 = vpack.c.bf16 %v1195_v11, %v1192_v12  ;;  %v1264_v35 = vld [vmem:[%s7105_s2 + $0xe80] sm:$0xff]  ;;  %v1070_v11 = vld [vmem:[%s7105_s2 + $0x870] sm:$0xff] }
 0x14f   :  { %3699 = vmatpush1.bf16.msra.mxu1 %v3698_v38  ;;  %4067 = vmatpush3.bf16.msra.mxu0 %v4066_v46  ;;  %v783_v54 = vpop.f32.mrb[8].mxu0  ;;  %v1055_v38 = vld [vmem:[%s7105_s2 + $0x7f8] sm:$0xff]  ;;  %v3712_v46 = vpack.c.bf16 %v1056_v14, %v1053_v13  ;;  %v1073_v13 = vld [vmem:[%s7105_s2 + $0x888] sm:$0xff] }
 0x150   :  { %3701 = vmatprep.subr.bf16.mxu1 %v3700_v24  ;;  %4069 = vmatprep.subr.bf16.mxu0 %v4068_v31  ;;  %v5833_v59 = vadd.f32 %v783_v54, %v233_v41  ;;  %v3255_v60 = vpop.f32.mrb[9].mxu0  ;;  %v1201_v24 = vld [vmem:[%s7105_s2 + $0xc88] sm:$0xff]  ;;  %v1059_v31 = vld [vmem:[%s7105_s2 + $0x818] sm:$0xff]  ;;  %v3714_v41 = vpack.c.bf16 %v1055_v38, %v1052_v27  ;;  %v1068_v54 = vld [vmem:[%s7105_s2 + $0x860] sm:$0xff] }
 0x151   :  { %v4082_v26 = vpack.c.bf16 %v1201_v24, %v1198_v30  ;;  %v3716_v44 = vpack.c.bf16 %v1062_v33, %v1059_v31  ;;  %v1067_v60 = vld [vmem:[%s7105_s2 + $0x858] sm:$0xff]  ;;  %v3720_v61 = vpack.c.bf16 %v1068_v54, %v1065_v53  ;;  %v1080_v27 = vld [vmem:[%s7105_s2 + $0x8c0] sm:$0xff]  ;;  %v1270_v38 = vld [vmem:[%s7105_s2 + $0xeb0] sm:$0xff] }
 0x152   :  { %v1076_v24 = vld [vmem:[%s7105_s2 + $0x8a0] sm:$0xff]  ;;  %v1079_v31 = vld [vmem:[%s7105_s2 + $0x8b8] sm:$0xff]  ;;  %v1082_v53 = vld [vmem:[%s7105_s2 + $0x8d0] sm:$0xff] }
 0x153   :  { %3703 = vmatpush1.bf16.msra.mxu1 %v3702_v56  ;;  %4071 = vmatpush3.bf16.msra.mxu0 %v4070_v49  ;;  %v4084_v56 = vpack.c.bf16 %v1255_v37, %v1252_v34  ;;  %v1204_v49 = vld [vmem:[%s7105_s2 + $0xca0] sm:$0xff]  ;;  %v1222_v37 = vld [vmem:[%s7105_s2 + $0xd30] sm:$0xff]  ;;  %v1085_v54 = vld [vmem:[%s7105_s2 + $0x8e8] sm:$0xff] }
 0x154   :  { %3705 = vmatprep.subr.bf16.mxu1 %v3704_v55  ;;  %4073 = vmatprep.subr.bf16.mxu0 %v4072_v57  ;;  %v1258_v55 = vld [vmem:[%s7105_s2 + $0xe50] sm:$0xff]  ;;  %v1261_v57 = vld [vmem:[%s7105_s2 + $0xe68] sm:$0xff]  ;;  %v4086_v58 = vpack.c.bf16 %v1207_v52, %v1204_v49  ;;  %v3730_v49 = vpack.c.bf16 %v1079_v31, %v1076_v24  ;;  %v1104_v31 = vld [vmem:[%s7105_s2 + $0x980] sm:$0xff] }
 0x155   :  { %v4088_v62 = vpack.c.bf16 %v1261_v57, %v1258_v55  ;;  %v1101_v24 = vld [vmem:[%s7105_s2 + $0x968] sm:$0xff] }
 0x156   :  { %2193 = vmatmul.mubr.f32.vlgmr.msra.gmra.mrb[16].mxu0 %v793_v4 }
 0x157   :  { %3707 = vmatpush1.bf16.msra.mxu1 %v3706_v5  ;;  %4075 = vmatpush3.bf16.msra.mxu0 %v4074_v6  ;;  %v1213_v5 = vld [vmem:[%s7105_s2 + $0xce8] sm:$0xff]  ;;  %v1071_v6 = vld [vmem:[%s7105_s2 + $0x878] sm:$0xff] }
 0x158   :  { %3709 = vmatprep.subr.bf16.mxu1 %v3708_v9  ;;  %4077 = vmatprep.subr.bf16.mxu0 %v4076_v10  ;;  %v1267_v9 = vld [vmem:[%s7105_s2 + $0xe98] sm:$0xff]  ;;  %v3722_v10 = vpack.c.bf16 %v1067_v60, %v1064_v2  ;;  %v4090_v12 = vpack.c.bf16 %v1213_v5, %v1210_v63  ;;  %v3724_v14 = vpack.c.bf16 %v1074_v17, %v1071_v6  ;;  %v1089_v2 = vld [vmem:[%s7105_s2 + $0x908] sm:$0xff]  ;;  %v1092_v60 = vld [vmem:[%s7105_s2 + $0x920] sm:$0xff] }
 0x159   :  { %2262 = vmatprep.mubr.f32.mxu0 %v796_v18  ;;  %v4092_v15 = vpack.c.bf16 %v1267_v9, %v1264_v35  ;;  %v229_v63 = vrot.slane %v5784_v28, %v196_v32  ;;  %v3734_v6 = vpack.c.bf16 %v1085_v54, %v1082_v53  ;;  %v3736_v35 = vpack.c.bf16 %v1092_v60, %v1089_v2  ;;  %v1282_v32 = vld [vmem:[%s7105_s2 + $0xf10] sm:$0xff]  ;;  %v1303_v60 = vld [vmem:[%s7105_s2 + $0xfb8] sm:$0xff] }
 0x15b   :  { %3711 = vmatpush1.bf16.msra.mxu1 %v3710_v20  ;;  %4079 = vmatpush3.bf16.msra.mxu0 %v4078_v21  ;;  %v1219_v20 = vld [vmem:[%s7105_s2 + $0xd18] sm:$0xff]  ;;  %v1077_v21 = vld [vmem:[%s7105_s2 + $0x8a8] sm:$0xff] }
 0x15c   :  { %3713 = vmatprep.subr.bf16.mxu1 %v3712_v46  ;;  %4081 = vmatprep.subr.bf16.mxu0 %v4080_v29  ;;  %v1273_v46 = vld [vmem:[%s7105_s2 + $0xec8] sm:$0xff]  ;;  %v3726_v29 = vpack.c.bf16 %v1073_v13, %v1070_v11  ;;  %v4094_v30 = vpack.c.bf16 %v1219_v20, %v1216_v16  ;;  %v3728_v33 = vpack.c.bf16 %v1080_v27, %v1077_v21  ;;  %v1098_v11 = vld [vmem:[%s7105_s2 + $0x950] sm:$0xff]  ;;  %v1339_v16 = vld [vmem:[%s7105_s2 + $0x10d8] sm:$0xff] }
 0x15d   :  { %v4096_v34 = vpack.c.bf16 %v1273_v46, %v1270_v38  ;;  %v6048_v13 = vadd.f32 %v5508_v40, %v229_v63  ;;  %v1094_v40 = vld [vmem:[%s7105_s2 + $0x930] sm:$0xff]  ;;  %v1097_v38 = vld [vmem:[%s7105_s2 + $0x948] sm:$0xff]  ;;  %v1288_v46 = vld [vmem:[%s7105_s2 + $0xf40] sm:$0xff] }
 0x15e   :  { %v1354_v63 = vld [vmem:[%s7105_s2 + $0x1150] sm:$0xff] }
 0x15f   :  { %3715 = vmatpush1.bf16.msra.mxu1 %v3714_v41  ;;  %4083 = vmatpush3.bf16.msra.mxu0 %v4082_v26  ;;  %v1225_v41 = vld [vmem:[%s7105_s2 + $0xd48] sm:$0xff]  ;;  %v1083_v26 = vld [vmem:[%s7105_s2 + $0x8d8] sm:$0xff] }
 0x160   :  { %3717 = vmatprep.subr.bf16.mxu1 %v3716_v44  ;;  %4085 = vmatprep.subr.bf16.mxu0 %v4084_v56  ;;  %v1279_v44 = vld [vmem:[%s7105_s2 + $0xef8] sm:$0xff]  ;;  %v217_v56 = vrot.slane %v5784_v28, %v5156_v23  ;;  %v4098_v52 = vpack.c.bf16 %v1225_v41, %v1222_v37  ;;  %v3732_v55 = vpack.c.bf16 %v1086_v42, %v1083_v26  ;;  %v1345_v37 = vld [vmem:[%s7105_s2 + $0x1108] sm:$0xff]  ;;  %v1100_v26 = vld [vmem:[%s7105_s2 + $0x960] sm:$0xff] }
 0x161   :  { %v4100_v57 = vpack.c.bf16 %v1279_v44, %v1276_v43  ;;  %v3742_v41 = vpack.c.bf16 %v1097_v38, %v1094_v40  ;;  %v1103_v42 = vld [vmem:[%s7105_s2 + $0x978] sm:$0xff]  ;;  %v1294_v43 = vld [vmem:[%s7105_s2 + $0xf70] sm:$0xff] }
 0x162   :  { %v6027_v5 = vadd.f32 %v5657_v8, %v217_v56  ;;  %v1285_v8 = vld [vmem:[%s7105_s2 + $0xf28] sm:$0xff]  ;;  %v1107_v44 = vld [vmem:[%s7105_s2 + $0x998] sm:$0xff]  ;;  %v1110_v56 = vld [vmem:[%s7105_s2 + $0x9b0] sm:$0xff]  ;;  %v3746_v53 = vpack.c.bf16 %v1103_v42, %v1100_v26 }
 0x163   :  { %3719 = vmatpush1.bf16.msra.mxu1 %v3718_v0  ;;  %4087 = vmatpush3.bf16.msra.mxu0 %v4086_v58  ;;  %v1228_v0 = vld [vmem:[%s7105_s2 + $0xd60] sm:$0xff]  ;;  %v1231_v58 = vld [vmem:[%s7105_s2 + $0xd78] sm:$0xff]  ;;  %v4106_v21 = vpack.c.bf16 %v1285_v8, %v1282_v32  ;;  %v1306_v32 = vld [vmem:[%s7105_s2 + $0xfd0] sm:$0xff] }
 0x164   :  { %3721 = vmatprep.subr.bf16.mxu1 %v3720_v61  ;;  %4089 = vmatprep.subr.bf16.mxu0 %v4088_v62  ;;  %v1330_v61 = vld [vmem:[%s7105_s2 + $0x1090] sm:$0xff]  ;;  %v1333_v62 = vld [vmem:[%s7105_s2 + $0x10a8] sm:$0xff]  ;;  %v4102_v17 = vpack.c.bf16 %v1231_v58, %v1228_v0  ;;  %v1300_v58 = vld [vmem:[%s7105_s2 + $0xfa0] sm:$0xff] }
 0x165   :  { %v4104_v9 = vpack.c.bf16 %v1333_v62, %v1330_v61  ;;  %v1109_v0 = vld [vmem:[%s7105_s2 + $0x9a8] sm:$0xff]  ;;  %v1116_v62 = vld [vmem:[%s7105_s2 + $0x9e0] sm:$0xff]  ;;  %v1118_v38 = vld [vmem:[%s7105_s2 + $0x9f0] sm:$0xff] }
 0x166   :  { %v1113_v61 = vld [vmem:[%s7105_s2 + $0x9c8] sm:$0xff]  ;;  %v1124_v42 = vld [vmem:[%s7105_s2 + $0xa20] sm:$0xff] }
 0x167   :  { %3723 = vmatpush1.bf16.msra.mxu1 %v3722_v10  ;;  %4091 = vmatpush3.bf16.msra.mxu0 %v4090_v12  ;;  %v1088_v10 = vld [vmem:[%s7105_s2 + $0x900] sm:$0xff]  ;;  %v1095_v12 = vld [vmem:[%s7105_s2 + $0x938] sm:$0xff] }
 0x168   :  { %3725 = vmatprep.subr.bf16.mxu1 %v3724_v14  ;;  %4093 = vmatprep.subr.bf16.mxu0 %v4092_v15  ;;  %v795_v14 = vmax.f32 %v6027_v5, 0.0  ;;  %v1336_v15 = vld [vmem:[%s7105_s2 + $0x10c0] sm:$0xff]  ;;  %v3738_v20 = vpack.c.bf16 %v1091_v22, %v1088_v10  ;;  %v3740_v27 = vpack.c.bf16 %v1098_v11, %v1095_v12  ;;  %v1115_v22 = vld [vmem:[%s7105_s2 + $0x9d8] sm:$0xff]  ;;  %v1309_v12 = vld [vmem:[%s7105_s2 + $0xfe8] sm:$0xff] }
 0x169   :  { %v1112_v10 = vld [vmem:[%s7105_s2 + $0x9c0] sm:$0xff]  ;;  %v1119_v11 = vld [vmem:[%s7105_s2 + $0x9f8] sm:$0xff] }
 0x16a   :  { %v1299_v5 = vld [vmem:[%s7105_s2 + $0xf98] sm:$0xff] }
 0x16b   :  { %3727 = vmatpush1.bf16.msra.mxu1 %v3726_v29  ;;  %4095 = vmatpush3.bf16.msra.mxu0 %v4094_v30  ;;  %v4108_v29 = vpack.c.bf16 %v1339_v16, %v1336_v15  ;;  %v1291_v30 = vld [vmem:[%s7105_s2 + $0xf58] sm:$0xff]  ;;  %v1122_v15 = vld [vmem:[%s7105_s2 + $0xa10] sm:$0xff]  ;;  %v1360_v16 = vld [vmem:[%s7105_s2 + $0x1180] sm:$0xff] }
 0x16c   :  { %3729 = vmatprep.subr.bf16.mxu1 %v3728_v33  ;;  %4097 = vmatprep.subr.bf16.mxu0 %v4096_v34  ;;  %v798_v33 = vmax.f32 %v6048_v13, 0.0  ;;  %v1342_v34 = vld [vmem:[%s7105_s2 + $0x10f0] sm:$0xff]  ;;  %v4110_v45 = vpack.c.bf16 %v1291_v30, %v1288_v46  ;;  %v3756_v40 = vpack.c.bf16 %v1122_v15, %v1119_v11  ;;  %v1121_v46 = vld [vmem:[%s7105_s2 + $0xa08] sm:$0xff] }
 0x16d   :  { %v4112_v50 = vpack.c.bf16 %v1345_v37, %v1342_v34  ;;  %v1128_v34 = vld [vmem:[%s7105_s2 + $0xa40] sm:$0xff]  ;;  %v1366_v37 = vld [vmem:[%s7105_s2 + $0x11b0] sm:$0xff] }
 0x16e   :  { %v1146_v11 = vld [vmem:[%s7105_s2 + $0xad0] sm:$0xff] }
 0x16f   :  { %3731 = vmatpush1.bf16.msra.mxu1 %v3730_v49  ;;  %4099 = vmatpush3.bf16.msra.mxu0 %v4098_v52  ;;  %v1348_v49 = vld [vmem:[%s7105_s2 + $0x1120] sm:$0xff]  ;;  %v1351_v52 = vld [vmem:[%s7105_s2 + $0x1138] sm:$0xff]  ;;  %v1302_v13 = vld [vmem:[%s7105_s2 + $0xfb0] sm:$0xff] }
 0x170   :  { %3733 = vmatprep.subr.bf16.mxu1 %v3732_v55  ;;  %4101 = vmatprep.subr.bf16.mxu0 %v4100_v57  ;;  %v3748_v55 = vpack.c.bf16 %v1110_v56, %v1107_v44  ;;  %v1106_v57 = vld [vmem:[%s7105_s2 + $0x990] sm:$0xff]  ;;  %v4116_v2 = vpack.c.bf16 %v1351_v52, %v1348_v49  ;;  %v1321_v44 = vld [vmem:[%s7105_s2 + $0x1048] sm:$0xff]  ;;  %v1131_v56 = vld [vmem:[%s7105_s2 + $0xa58] sm:$0xff] }
 0x171   :  { %v1134_v49 = vld [vmem:[%s7105_s2 + $0xa70] sm:$0xff]  ;;  %v1372_v52 = vld [vmem:[%s7105_s2 + $0x11e0] sm:$0xff] }
 0x173   :  { %3735 = vmatpush1.bf16.msra.mxu1 %v3734_v6  ;;  %4103 = vmatpush3.bf16.msra.mxu0 %v4102_v17  ;;  %v1357_v6 = vld [vmem:[%s7105_s2 + $0x1168] sm:$0xff]  ;;  %v3750_v17 = vpack.c.bf16 %v1109_v0, %v1106_v57  ;;  %v3764_v57 = vpack.c.bf16 %v1134_v49, %v1131_v56  ;;  %v1130_v0 = vld [vmem:[%s7105_s2 + $0xa50] sm:$0xff]  ;;  %v1396_v56 = vld [vmem:[%s7105_s2 + $0x12a0] sm:$0xff] }
 0x174   :  { %3737 = vmatprep.subr.bf16.mxu1 %v3736_v35  ;;  %4105 = vmatprep.subr.bf16.mxu0 %v4104_v9  ;;  %v4118_v35 = vpack.c.bf16 %v1303_v60, %v1300_v58  ;;  %v3752_v9 = vpack.c.bf16 %v1116_v62, %v1113_v61  ;;  %v4120_v8 = vpack.c.bf16 %v1357_v6, %v1354_v63  ;;  %v1133_v58 = vld [vmem:[%s7105_s2 + $0xa68] sm:$0xff]  ;;  %v1327_v62 = vld [vmem:[%s7105_s2 + $0x1078] sm:$0xff]  ;;  %v1140_v6 = vld [vmem:[%s7105_s2 + $0xaa0] sm:$0xff] }
 0x175   :  { %v225_v60 = vrot.slane %v5784_v28, %v5319_v48  ;;  %v1137_v63 = vld [vmem:[%s7105_s2 + $0xa88] sm:$0xff]  ;;  %v1399_v49 = vld [vmem:[%s7105_s2 + $0x12b8] sm:$0xff] }
 0x176   :  { %1628 = vmatmul.mubr.f32.vlgmr.msra.gmra.mrb[4].mxu1 %v791_v51  ;;  %2263 = vmatmul.mubr.f32.vlgmr.msra.gmra.mrb[18].mxu0 %v795_v14  ;;  %v3744_v51 = vpack.c.bf16 %v1104_v31, %v1101_v24  ;;  %v1315_v24 = vld [vmem:[%s7105_s2 + $0x1018] sm:$0xff]  ;;  %v1125_v31 = vld [vmem:[%s7105_s2 + $0xa28] sm:$0xff]  ;;  %v3768_v28 = vpack.c.bf16 %v1140_v6, %v1137_v63  ;;  %v1166_v6 = vld [vmem:[%s7105_s2 + $0xb70] sm:$0xff] }
 0x177   :  { %3739 = vmatpush1.bf16.msra.mxu1 %v3738_v20  ;;  %1698 = vmatprep.mubr.f32.mxu1 %v794_v1  ;;  %v1297_v1 = vld [vmem:[%s7105_s2 + $0xf88] sm:$0xff]  ;;  %v1363_v20 = vld [vmem:[%s7105_s2 + $0x1198] sm:$0xff]  ;;  %v3760_v26 = vpack.c.bf16 %v1128_v34, %v1125_v31  ;;  %v1148_v34 = vld [vmem:[%s7105_s2 + $0xae0] sm:$0xff] }
 0x178   :  { %4107 = vmatpush3.bf16.msra.mxu0 %v4106_v21  ;;  %3741 = vmatprep.subr.bf16.mxu1 %v3740_v27  ;;  %v4114_v54 = vpack.c.bf16 %v1297_v1, %v1294_v43  ;;  %v3754_v21 = vpack.c.bf16 %v1115_v22, %v1112_v10  ;;  %v4122_v27 = vpack.c.bf16 %v1309_v12, %v1306_v32  ;;  %v1127_v43 = vld [vmem:[%s7105_s2 + $0xa38] sm:$0xff]  ;;  %v1378_v22 = vld [vmem:[%s7105_s2 + $0x1210] sm:$0xff] }
 0x179   :  { %4109 = vmatprep.subr.bf16.mxu0 %v4108_v29  ;;  %2332 = vmatprep.mubr.f32.mxu0 %v798_v33  ;;  %v1312_v29 = vld [vmem:[%s7105_s2 + $0x1000] sm:$0xff]  ;;  %v4124_v30 = vpack.c.bf16 %v1363_v20, %v1360_v16  ;;  %v1139_v10 = vld [vmem:[%s7105_s2 + $0xa98] sm:$0xff]  ;;  %v6240_v32 = vadd.f32 %v5506_v39, %v225_v60  ;;  %v1142_v20 = vld [vmem:[%s7105_s2 + $0xab0] sm:$0xff] }
 0x17a   :  { %v1143_v12 = vld [vmem:[%s7105_s2 + $0xab8] sm:$0xff]  ;;  %v1170_v60 = vld [vmem:[%s7105_s2 + $0xb90] sm:$0xff] }
 0x17b   :  { %3743 = vmatpush1.bf16.msra.mxu1 %v3742_v41  ;;  %v1369_v41 = vld [vmem:[%s7105_s2 + $0x11c8] sm:$0xff]  ;;  %v3772_v39 = vpack.c.bf16 %v1146_v11, %v1143_v12  ;;  %v1179_v12 = vld [vmem:[%s7105_s2 + $0xbd8] sm:$0xff]  ;;  %v1182_v11 = vld [vmem:[%s7105_s2 + $0xbf0] sm:$0xff] }
 0x17c   :  { %4111 = vmatpush3.bf16.msra.mxu0 %v4110_v45  ;;  %3745 = vmatprep.subr.bf16.mxu1 %v3744_v51  ;;  %v3758_v45 = vpack.c.bf16 %v1121_v46, %v1118_v38  ;;  %v4126_v51 = vpack.c.bf16 %v1315_v24, %v1312_v29  ;;  %v4128_v1 = vpack.c.bf16 %v1369_v41, %v1366_v37  ;;  %v1387_v38 = vld [vmem:[%s7105_s2 + $0x1258] sm:$0xff]  ;;  %v1149_v46 = vld [vmem:[%s7105_s2 + $0xae8] sm:$0xff]  ;;  %v1152_v29 = vld [vmem:[%s7105_s2 + $0xb00] sm:$0xff] }
 0x17d   :  { %4113 = vmatprep.subr.bf16.mxu0 %v4112_v50  ;;  %v1318_v50 = vld [vmem:[%s7105_s2 + $0x1030] sm:$0xff]  ;;  %v3776_v31 = vpack.c.bf16 %v1152_v29, %v1149_v46  ;;  %v1151_v37 = vld [vmem:[%s7105_s2 + $0xaf8] sm:$0xff]  ;;  %v1184_v29 = vld [vmem:[%s7105_s2 + $0xc00] sm:$0xff] }
 0x17e   :  { %v1390_v41 = vld [vmem:[%s7105_s2 + $0x1270] sm:$0xff] }
 0x17f   :  { %3747 = vmatpush1.bf16.msra.mxu1 %v3746_v53  ;;  %v1375_v53 = vld [vmem:[%s7105_s2 + $0x11f8] sm:$0xff] }
 0x180   :  { %4115 = vmatpush3.bf16.msra.mxu0 %v4114_v54  ;;  %3749 = vmatprep.subr.bf16.mxu1 %v3748_v55  ;;  %v3762_v54 = vpack.c.bf16 %v1127_v43, %v1124_v42  ;;  %v4130_v55 = vpack.c.bf16 %v1321_v44, %v1318_v50  ;;  %v4132_v61 = vpack.c.bf16 %v1375_v53, %v1372_v52  ;;  %v1157_v44 = vld [vmem:[%s7105_s2 + $0xb28] sm:$0xff]  ;;  %v1164_v53 = vld [vmem:[%s7105_s2 + $0xb60] sm:$0xff] }
 0x181   :  { %4117 = vmatprep.subr.bf16.mxu0 %v4116_v2  ;;  %v1324_v2 = vld [vmem:[%s7105_s2 + $0x1060] sm:$0xff]  ;;  %v3778_v42 = vpack.c.bf16 %v1151_v37, %v1148_v34  ;;  %v1161_v52 = vld [vmem:[%s7105_s2 + $0xb48] sm:$0xff] }
 0x183   :  { %3751 = vmatpush1.bf16.msra.mxu1 %v3750_v17  ;;  %v3766_v17 = vpack.c.bf16 %v1133_v58, %v1130_v0  ;;  %v1160_v0 = vld [vmem:[%s7105_s2 + $0xb40] sm:$0xff]  ;;  %v1163_v58 = vld [vmem:[%s7105_s2 + $0xb58] sm:$0xff] }
 0x184   :  { %4119 = vmatpush3.bf16.msra.mxu0 %v4118_v35  ;;  %3753 = vmatprep.subr.bf16.mxu1 %v3752_v9  ;;  %v4134_v35 = vpack.c.bf16 %v1327_v62, %v1324_v2  ;;  %v1136_v9 = vld [vmem:[%s7105_s2 + $0xa80] sm:$0xff]  ;;  %v1167_v2 = vld [vmem:[%s7105_s2 + $0xb78] sm:$0xff]  ;;  %v3786_v62 = vpack.c.bf16 %v1163_v58, %v1160_v0  ;;  %v1218_v58 = vld [vmem:[%s7105_s2 + $0xd10] sm:$0xff] }
 0x185   :  { %4121 = vmatprep.subr.bf16.mxu0 %v4120_v8  ;;  %v1381_v8 = vld [vmem:[%s7105_s2 + $0x1228] sm:$0xff]  ;;  %v3770_v15 = vpack.c.bf16 %v1139_v10, %v1136_v9  ;;  %v3788_v63 = vpack.c.bf16 %v1170_v60, %v1167_v2  ;;  %v1215_v0 = vld [vmem:[%s7105_s2 + $0xcf8] sm:$0xff] }
 0x186   :  { %v4137_v16 = vpack.c.bf16 %v1381_v8, %v1378_v22  ;;  %v1172_v22 = vld [vmem:[%s7105_s2 + $0xba0] sm:$0xff]  ;;  %v1175_v8 = vld [vmem:[%s7105_s2 + $0xbb8] sm:$0xff]  ;;  %v3820_v60 = vpack.c.bf16 %v1218_v58, %v1215_v0 }
 0x187   :  { %3755 = vmatpush1.bf16.msra.mxu1 %v3754_v21  ;;  %v1145_v21 = vld [vmem:[%s7105_s2 + $0xac8] sm:$0xff]  ;;  %v1259_v0 = vld [vmem:[%s7105_s2 + $0xe58] sm:$0xff] }
 0x188   :  { %4123 = vmatpush3.bf16.msra.mxu0 %v4122_v27  ;;  %3757 = vmatprep.subr.bf16.mxu1 %v3756_v40  ;;  %v1384_v27 = vld [vmem:[%s7105_s2 + $0x1240] sm:$0xff]  ;;  %v797_v40 = vmax.f32 %v6240_v32, 0.0  ;;  %v1263_v58 = vld [vmem:[%s7105_s2 + $0xe78] sm:$0xff]  ;;  %v1398_v32 = vld [vmem:[%s7105_s2 + $0x12b0] sm:$0xff] }
 0x189   :  { %4125 = vmatprep.subr.bf16.mxu0 %v4124_v30  ;;  %v3774_v30 = vpack.c.bf16 %v1145_v21, %v1142_v20  ;;  %v4140_v24 = vpack.c.bf16 %v1387_v38, %v1384_v27  ;;  %v1181_v20 = vld [vmem:[%s7105_s2 + $0xbe8] sm:$0xff]  ;;  %v1188_v27 = vld [vmem:[%s7105_s2 + $0xc20] sm:$0xff] }
 0x18a   :  { %v1185_v21 = vld [vmem:[%s7105_s2 + $0xc08] sm:$0xff] }
 0x18b   :  { %3759 = vmatpush1.bf16.msra.mxu1 %v3758_v45  ;;  %v1393_v45 = vld [vmem:[%s7105_s2 + $0x1288] sm:$0xff]  ;;  %v3800_v46 = vpack.c.bf16 %v1188_v27, %v1185_v21 }
 0x18c   :  { %4127 = vmatpush3.bf16.msra.mxu0 %v4126_v51  ;;  %3761 = vmatprep.subr.bf16.mxu1 %v3760_v26  ;;  %v1155_v51 = vld [vmem:[%s7105_s2 + $0xb18] sm:$0xff]  ;;  %v1158_v26 = vld [vmem:[%s7105_s2 + $0xb30] sm:$0xff]  ;;  %v4143_v43 = vpack.c.bf16 %v1393_v45, %v1390_v41  ;;  %v1193_v45 = vld [vmem:[%s7105_s2 + $0xc48] sm:$0xff] }
 0x18d   :  { %4129 = vmatprep.subr.bf16.mxu0 %v4128_v1  ;;  %v3780_v50 = vpack.c.bf16 %v1158_v26, %v1155_v51  ;;  %v1154_v1 = vld [vmem:[%s7105_s2 + $0xb10] sm:$0xff]  ;;  %v1197_v51 = vld [vmem:[%s7105_s2 + $0xc68] sm:$0xff]  ;;  %v1200_v26 = vld [vmem:[%s7105_s2 + $0xc80] sm:$0xff] }
 0x18e   :  { %v1190_v41 = vld [vmem:[%s7105_s2 + $0xc30] sm:$0xff]  ;;  %v1229_v21 = vld [vmem:[%s7105_s2 + $0xd68] sm:$0xff] }
 0x18f   :  { %3763 = vmatpush1.bf16.msra.mxu1 %v3762_v54  ;;  %v3782_v54 = vpack.c.bf16 %v1157_v44, %v1154_v1  ;;  %v1199_v1 = vld [vmem:[%s7105_s2 + $0xc78] sm:$0xff]  ;;  %v1202_v44 = vld [vmem:[%s7105_s2 + $0xc90] sm:$0xff]  ;;  %v1233_v27 = vld [vmem:[%s7105_s2 + $0xd88] sm:$0xff] }
 0x190   :  { %4131 = vmatpush3.bf16.msra.mxu0 %v4130_v55  ;;  %3765 = vmatprep.subr.bf16.mxu1 %v3764_v57  ;;  %v4146_v55 = vpack.c.bf16 %v1399_v49, %v1396_v56  ;;  %v3784_v57 = vpack.c.bf16 %v1164_v53, %v1161_v52  ;;  %v1205_v56 = vld [vmem:[%s7105_s2 + $0xca8] sm:$0xff]  ;;  %v1212_v52 = vld [vmem:[%s7105_s2 + $0xce0] sm:$0xff] }
 0x191   :  { %4133 = vmatprep.subr.bf16.mxu0 %v4132_v61  ;;  %v799_v61 = vmax.f32 %v5833_v59, 0.0  ;;  %v1209_v49 = vld [vmem:[%s7105_s2 + $0xcc8] sm:$0xff]  ;;  %v3814_v53 = vpack.c.bf16 %v1205_v56, %v1202_v44  ;;  %v1250_v56 = vld [vmem:[%s7105_s2 + $0xe10] sm:$0xff]  ;;  %v2454_v59 = vld [vmem:[%s7106_s3 + $0x158] sm:$0xff] }
 0x193   :  { %3767 = vmatpush1.bf16.msra.mxu1 %v3766_v17  ;;  %v1169_v17 = vld [vmem:[%s7105_s2 + $0xb88] sm:$0xff] }
 0x194   :  { %4135 = vmatpush3.bf16.msra.mxu0 %v4134_v35  ;;  %3769 = vmatprep.subr.bf16.mxu1 %v3768_v28  ;;  %v1173_v35 = vld [vmem:[%s7105_s2 + $0xba8] sm:$0xff]  ;;  %v1176_v28 = vld [vmem:[%s7105_s2 + $0xbc0] sm:$0xff]  ;;  %v3790_v9 = vpack.c.bf16 %v1169_v17, %v1166_v6 }
 0x195   :  { %4136 = vmatprep.subr.bf16.mxu0 %v4289_v19  ;;  %v3792_v10 = vpack.c.bf16 %v1176_v28, %v1173_v35  ;;  %v1221_v6 = vld [vmem:[%s7105_s2 + $0xd28] sm:$0xff]  ;;  %v1224_v17 = vld [vmem:[%s7105_s2 + $0xd40] sm:$0xff] }
 0x196   :  { %v3824_v28 = vpack.c.bf16 %v1224_v17, %v1221_v6  ;;  %v1262_v6 = vld [vmem:[%s7105_s2 + $0xe70] sm:$0xff]  ;;  %v1265_v17 = vld [vmem:[%s7105_s2 + $0xe88] sm:$0xff] }
 0x197   :  { %2333 = vmatmul.mubr.f32.vlgmr.msra.gmra.mrb[20].mxu0 %v797_v40  ;;  %3771 = vmatpush1.bf16.msra.mxu1 %v3770_v15  ;;  %v3794_v15 = vpack.c.bf16 %v1175_v8, %v1172_v22  ;;  %v1227_v8 = vld [vmem:[%s7105_s2 + $0xd58] sm:$0xff] }
 0x198   :  { %4138 = vmatpush3.bf16.msra.mxu0 %v4137_v16  ;;  %3773 = vmatprep.subr.bf16.mxu1 %v3772_v39  ;;  %v3796_v16 = vpack.c.bf16 %v1182_v11, %v1179_v12  ;;  %v1178_v39 = vld [vmem:[%s7105_s2 + $0xbd0] sm:$0xff] }
 0x199   :  { %4139 = vmatprep.subr.bf16.mxu0 %v4289_v19  ;;  %3272 = vmatprep.mubr.msk.f32.mxu0 %vm4290_vm4, %v4287_v7  ;;  %v3798_v38 = vpack.c.bf16 %v1181_v20, %v1178_v39  ;;  %v1230_v12 = vld [vmem:[%s7105_s2 + $0xd70] sm:$0xff] }
 0x19a   :  { %v3828_v39 = vpack.c.bf16 %v1230_v12, %v1227_v8  ;;  %v1226_v20 = vld [vmem:[%s7105_s2 + $0xd50] sm:$0xff]  ;;  %v1268_v8 = vld [vmem:[%s7105_s2 + $0xea0] sm:$0xff]  ;;  %v1271_v12 = vld [vmem:[%s7105_s2 + $0xeb8] sm:$0xff] }
 0x19b   :  { %3775 = vmatpush1.bf16.msra.mxu1 %v3774_v30  ;;  %v1187_v30 = vld [vmem:[%s7105_s2 + $0xc18] sm:$0xff] }
 0x19c   :  { %4141 = vmatpush3.bf16.msra.mxu0 %v4140_v24  ;;  %3777 = vmatprep.subr.bf16.mxu1 %v3776_v31  ;;  %v1191_v24 = vld [vmem:[%s7105_s2 + $0xc38] sm:$0xff]  ;;  %v1194_v31 = vld [vmem:[%s7105_s2 + $0xc50] sm:$0xff]  ;;  %v3802_v34 = vpack.c.bf16 %v1187_v30, %v1184_v29  ;;  %v1232_v30 = vld [vmem:[%s7105_s2 + $0xd80] sm:$0xff] }
 0x19d   :  { %4142 = vmatprep.subr.bf16.mxu0 %v4289_v19  ;;  %v3804_v37 = vpack.c.bf16 %v1194_v31, %v1191_v24  ;;  %v1235_v24 = vld [vmem:[%s7105_s2 + $0xd98] sm:$0xff] }
 0x19e   :  { %v1239_v31 = vld [vmem:[%s7105_s2 + $0xdb8] sm:$0xff] }
 0x19f   :  { %3779 = vmatpush1.bf16.msra.mxu1 %v3778_v42  ;;  %v3806_v42 = vpack.c.bf16 %v1193_v45, %v1190_v41  ;;  %v1238_v45 = vld [vmem:[%s7105_s2 + $0xdb0] sm:$0xff] }
 0x1a0   :  { %4144 = vmatpush3.bf16.msra.mxu0 %v4143_v43  ;;  %3781 = vmatprep.subr.bf16.mxu1 %v3780_v50  ;;  %v3808_v43 = vpack.c.bf16 %v1200_v26, %v1197_v51  ;;  %v1196_v50 = vld [vmem:[%s7105_s2 + $0xc60] sm:$0xff]  ;;  %v1241_v51 = vld [vmem:[%s7105_s2 + $0xdc8] sm:$0xff] }
 0x1a1   :  { %4145 = vmatprep.subr.bf16.mxu0 %v4289_v19  ;;  %v3810_v3 = vpack.c.bf16 %v1199_v1, %v1196_v50  ;;  %v1245_v26 = vld [vmem:[%s7105_s2 + $0xde8] sm:$0xff]  ;;  %v1244_v1 = vld [vmem:[%s7105_s2 + $0xde0] sm:$0xff] }
 0x1a3   :  { %3783 = vmatpush1.bf16.msra.mxu1 %v3782_v54  ;;  %v3816_v54 = vpack.c.bf16 %v1212_v52, %v1209_v49  ;;  %v1253_v49 = vld [vmem:[%s7105_s2 + $0xe28] sm:$0xff] }
 0x1a4   :  { %4147 = vmatpush3.bf16.msra.mxu0 %v4146_v55  ;;  %3785 = vmatprep.subr.bf16.mxu1 %v3784_v57  ;;  %v1208_v55 = vld [vmem:[%s7105_s2 + $0xcc0] sm:$0xff]  ;;  %v1211_v57 = vld [vmem:[%s7105_s2 + $0xcd8] sm:$0xff]  ;;  %v1257_v52 = vld [vmem:[%s7105_s2 + $0xe48] sm:$0xff] }
 0x1a5   :  { %v3818_v2 = vpack.c.bf16 %v1211_v57, %v1208_v55  ;;  %v1256_v57 = vld [vmem:[%s7105_s2 + $0xe40] sm:$0xff] }
 0x1a7   :  { %3273 = vmatmul.mubr.msk.f32.vlgmr.msra.gmra.mrb[22].mxu0 %vm1417_vm5, %v799_v61  ;;  %3787 = vmatpush1.bf16.msra.mxu1 %v3786_v62  ;;  %v1214_v62 = vld [vmem:[%s7105_s2 + $0xcf0] sm:$0xff] }
 0x1a8   :  { %3789 = vmatprep.subr.bf16.mxu1 %v3788_v63  ;;  %v1217_v63 = vld [vmem:[%s7105_s2 + $0xd08] sm:$0xff] }
 0x1a9   :  { %v3822_v35 = vpack.c.bf16 %v1217_v63, %v1214_v62  ;;  %v6531_v62 = vld [vmem:[%s7107_s4 + $0xd] sm:$0x7] }
 0x1ab   :  { %3791 = vmatpush1.bf16.msra.mxu1 %v3790_v9  ;;  %v1220_v9 = vld [vmem:[%s7105_s2 + $0xd20] sm:$0xff] }
 0x1ac   :  { %3793 = vmatprep.subr.bf16.mxu1 %v3792_v10  ;;  %v1223_v10 = vld [vmem:[%s7105_s2 + $0xd38] sm:$0xff] }
 0x1af   :  { %3795 = vmatpush1.bf16.msra.mxu1 %v3794_v15 }
 0x1b0   :  { %3797 = vmatprep.subr.bf16.mxu1 %v3796_v16  ;;  %v3826_v16 = vpack.c.bf16 %v1223_v10, %v1220_v9  ;;  %v1413_v9 = vrot.slane %v6531_v62, %v5319_v48  ;;  %v3854_v10 = vpack.c.bf16 %v1265_v17, %v1262_v6  ;;  %v1278_v48 = vld [vmem:[%s7105_s2 + $0xef0] sm:$0xff] }
 0x1b3   :  { %3799 = vmatpush1.bf16.msra.mxu1 %v3798_v38  ;;  %v1236_v38 = vld [vmem:[%s7105_s2 + $0xda0] sm:$0xff] }
 0x1b4   :  { %3801 = vmatprep.subr.bf16.mxu1 %v3800_v46  ;;  %v3830_v46 = vpack.c.bf16 %v1229_v21, %v1226_v20  ;;  %v3832_v29 = vpack.c.bf16 %v1236_v38, %v1233_v27  ;;  %v3858_v27 = vpack.c.bf16 %v1271_v12, %v1268_v8  ;;  %v1307_v8 = vld [vmem:[%s7105_s2 + $0xfd8] sm:$0xff]  ;;  %v2444_v12 = vld [vmem:[%s7106_s3 + $0x108] sm:$0xff] }
 0x1b6   :  { %1699 = vmatmul.mubr.f32.vlgmr.msra.gmra.mrb[4].mxu1 %v793_v4  ;;  %v1206_v4 = vld [vmem:[%s7105_s2 + $0xcb0] sm:$0xff] }
 0x1b7   :  { %3803 = vmatpush1.bf16.msra.mxu1 %v3802_v34  ;;  %1769 = vmatprep.mubr.f32.mxu1 %v796_v18  ;;  %v3812_v18 = vpack.c.bf16 %v1206_v4, %v1203_v47  ;;  %v1242_v34 = vld [vmem:[%s7105_s2 + $0xdd0] sm:$0xff]  ;;  %v1247_v47 = vld [vmem:[%s7105_s2 + $0xdf8] sm:$0xff] }
 0x1b8   :  { %3805 = vmatprep.subr.bf16.mxu1 %v3804_v37  ;;  %v3834_v37 = vpack.c.bf16 %v1235_v24, %v1232_v30  ;;  %v3836_v41 = vpack.c.bf16 %v1242_v34, %v1239_v31  ;;  %v1251_v4 = vld [vmem:[%s7105_s2 + $0xe18] sm:$0xff]  ;;  %v1281_v24 = vld [vmem:[%s7105_s2 + $0xf08] sm:$0xff] }
 0x1bb   :  { %3807 = vmatpush1.bf16.msra.mxu1 %v3806_v42  ;;  %v1248_v42 = vld [vmem:[%s7105_s2 + $0xe00] sm:$0xff] }
 0x1bc   :  { %3809 = vmatprep.subr.bf16.mxu1 %v3808_v43  ;;  %v3838_v43 = vpack.c.bf16 %v1241_v51, %v1238_v45  ;;  %v3840_v50 = vpack.c.bf16 %v1248_v42, %v1245_v26  ;;  %v1287_v45 = vld [vmem:[%s7105_s2 + $0xf38] sm:$0xff]  ;;  %v1290_v51 = vld [vmem:[%s7105_s2 + $0xf50] sm:$0xff] }
 0x1bd   :  { %v3868_v42 = vpack.c.bf16 %v1290_v51, %v1287_v45  ;;  %v2429_v45 = vld [vmem:[%s7106_s3 + $0x90] sm:$0xff]  ;;  %v2430_v51 = vld [vmem:[%s7106_s3 + $0x98] sm:$0xff] }
 0x1bf   :  { %3811 = vmatpush1.bf16.msra.mxu1 %v3810_v3  ;;  %v1254_v3 = vld [vmem:[%s7105_s2 + $0xe30] sm:$0xff] }
 0x1c0   :  { %3813 = vmatprep.subr.bf16.mxu1 %v3812_v18  ;;  %v3842_v18 = vpack.c.bf16 %v1247_v47, %v1244_v1  ;;  %v3844_v44 = vpack.c.bf16 %v1254_v3, %v1251_v4  ;;  %v1293_v1 = vld [vmem:[%s7105_s2 + $0xf68] sm:$0xff]  ;;  %v1296_v47 = vld [vmem:[%s7105_s2 + $0xf80] sm:$0xff] }
 0x1c1   :  { %v3872_v3 = vpack.c.bf16 %v1296_v47, %v1293_v1  ;;  %v1316_v1 = vld [vmem:[%s7105_s2 + $0x1020] sm:$0xff]  ;;  %v1319_v47 = vld [vmem:[%s7105_s2 + $0x1038] sm:$0xff] }
 0x1c3   :  { %3815 = vmatpush1.bf16.msra.mxu1 %v3814_v53  ;;  %v1260_v53 = vld [vmem:[%s7105_s2 + $0xe60] sm:$0xff] }
 0x1c4   :  { %3817 = vmatprep.subr.bf16.mxu1 %v3816_v54  ;;  %v3846_v54 = vpack.c.bf16 %v1253_v49, %v1250_v56  ;;  %v3848_v55 = vpack.c.bf16 %v1260_v53, %v1257_v52  ;;  %v3876_v56 = vpack.c.bf16 %v1302_v13, %v1299_v5  ;;  %v1301_v49 = vld [vmem:[%s7105_s2 + $0xfa8] sm:$0xff]  ;;  %v1308_v53 = vld [vmem:[%s7105_s2 + $0xfe0] sm:$0xff] }
 0x1c5   :  { %v1305_v52 = vld [vmem:[%s7105_s2 + $0xfc8] sm:$0xff] }
 0x1c7   :  { %3819 = vmatpush1.bf16.msra.mxu1 %v3818_v2  ;;  %v1266_v2 = vld [vmem:[%s7105_s2 + $0xe90] sm:$0xff] }
 0x1c8   :  { %3821 = vmatprep.subr.bf16.mxu1 %v3820_v60  ;;  %v3850_v60 = vpack.c.bf16 %v1259_v0, %v1256_v57  ;;  %v3852_v63 = vpack.c.bf16 %v1266_v2, %v1263_v58  ;;  %v2423_v57 = vld [vmem:[%s7106_s3 + $0x60] sm:$0xff]  ;;  %v2424_v58 = vld [vmem:[%s7106_s3 + $0x68] sm:$0xff]  ;;  %v2441_v2 = vld [vmem:[%s7106_s3 + $0xf0] sm:$0xff] }
 0x1c9   :  { %v2962_v22 = vpop.f32.mrb[10].mxu0  ;;  %v4150_v6 = vpack.c.bf16 %v2424_v58, %v2423_v57  ;;  %v1325_v57 = vld [vmem:[%s7105_s2 + $0x1068] sm:$0xff] }
 0x1ca   :  { %v2963_v11 = vpop.f32.mrb[11].mxu0  ;;  %v1329_v58 = vld [vmem:[%s7105_s2 + $0x1088] sm:$0xff] }
 0x1cb   :  { %3823 = vmatpush1.bf16.msra.mxu1 %v3822_v35  ;;  %v6454_v15 = vadd.f32 %v2963_v11, %v2962_v22  ;;  %v1269_v35 = vld [vmem:[%s7105_s2 + $0xea8] sm:$0xff] }
 0x1cc   :  { %3825 = vmatprep.subr.bf16.mxu1 %v3824_v28  ;;  %v1272_v28 = vld [vmem:[%s7105_s2 + $0xec0] sm:$0xff] }
 0x1cd   :  { %v3856_v22 = vpack.c.bf16 %v1272_v28, %v1269_v35  ;;  %v1985_v20 = vadd.f32 %v6454_v15, %v1413_v9  ;;  %v1284_v15 = vld [vmem:[%s7105_s2 + $0xf20] sm:$0xff]  ;;  %v2425_v35 = vld [vmem:[%s7106_s3 + $0x70] sm:$0xff]  ;;  %v2426_v28 = vld [vmem:[%s7106_s3 + $0x78] sm:$0xff] }
 0x1ce   :  { %v3864_v34 = vpack.c.bf16 %v1284_v15, %v1281_v24  ;;  %v2443_v9 = vld [vmem:[%s7106_s3 + $0x100] sm:$0xff]  ;;  %v1310_v24 = vld [vmem:[%s7105_s2 + $0xff0] sm:$0xff]  ;;  %v1313_v15 = vld [vmem:[%s7105_s2 + $0x1008] sm:$0xff] }
 0x1cf   :  { %3827 = vmatpush1.bf16.msra.mxu1 %v3826_v16  ;;  %v1275_v16 = vld [vmem:[%s7105_s2 + $0xed8] sm:$0xff] }
 0x1d0   :  { %3829 = vmatprep.subr.bf16.mxu1 %v3828_v39  ;;  %v3860_v38 = vpack.c.bf16 %v1278_v48, %v1275_v16  ;;  %v1314_v16 = vld [vmem:[%s7105_s2 + $0x1010] sm:$0xff]  ;;  %v4154_v48 = vpack.c.bf16 %v2426_v28, %v2425_v35  ;;  %v2451_v35 = vld [vmem:[%s7106_s3 + $0x140] sm:$0xff]  ;;  %v2452_v28 = vld [vmem:[%s7106_s3 + $0x148] sm:$0xff] }
 0x1d3   :  { %3831 = vmatpush1.bf16.msra.mxu1 %v3830_v46  ;;  %v1274_v46 = vld [vmem:[%s7105_s2 + $0xed0] sm:$0xff] }
 0x1d4   :  { %3833 = vmatprep.subr.bf16.mxu1 %v3832_v29  ;;  %v1277_v29 = vld [vmem:[%s7105_s2 + $0xee8] sm:$0xff] }
 0x1d5   :  { %v3862_v31 = vpack.c.bf16 %v1277_v29, %v1274_v46  ;;  %v2446_v46 = vld [vmem:[%s7106_s3 + $0x118] sm:$0xff] }
 0x1d7   :  { %3835 = vmatpush1.bf16.msra.mxu1 %v3834_v37  ;;  %v1280_v37 = vld [vmem:[%s7105_s2 + $0xf00] sm:$0xff] }
 0x1d8   :  { %3837 = vmatprep.subr.bf16.mxu1 %v3836_v41  ;;  %v1283_v41 = vld [vmem:[%s7105_s2 + $0xf18] sm:$0xff] }
 0x1d9   :  { %v3866_v26 = vpack.c.bf16 %v1283_v41, %v1280_v37 }
 0x1db   :  { %3839 = vmatpush1.bf16.msra.mxu1 %v3838_v43  ;;  %v1286_v43 = vld [vmem:[%s7105_s2 + $0xf30] sm:$0xff] }
 0x1dc   :  { %3841 = vmatprep.subr.bf16.mxu1 %v3840_v50  ;;  %v1289_v50 = vld [vmem:[%s7105_s2 + $0xf48] sm:$0xff] }
 0x1dd   :  { %v3870_v4 = vpack.c.bf16 %v1289_v50, %v1286_v43  ;;  %v2448_v43 = vld [vmem:[%s7106_s3 + $0x128] sm:$0xff] }
 0x1df   :  { %3843 = vmatpush1.bf16.msra.mxu1 %v3842_v18  ;;  %v1292_v18 = vld [vmem:[%s7105_s2 + $0xf60] sm:$0xff] }
 0x1e0   :  { %3845 = vmatprep.subr.bf16.mxu1 %v3844_v44  ;;  %v1295_v44 = vld [vmem:[%s7105_s2 + $0xf78] sm:$0xff] }
 0x1e3   :  { %3847 = vmatpush1.bf16.msra.mxu1 %v3846_v54  ;;  %v2439_v54 = vld [vmem:[%s7106_s3 + $0xe0] sm:$0xff] }
 0x1e4   :  { %3849 = vmatprep.subr.bf16.mxu1 %v3848_v55  ;;  %v2440_v55 = vld [vmem:[%s7106_s3 + $0xe8] sm:$0xff] }
 0x1e5   :  { %v4148_v0 = vpack.c.bf16 %v2440_v55, %v2439_v54  ;;  %v1322_v55 = vld [vmem:[%s7105_s2 + $0x1050] sm:$0xff] }
 0x1e7   :  { %3851 = vmatpush1.bf16.msra.mxu1 %v3850_v60  ;;  %v2442_v60 = vld [vmem:[%s7106_s3 + $0xf8] sm:$0xff]  ;;  %4149 = vmatprep.subr.bf16.mxu0 %v4148_v0 }
 0x1e8   :  { %3853 = vmatprep.subr.bf16.mxu1 %v3852_v63  ;;  %v4152_v17 = vpack.c.bf16 %v2442_v60, %v2441_v2  ;;  %4151 = vmatpush3.bf16.msra.mxu0 %v4150_v6  ;;  %v1332_v2 = vld [vmem:[%s7105_s2 + $0x10a0] sm:$0xff]  ;;  %v2433_v6 = vld [vmem:[%s7106_s3 + $0xb0] sm:$0xff] }
 0x1e9   :  { %v2997_v11 = vpop.f32.mrb[12].mxu0 }
 0x1ea   :  { %v2998_v39 = vpop.f32.mrb[13].mxu0  ;;  %4153 = vmatprep.subr.bf16.mxu0 %v4152_v17  ;;  %v3894_v17 = vpack.c.bf16 %v1325_v57, %v1322_v55  ;;  %v1364_v55 = vld [vmem:[%s7105_s2 + $0x11a0] sm:$0xff]  ;;  %v1367_v57 = vld [vmem:[%s7105_s2 + $0x11b8] sm:$0xff] }
 0x1eb   :  { %v2999_v21 = vadd.f32 %v2998_v39, %v2997_v11  ;;  %3855 = vmatpush1.bf16.msra.mxu1 %v3854_v10  ;;  %v3880_v10 = vpack.c.bf16 %v1308_v53, %v1305_v52  ;;  %v1311_v11 = vld [vmem:[%s7105_s2 + $0xff8] sm:$0xff]  ;;  %v4156_v39 = vpack.c.bf16 %v2444_v12, %v2443_v9  ;;  %v2449_v52 = vld [vmem:[%s7106_s3 + $0x130] sm:$0xff]  ;;  %v3896_v9 = vpack.c.bf16 %v1332_v2, %v1329_v58 }
 0x1ec   :  { %3857 = vmatprep.subr.bf16.mxu1 %v3856_v22  ;;  %v1304_v22 = vld [vmem:[%s7105_s2 + $0xfc0] sm:$0xff]  ;;  %v3884_v29 = vpack.c.bf16 %v1314_v16, %v1311_v11  ;;  %4155 = vmatpush3.bf16.msra.mxu0 %v4154_v48  ;;  %v2450_v53 = vld [vmem:[%s7106_s3 + $0x138] sm:$0xff]  ;;  %v1338_v12 = vld [vmem:[%s7105_s2 + $0x10d0] sm:$0xff]  ;;  %v4172_v16 = vpack.c.bf16 %v2452_v28, %v2451_v35 }
 0x1ed   :  { %v6566_v30 = vadd.f32 %v2999_v21, %v1985_v20  ;;  %v2427_v20 = vld [vmem:[%s7106_s3 + $0x80] sm:$0xff]  ;;  %v2428_v21 = vld [vmem:[%s7106_s3 + $0x88] sm:$0xff]  ;;  %4157 = vmatprep.subr.bf16.mxu0 %v4156_v39  ;;  %v1371_v2 = vld [vmem:[%s7105_s2 + $0x11d8] sm:$0xff] }
 0x1ee   :  { %v4158_v37 = vpack.c.bf16 %v2428_v21, %v2427_v20  ;;  %v2435_v48 = vld [vmem:[%s7106_s3 + $0xc0] sm:$0xff]  ;;  %v2436_v39 = vld [vmem:[%s7106_s3 + $0xc8] sm:$0xff]  ;;  %v1370_v35 = vld [vmem:[%s7105_s2 + $0x11d0] sm:$0xff] }
 0x1ef   :  { %3859 = vmatpush1.bf16.msra.mxu1 %v3858_v27  ;;  %v3882_v27 = vpack.c.bf16 %v1307_v8, %v1304_v22  ;;  %v1331_v22 = vld [vmem:[%s7105_s2 + $0x1098] sm:$0xff]  ;;  %v1373_v28 = vld [vmem:[%s7105_s2 + $0x11e8] sm:$0xff] }
 0x1f0   :  { %3861 = vmatprep.subr.bf16.mxu1 %v3860_v38  ;;  %v2445_v38 = vld [vmem:[%s7106_s3 + $0x110] sm:$0xff]  ;;  %4159 = vmatpush3.bf16.msra.mxu0 %v4158_v37  ;;  %v1335_v8 = vld [vmem:[%s7105_s2 + $0x10b8] sm:$0xff] }
 0x1f1   :  { %v4160_v41 = vpack.c.bf16 %v2446_v46, %v2445_v38  ;;  %v3900_v21 = vpack.c.bf16 %v1338_v12, %v1335_v8  ;;  %v1337_v38 = vld [vmem:[%s7105_s2 + $0x10c8] sm:$0xff]  ;;  %v1343_v37 = vld [vmem:[%s7105_s2 + $0x10f8] sm:$0xff]  ;;  %v3926_v8 = vpack.c.bf16 %v1373_v28, %v1370_v35  ;;  %v2461_v28 = vld [vmem:[%s7106_s3 + $0x190] sm:$0xff] }
 0x1f2   :  { %v1341_v46 = vld [vmem:[%s7105_s2 + $0x10e8] sm:$0xff] }
 0x1f3   :  { %3863 = vmatpush1.bf16.msra.mxu1 %v3862_v31  ;;  %v1317_v31 = vld [vmem:[%s7105_s2 + $0x1028] sm:$0xff]  ;;  %4161 = vmatprep.subr.bf16.mxu0 %v4160_v41  ;;  %v1347_v41 = vld [vmem:[%s7105_s2 + $0x1118] sm:$0xff] }
 0x1f4   :  { %3865 = vmatprep.subr.bf16.mxu1 %v3864_v34  ;;  %v1320_v34 = vld [vmem:[%s7105_s2 + $0x1040] sm:$0xff] }
 0x1f5   :  { %v3888_v50 = vpack.c.bf16 %v1320_v34, %v1317_v31  ;;  %v1340_v34 = vld [vmem:[%s7105_s2 + $0x10e0] sm:$0xff] }
 0x1f6   :  { %1770 = vmatmul.mubr.f32.vlgmr.msra.gmra.mrb[4].mxu1 %v795_v14  ;;  %v3874_v14 = vpack.c.bf16 %v1295_v44, %v1292_v18  ;;  %v1326_v18 = vld [vmem:[%s7105_s2 + $0x1070] sm:$0xff]  ;;  %v4162_v44 = vpack.c.bf16 %v2430_v51, %v2429_v45  ;;  %v3906_v51 = vpack.c.bf16 %v1343_v37, %v1340_v34  ;;  %v1395_v34 = vld [vmem:[%s7105_s2 + $0x1298] sm:$0xff] }
 0x1f7   :  { %3867 = vmatpush1.bf16.msra.mxu1 %v3866_v26  ;;  %1840 = vmatprep.mubr.f32.mxu1 %v798_v33  ;;  %v1298_v33 = vld [vmem:[%s7105_s2 + $0xf90] sm:$0xff]  ;;  %v3886_v26 = vpack.c.bf16 %v1313_v15, %v1310_v24  ;;  %v4174_v24 = vpack.c.bf16 %v2436_v39, %v2435_v48  ;;  %v3940_v37 = vpack.c.bf16 %v1398_v32, %v1395_v34  ;;  %v2418_v32 = vld [vmem:[%s7106_s3 + $0x38] sm:$0xff] }
 0x1f8   :  { %3869 = vmatprep.subr.bf16.mxu1 %v3868_v42  ;;  %v3878_v63 = vpack.c.bf16 %v1301_v49, %v1298_v33  ;;  %v2447_v42 = vld [vmem:[%s7106_s3 + $0x120] sm:$0xff]  ;;  %v2432_v33 = vld [vmem:[%s7106_s3 + $0xa8] sm:$0xff]  ;;  %v3890_v49 = vpack.c.bf16 %v1319_v47, %v1316_v1  ;;  %4163 = vmatpush3.bf16.msra.mxu0 %v4162_v44  ;;  %v1350_v45 = vld [vmem:[%s7105_s2 + $0x1130] sm:$0xff] }
 0x1f9   :  { %v4164_v13 = vpack.c.bf16 %v2448_v43, %v2447_v42  ;;  %v1346_v42 = vld [vmem:[%s7105_s2 + $0x1110] sm:$0xff]  ;;  %v1349_v43 = vld [vmem:[%s7105_s2 + $0x1128] sm:$0xff]  ;;  %v1356_v1 = vld [vmem:[%s7105_s2 + $0x1160] sm:$0xff] }
 0x1fa   :  { %v3910_v47 = vpack.c.bf16 %v1349_v43, %v1346_v42  ;;  %v1359_v44 = vld [vmem:[%s7105_s2 + $0x1178] sm:$0xff]  ;;  %v1386_v48 = vld [vmem:[%s7105_s2 + $0x1250] sm:$0xff] }
 0x1fb   :  { %3871 = vmatpush1.bf16.msra.mxu1 %v3870_v4  ;;  %4165 = vmatprep.subr.bf16.mxu0 %v4164_v13  ;;  %v2417_v34 = vld [vmem:[%s7106_s3 + $0x30] sm:$0xff] }
 0x1fc   :  { %3873 = vmatprep.subr.bf16.mxu1 %v3872_v3  ;;  %v1323_v3 = vld [vmem:[%s7105_s2 + $0x1058] sm:$0xff] }
 0x1fd   :  { %v3892_v54 = vpack.c.bf16 %v1326_v18, %v1323_v3  ;;  %v1352_v3 = vld [vmem:[%s7105_s2 + $0x1140] sm:$0xff]  ;;  %v1355_v18 = vld [vmem:[%s7105_s2 + $0x1158] sm:$0xff] }
 0x1fe   :  { %v3914_v13 = vpack.c.bf16 %v1355_v18, %v1352_v3 }
 0x1ff   :  { %3875 = vmatpush1.bf16.msra.mxu1 %v3874_v14  ;;  %v2431_v14 = vld [vmem:[%s7106_s3 + $0xa0] sm:$0xff] }
 0x200   :  { %3877 = vmatprep.subr.bf16.mxu1 %v3876_v56  ;;  %v4166_v60 = vpack.c.bf16 %v2432_v33, %v2431_v14  ;;  %v1358_v33 = vld [vmem:[%s7105_s2 + $0x1170] sm:$0xff] }
 0x202   :  { %4167 = vmatpush3.bf16.msra.mxu0 %v4166_v60  ;;  %v1374_v60 = vld [vmem:[%s7105_s2 + $0x11f0] sm:$0xff] }
 0x203   :  { %3879 = vmatpush1.bf16.msra.mxu1 %v3878_v63  ;;  %v4168_v63 = vpack.c.bf16 %v2450_v53, %v2449_v52  ;;  %v1368_v52 = vld [vmem:[%s7105_s2 + $0x11c0] sm:$0xff] }
 0x204   :  { %3881 = vmatprep.subr.bf16.mxu1 %v3880_v10  ;;  %v1328_v10 = vld [vmem:[%s7105_s2 + $0x1080] sm:$0xff] }
 0x205   :  { %4169 = vmatprep.subr.bf16.mxu0 %v4168_v63  ;;  %v3898_v20 = vpack.c.bf16 %v1331_v22, %v1328_v10  ;;  %v1377_v10 = vld [vmem:[%s7105_s2 + $0x1208] sm:$0xff]  ;;  %v1380_v22 = vld [vmem:[%s7105_s2 + $0x1220] sm:$0xff] }
 0x206   :  { %v3928_v12 = vpack.c.bf16 %v1380_v22, %v1377_v10  ;;  %v2463_v22 = vld [vmem:[%s7106_s3 + $0x1a0] sm:$0xff] }
 0x207   :  { %3883 = vmatpush1.bf16.msra.mxu1 %v3882_v27  ;;  %v1334_v27 = vld [vmem:[%s7105_s2 + $0x10b0] sm:$0xff] }
 0x208   :  { %3885 = vmatprep.subr.bf16.mxu1 %v3884_v29  ;;  %v1344_v29 = vld [vmem:[%s7105_s2 + $0x1100] sm:$0xff]  ;;  %v3902_v15 = vpack.c.bf16 %v1337_v38, %v1334_v27  ;;  %v1385_v27 = vld [vmem:[%s7105_s2 + $0x1248] sm:$0xff] }
 0x209   :  { %v3032_v4 = vpop.f32.mrb[14].mxu0  ;;  %v3904_v31 = vpack.c.bf16 %v1344_v29, %v1341_v46  ;;  %v1389_v38 = vld [vmem:[%s7105_s2 + $0x1268] sm:$0xff]  ;;  %v1392_v46 = vld [vmem:[%s7105_s2 + $0x1280] sm:$0xff] }
 0x20a   :  { %v3033_v5 = vpop.f32.mrb[15].mxu0 }
 0x20b   :  { %v3034_v56 = vadd.f32 %v3033_v5, %v3032_v4  ;;  %3887 = vmatpush1.bf16.msra.mxu1 %v3886_v26  ;;  %v3908_v26 = vpack.c.bf16 %v1350_v45, %v1347_v41  ;;  %v1362_v5 = vld [vmem:[%s7105_s2 + $0x1190] sm:$0xff]  ;;  %v1397_v45 = vld [vmem:[%s7105_s2 + $0x12a8] sm:$0xff] }
 0x20c   :  { %3889 = vmatprep.subr.bf16.mxu1 %v3888_v50  ;;  %v1353_v50 = vld [vmem:[%s7105_s2 + $0x1148] sm:$0xff]  ;;  %v3916_v14 = vpack.c.bf16 %v1362_v5, %v1359_v44  ;;  %v1394_v41 = vld [vmem:[%s7105_s2 + $0x1290] sm:$0xff] }
 0x20d   :  { %v6735_v0 = vadd.f32 %v3034_v56, %v6566_v30  ;;  %v2434_v30 = vld [vmem:[%s7106_s3 + $0xb8] sm:$0xff]  ;;  %v3912_v4 = vpack.c.bf16 %v1356_v1, %v1353_v50  ;;  %v1361_v56 = vld [vmem:[%s7105_s2 + $0x1188] sm:$0xff] }
 0x20e   :  { %v4170_v11 = vpack.c.bf16 %v2434_v30, %v2433_v6  ;;  %v3918_v53 = vpack.c.bf16 %v1361_v56, %v1358_v33  ;;  %v3922_v30 = vpack.c.bf16 %v1367_v57, %v1364_v55  ;;  %v2438_v33 = vld [vmem:[%s7106_s3 + $0xd8] sm:$0xff]  ;;  %v2455_v57 = vld [vmem:[%s7106_s3 + $0x160] sm:$0xff] }
 0x20f   :  { %3891 = vmatpush1.bf16.msra.mxu1 %v3890_v49  ;;  %v1365_v49 = vld [vmem:[%s7105_s2 + $0x11a8] sm:$0xff] }
 0x210   :  { %3893 = vmatprep.subr.bf16.mxu1 %v3892_v54  ;;  %4171 = vmatpush3.bf16.msra.mxu0 %v4170_v11  ;;  %v3920_v54 = vpack.c.bf16 %v1368_v52, %v1365_v49  ;;  %v1376_v11 = vld [vmem:[%s7105_s2 + $0x1200] sm:$0xff]  ;;  %v1405_v49 = vrot.slane %v6531_v62, %v5156_v23  ;;  %v1409_v52 = vrot.slane %v6531_v62, %v5164_v25  ;;  %v2457_v23 = vld [vmem:[%s7106_s3 + $0x170] sm:$0xff]  ;;  %v2458_v25 = vld [vmem:[%s7106_s3 + $0x178] sm:$0xff] }
 0x211   :  { %4173 = vmatprep.subr.bf16.mxu0 %v4172_v16  ;;  %v1383_v16 = vld [vmem:[%s7105_s2 + $0x1238] sm:$0xff]  ;;  %v4184_v62 = vpack.c.bf16 %v2458_v25, %v2457_v23 }
 0x212   :  { %v2785_v25 = vld [vmem:[%s7106_s3 + $0x218] sm:$0xff] }
 0x213   :  { %3895 = vmatpush1.bf16.msra.mxu1 %v3894_v17  ;;  %v3924_v17 = vpack.c.bf16 %v1374_v60, %v1371_v2 }
 0x214   :  { %3897 = vmatprep.subr.bf16.mxu1 %v3896_v9  ;;  %4175 = vmatpush3.bf16.msra.mxu0 %v4174_v24  ;;  %v3936_v24 = vpack.c.bf16 %v1392_v46, %v1389_v38  ;;  %v2413_v38 = vld [vmem:[%s7106_s3 + $0x10] sm:$0xff]  ;;  %v2414_v46 = vld [vmem:[%s7106_s3 + $0x18] sm:$0xff] }
 0x217   :  { %3899 = vmatpush1.bf16.msra.mxu1 %v3898_v20  ;;  %v3932_v20 = vpack.c.bf16 %v1386_v48, %v1383_v16  ;;  %v2411_v48 = vld [vmem:[%s7106_s3] sm:$0xff] }
 0x218   :  { %3901 = vmatprep.subr.bf16.mxu1 %v3900_v21  ;;  %v1382_v21 = vld [vmem:[%s7105_s2 + $0x1230] sm:$0xff] }
 0x219   :  { %v3934_v29 = vpack.c.bf16 %v1385_v27, %v1382_v21 }
 0x21b   :  { %3903 = vmatpush1.bf16.msra.mxu1 %v3902_v15  ;;  %v1388_v15 = vld [vmem:[%s7105_s2 + $0x1260] sm:$0xff] }
 0x21c   :  { %3905 = vmatprep.subr.bf16.mxu1 %v3904_v31  ;;  %v1391_v31 = vld [vmem:[%s7105_s2 + $0x1278] sm:$0xff] }
 0x21f   :  { %3907 = vmatpush1.bf16.msra.mxu1 %v3906_v51  ;;  %v3942_v51 = vpack.c.bf16 %v1397_v45, %v1394_v41  ;;  %v2420_v41 = vld [vmem:[%s7106_s3 + $0x48] sm:$0xff] }
 0x220   :  { %3909 = vmatprep.subr.bf16.mxu1 %v3908_v26 }
 0x223   :  { %3911 = vmatpush1.bf16.msra.mxu1 %v3910_v47 }
 0x224   :  { %3913 = vmatprep.subr.bf16.mxu1 %v3912_v4 }
 0x227   :  { %3915 = vmatpush1.bf16.msra.mxu1 %v3914_v13  ;;  %v2453_v13 = vld [vmem:[%s7106_s3 + $0x150] sm:$0xff] }
 0x228   :  { %3917 = vmatprep.subr.bf16.mxu1 %v3916_v14  ;;  %v2437_v14 = vld [vmem:[%s7106_s3 + $0xd0] sm:$0xff] }
 0x229   :  { %v3067_v58 = vpop.f32.mrb[16].mxu0  ;;  %v4178_v56 = vpack.c.bf16 %v2438_v33, %v2437_v14 }
 0x22a   :  { %v3068_v63 = vpop.f32.mrb[17].mxu0 }
 0x22b   :  { %v3069_v6 = vadd.f32 %v3068_v63, %v3067_v58  ;;  %3919 = vmatpush1.bf16.msra.mxu1 %v3918_v53  ;;  %v2456_v58 = vld [vmem:[%s7106_s3 + $0x168] sm:$0xff] }
 0x22c   :  { %3921 = vmatprep.subr.bf16.mxu1 %v3920_v54  ;;  %v4181_v63 = vpack.c.bf16 %v2456_v58, %v2455_v57 }
 0x22d   :  { %v2195_v9 = vadd.f32 %v3069_v6, %v6735_v0  ;;  %v1379_v0 = vld [vmem:[%s7105_s2 + $0x1218] sm:$0xff] }
 0x22e   :  { %v3930_v39 = vpack.c.bf16 %v1379_v0, %v1376_v11  ;;  %v2465_v11 = vld [vmem:[%s7106_s3 + $0x1b0] sm:$0xff]  ;;  %v2466_v0 = vld [vmem:[%s7106_s3 + $0x1b8] sm:$0xff] }
 0x22f   :  { %3923 = vmatpush1.bf16.msra.mxu1 %v3922_v30  ;;  %v2459_v30 = vld [vmem:[%s7106_s3 + $0x180] sm:$0xff]  ;;  %v4196_v16 = vpack.c.bf16 %v2466_v0, %v2465_v11 }
 0x230   :  { %3925 = vmatprep.subr.bf16.mxu1 %v3924_v17  ;;  %v2460_v17 = vld [vmem:[%s7106_s3 + $0x188] sm:$0xff] }
 0x231   :  { %v4187_v35 = vpack.c.bf16 %v2460_v17, %v2459_v30  ;;  %v2787_v17 = vld [vmem:[%s7106_s3 + $0x228] sm:$0xff] }
 0x233   :  { %3927 = vmatpush1.bf16.msra.mxu1 %v3926_v8  ;;  %v2464_v8 = vld [vmem:[%s7106_s3 + $0x1a8] sm:$0xff] }
 0x234   :  { %3929 = vmatprep.subr.bf16.mxu1 %v3928_v12  ;;  %v4193_v12 = vpack.c.bf16 %v2464_v8, %v2463_v22  ;;  %v2913_v22 = vld [vmem:[%s7107_s4 + $0x11] ss:$0 sm:$0xff] }
 0x236   :  { %1841 = vmatmul.mubr.f32.vlgmr.msra.gmra.mrb[4].mxu1 %v797_v40  ;;  %v3938_v40 = vpack.c.bf16 %v1391_v31, %v1388_v15  ;;  %v2416_v15 = vld [vmem:[%s7106_s3 + $0x28] sm:$0xff] }
 0x237   :  { %3931 = vmatpush1.bf16.msra.mxu1 %v3930_v39  ;;  %1911 = vmatprep.mubr.f32.mxu1 %v4287_v7  ;;  %v2412_v39 = vld [vmem:[%s7106_s3 + $0x8] sm:$0xff] }
 0x238   :  { %3933 = vmatprep.subr.bf16.mxu1 %v3932_v20  ;;  %v2467_v20 = vld [vmem:[%s7106_s3 + $0x1c0] sm:$0xff]  ;;  %v4199_v21 = vpack.c.bf16 %v2412_v39, %v2411_v48 }
 0x23b   :  { %3935 = vmatpush1.bf16.msra.mxu1 %v3934_v29  ;;  %v4202_v29 = vpack.c.bf16 %v2414_v46, %v2413_v38 }
 0x23c   :  { %3937 = vmatprep.subr.bf16.mxu1 %v3936_v24  ;;  %v2415_v24 = vld [vmem:[%s7106_s3 + $0x20] sm:$0xff] }
 0x23d   :  { %v4205_v31 = vpack.c.bf16 %v2416_v15, %v2415_v24 }
 0x23f   :  { %3939 = vmatpush1.bf16.msra.mxu1 %v3938_v40  ;;  %v4208_v40 = vpack.c.bf16 %v2418_v32, %v2417_v34 }
 0x240   :  { %3941 = vmatprep.subr.bf16.mxu1 %v3940_v37  ;;  %v2419_v37 = vld [vmem:[%s7106_s3 + $0x40] sm:$0xff] }
 0x241   :  { %v4211_v45 = vpack.c.bf16 %v2420_v41, %v2419_v37 }
 0x243   :  { %3943 = vmatpush1.bf16.msra.mxu1 %v3942_v51  ;;  %v2421_v51 = vld [vmem:[%s7106_s3 + $0x50] sm:$0xff] }
 0x246   :  { %2907 = vmatmul.mubr.msk.f32.vlgmr.msra.gmra.mrb[4].mxu1 %vm1417_vm5, %v799_v61  ;;  %v4176_v61 = vpack.c.bf16 %v2454_v59, %v2453_v13  ;;  %v2700_v13 = vld [vmem:[%s7106_s3 + $0x1f8] sm:$0xff]  ;;  %v2701_v59 = vld [vmem:[%s7106_s3 + $0x200] sm:$0xff] }
 0x248   :  { %4177 = vmatprep.subr.bf16.mxu0 %v4176_v61  ;;  %v4227_v61 = vpack.c.bf16 %v2701_v59, %v2700_v13 }
 0x249   :  { %v3102_v26 = vpop.f32.mrb[18].mxu0  ;;  %4179 = vmatpush3.bf16.msra.mxu0 %v4178_v56 }
 0x24a   :  { %v3103_v42 = vpop.f32.mrb[19].mxu0  ;;  %4180 = vmatprep.subr.bf16.mxu0 %v4289_v19 }
 0x24b   :  { %v3104_v43 = vadd.f32 %v3103_v42, %v3102_v26  ;;  %v2422_v26 = vld [vmem:[%s7106_s3 + $0x58] sm:$0xf] }
 0x24c   :  { %v4214_v42 = vpack.c.bf16 %v2422_v26, %v2421_v51 }
 0x24d   :  { %v2265_v50 = vadd.f32 %v3104_v43, %v2195_v9  ;;  %v2462_v9 = vld [vmem:[%s7106_s3 + $0x198] sm:$0xff]  ;;  %v4262_v43 = vld [vmem:[%s7103_s0] sm:$0x3] }
 0x24e   :  { %v4190_v10 = vpack.c.bf16 %v2462_v9, %v2461_v28  ;;  %v2789_v28 = vld [vmem:[%s7106_s3 + $0x238] sm:$0xff]  ;;  %v2790_v9 = vld [vmem:[%s7106_s3 + $0x240] sm:$0xff] }
 0x26a   :  { %v3137_v1 = vpop.f32.mrb[20].mxu0 }
 0x26b   :  { %v3138_v47 = vpop.f32.mrb[21].mxu0 }
 0x26c   :  { %v3139_v4 = vadd.f32 %v3138_v47, %v3137_v1  ;;  %v2696_v1 = vld [vmem:[%s7106_s3 + $0x1d8] sm:$0xff] }
 0x26e   :  { %v2335_v3 = vadd.f32 %v3139_v4, %v2265_v50  ;;  %v2694_v50 = vld [vmem:[%s7106_s3 + $0x1c8] sm:$0xff]  ;;  %v2697_v4 = vld [vmem:[%s7106_s3 + $0x1e0] sm:$0xff] }
 0x26f   :  { %v4218_v47 = vpack.c.bf16 %v2695_v36, %v2694_v50 }
 0x27a   :  { %v2404_v18 = vpop.f32.mrb[22].mxu0 }
 0x27b   :  { %v2405_v44 = vadd.f32 %v2404_v18, %v2335_v3  ;;  %v3274_v5 = vpop.f32.mrb[23].mxu0  ;;  %v4221_v3 = vpack.c.bf16 %v2697_v4, %v2696_v1  ;;  %v2698_v18 = vld [vmem:[%s7106_s3 + $0x1e8] sm:$0xff] }
 0x27d   :  { %v2410_v27 = vmax.f32 %v2405_v44, 0.0  ;;  %v2699_v44 = vld [vmem:[%s7106_s3 + $0x1f0] sm:$0xff] }
 0x27e   :  { %v4224_v5 = vpack.c.bf16 %v2699_v44, %v2698_v18 }
 0x319   :  { %v1913_v53 = vpop.f32.mrb[4].mxu1 }
 0x31a   :  { %v4241_v54 = vadd.f32 %v1913_v53, %v1405_v49  ;;  %v1915_v55 = vpop.f32.mrb[5].mxu1 }
 0x31b   :  { %v4242_v2 = vadd.f32 %v1915_v55, %v1409_v52  ;;  %v2912_v55 = vld [vmem:[%s7107_s4 + $0x10] ss:$0 sm:$0xff] }
 0x31c   :  { %v2408_v6 = vmax.f32 %v4241_v54, 0.0 }
 0x31d   :  { %v2409_v60 = vmax.f32 %v4242_v2, 0.0  ;;  %v2783_v2 = vld [vmem:[%s7106_s3 + $0x208] sm:$0xff] }
 0x31f   :  { %2536 = vmatprep.mubr.f32.mxu0 %v2409_v60  ;;  %v2784_v60 = vld [vmem:[%s7106_s3 + $0x210] sm:$0xff] }
 0x320   :  { %2537 = vmatmul.mubr.f32.vlgmr.msra.gmra.mrb[24].mxu0 %v2408_v6  ;;  %v4230_v6 = vpack.c.bf16 %v2784_v60, %v2783_v2 }
 0x321   :  { %4182 = vmatpush3.bf16.msra.mxu0 %v4181_v63  ;;  %3301 = vmatprep.mubr.msk.f32.mxu0 %vm4290_vm4, %v4287_v7 }
 0x322   :  { %4183 = vmatprep.subr.bf16.mxu0 %v4289_v19 }
 0x325   :  { %4185 = vmatpush3.bf16.msra.mxu0 %v4184_v62  ;;  %v2786_v62 = vld [vmem:[%s7106_s3 + $0x220] sm:$0xff] }
 0x326   :  { %4186 = vmatprep.subr.bf16.mxu0 %v4289_v19  ;;  %v4233_v30 = vpack.c.bf16 %v2786_v62, %v2785_v25 }
 0x329   :  { %4188 = vmatpush3.bf16.msra.mxu0 %v4187_v35 }
 0x32a   :  { %4189 = vmatprep.subr.bf16.mxu0 %v4289_v19 }
 0x32d   :  { %4191 = vmatpush3.bf16.msra.mxu0 %v4190_v10  ;;  %v4239_v10 = vpack.c.bf16 %v2790_v9, %v2789_v28 }
 0x32e   :  { %4192 = vmatprep.subr.bf16.mxu0 %v4289_v19 }
 0x331   :  { %4194 = vmatpush3.bf16.msra.mxu0 %v4193_v12 }
 0x332   :  { %4195 = vmatprep.subr.bf16.mxu0 %v4289_v19 }
 0x335   :  { %4197 = vmatpush3.bf16.msra.mxu0 %v4196_v16  ;;  %v2915_v16 = vld [vmem:[%s7107_s4 + $0x12] ss:$0 sm:$0xff] }
 0x336   :  { %3299 = vmatprep.subr.mxu0 %v4287_v7 }
 0x339   :  { %3300 = vmatpush3.msra.mxu0 %v2467_v20 }
 0x33a   :  { %3302 = vmatmul.mubr.msk.f32.vlgmr.msra.gmra.mrb[26].mxu0 %vm2468_vm6, %v2410_v27  ;;  %4198 = vmatprep.subr.bf16.mxu0 %v4289_v19 }
 0x33b   :  { %4200 = vmatpush3.bf16.msra.mxu0 %v4199_v21  ;;  %3328 = vmatprep.mubr.msk.f32.mxu0 %vm4290_vm4, %v4287_v7 }
 0x33c   :  { %4201 = vmatprep.subr.bf16.mxu0 %v4289_v19 }
 0x33f   :  { %4203 = vmatpush3.bf16.msra.mxu0 %v4202_v29 }
 0x340   :  { %4204 = vmatprep.subr.bf16.mxu0 %v4289_v19 }
 0x343   :  { %4206 = vmatpush3.bf16.msra.mxu0 %v4205_v31 }
 0x344   :  { %4207 = vmatprep.subr.bf16.mxu0 %v4289_v19 }
 0x347   :  { %4209 = vmatpush3.bf16.msra.mxu0 %v4208_v40 }
 0x348   :  { %4210 = vmatprep.subr.bf16.mxu0 %v4289_v19 }
 0x34b   :  { %4212 = vmatpush3.bf16.msra.mxu0 %v4211_v45 }
 0x34c   :  { %4213 = vmatprep.subr.bf16.mxu0 %v4289_v19 }
 0x34f   :  { %4216 = vmatpush3.bf16.msk.msra.mxu0 %vm4396_vm2, %v4214_v42 }
 0x350   :  { %4217 = vmatprep.subr.bf16.mxu0 %v4289_v19 }
 0x352   :  { %3329 = vmatmul.mubr.msk.f32.vlgmr.msra.gmra.mrb[28].mxu0 %vm247_vm3, %v4262_v43 }
 0x353   :  { %3347 = vmatprep.mubr.msk.f32.mxu0 %vm4290_vm4, %v4287_v7  ;;  %4219 = vmatpush3.bf16.msra.mxu0 %v4218_v47 }
 0x354   :  { %4220 = vmatprep.subr.bf16.mxu0 %v4289_v19 }
 0x357   :  { %4222 = vmatpush3.bf16.msra.mxu0 %v4221_v3 }
 0x358   :  { %4223 = vmatprep.subr.bf16.mxu0 %v4289_v19 }
 0x35b   :  { %4225 = vmatpush3.bf16.msra.mxu0 %v4224_v5 }
 0x35c   :  { %4226 = vmatprep.subr.bf16.mxu0 %v4289_v19 }
 0x35f   :  { %4228 = vmatpush3.bf16.msra.mxu0 %v4227_v61 }
 0x360   :  { %4229 = vmatprep.subr.bf16.mxu0 %v4289_v19 }
 0x3f3   :  { %v3181_v14 = vpop.f32.mrb[24].mxu0 }
 0x3f4   :  { %v3182_v33 = vpop.f32.mrb[25].mxu0 }
 0x3f5   :  { %v3183_v56 = vadd.f32 %v3182_v33, %v3181_v14 }
 0x40d   :  { %v2608_v49 = vpop.f32.mrb[26].mxu0 }
 0x40e   :  { %v2609_v52 = vadd.f32 %v3183_v56, %v2608_v49  ;;  %v3303_v53 = vpop.f32.mrb[27].mxu0 }
 0x425   :  { %v2681_v54 = vpop.f32.mrb[28].mxu0 }
 0x426   :  { %v2682_v57 = vadd.f32 %v2681_v54, %v2609_v52  ;;  %v3330_v58 = vpop.f32.mrb[29].mxu0 }
 0x428   :  { %v2692_v63 = vadd.f32 %v2912_v55, %v2682_v57 }
 0x42a   :  { %v2693_v23 = vmax.f32 %v2692_v63, 0.0 }
 0x42c   :  { %3348 = vmatmul.mubr.msk.f32.vlgmr.msra.gmra.mrb[30].mxu0 %vm1417_vm5, %v2693_v23 }
 0x42d   :  { %4231 = vmatpush3.bf16.msra.mxu0 %v4230_v6  ;;  %3366 = vmatprep.mubr.msk.f32.mxu0 %vm4290_vm4, %v4287_v7  ;;  %v2788_v7 = vld [vmem:[%s7106_s3 + $0x230] sm:$0xff]  ;;  %s4291_s3 = smov [#allocation2]  }
 0x42e   :  { %4232 = vmatprep.subr.bf16.mxu0 %v4289_v19  ;;  %v4236_v35 = vpack.c.bf16 %v2788_v7, %v2787_v17  ;;  %s2879_s12 = sshll.u32 %s4291_s3, 4  ;;  %s2880_s12 = int_to_ptr.vmem [resolvable:$true] %s2879_s12 }
 0x42f   :  { %s4263_s13 = scalar_lea.vmem %s2880_s12, 32  ;;  %p4268_p1 = scmp.lt.s32.totalorder %s2880_s12, %s2880_s12 }
 0x430   :  { %p4264_p0 = scmp.ne.s32.totalorder %s2880_s12, %s4263_s13  ;;  %p4269_p2 = scmp.lt.s32.totalorder %s4263_s13, %s4263_s13 }
 0x431   :  { %4234 = vmatpush3.bf16.msra.mxu0 %v4233_v30 }
 0x432   :  { %4235 = vmatprep.subr.bf16.mxu0 %v4289_v19  ;;  %p4270_p3 = por %p4269_p2, %p4268_p1 }
 0x434   :  { %p4271_p4 = pnand %p4270_p3, %p4264_p0 }
 0x435   :  { %4237 = vmatpush3.bf16.msra.mxu0 %v4236_v35 }
 0x436   :  { %4238 = vmatprep.subr.bf16.mxu0 %v4289_v19 }
 0x439   :  { %4240 = vmatpush3.bf16.msra.mxu0 %v4239_v10 }
 0x4ff   :  { %v2778_v8 = vpop.f32.mrb[30].mxu0 }
 0x500   :  { %v2779_v12 = vadd.f32 %v2913_v22, %v2778_v8  ;;  %v3349_v11 = vpop.f32.mrb[31].mxu0 }
 0x502   :  { %4260 = vtanh.f32 %v2779_v12 }
 0x50c   :  { %v4261_v0 = vpop.eup %4260 }
 0x50d   :  { %3367 = vmatmul.mubr.msk.f32.vlgmr.msra.gmra.mrb[32].mxu0 %vm1417_vm5, %v4261_v0 }
 0x5e0   :  { %v2867_v48 = vpop.f32.mrb[32].mxu0 }
 0x5e1   :  { %v2868_v19 = vadd.f32 %v2915_v16, %v2867_v48  ;;  %v3368_v39 = vpop.f32.mrb[33].mxu0 }
 0x5e3   :  { %2872 = vst.msk [vmem:[#allocation2] sm:$0x3] %vm2871_vm7, %v2868_v19 }
 0x5e4   :  { %4274 = shalt.err (!%p4271_p4)
}
 0x5e5   :  { %s4275_s16 = scalar_lea.hbm %s7108_s5, 32 }
 0x5e6   :  { %p4276_p5 = scmp.ne.s32.totalorder %s7108_s5, %s4275_s16  ;;  %p4279_p6 = scmp.lt.u32.totalorder %s4275_s16, %s7108_s5 }
 0x5e8   :  { %p4281_p7 = pnand %p4279_p6, %p4276_p5 }
 0x5ea   :  { %4284 = shalt.err (!%p4281_p7)
}
 0x5eb   :  { %2882 = dma.vmem_to_hbm [thread:$0]  %s2880_s12, 32, %s7108_s5, [#allocation3]  }
 0x5ec   :  { %4285 = dma.done.wait [#allocation3], 32  }
 0x5ed   :  { %4286 = vsyncadd [#allocation3], 4294967264 }
 0x5ee   :  { %2886 = vsyncpa [#allocation3], 1 }

</bundles_post_ra>
